<compile_context>
chip_gen: v7x
topology: tpu7x:2x2x1
jax: 0.10.0
libtpu: 0.0.40
codegen_flags: <defaults>
</compile_context>

<pallas_src>
import math
import functools

import jax
import jax.numpy as jnp
from jax.experimental import pallas as pl
from jax.experimental.pallas import tpu as pltpu


# ----------------------------------------------------------------------------
# Fused MLP kernel: all Linear(+ReLU) layers of one MLP in a single pallas_call
# ----------------------------------------------------------------------------

def _fused_mlp_kernel(*refs, num_layers, relus, num_extra_cols):
    """refs = (x_ref, [xe_ref, we_ref,] w0, b0, w1, b1, ..., o_ref).

    Weights are bf16, accumulation f32.  If num_extra_cols > 0 the first layer adds
    xe @ we (a tiny rank-`num_extra_cols` VPU update) so the main contraction stays
    a clean multiple of 128 (review: avoid the ragged 257-wide decoder input).
    """
    x_ref = refs[0]
    o_ref = refs[-1]
    if num_extra_cols:
        xe_ref, we_ref = refs[1], refs[2]
        base = 3
    else:
        base = 1

    h = x_ref[...]
    for i in range(num_layers):
        w_ref = refs[base + 2 * i]          # (din_i, dout_i) bf16
        b_ref = refs[base + 2 * i + 1]      # (1, dout_i)     f32
        acc = jnp.dot(h.astype(jnp.bfloat16), w_ref[...],
                      preferred_element_type=jnp.float32) + b_ref[...]
        if i == 0 and num_extra_cols:
            xe = xe_ref[...]                # (tm, de) f32
            we = we_ref[...]                # (de, d0) f32
            for j in range(num_extra_cols):          # de is tiny (dim_x); VPU update
                acc = acc + xe[:, j:j + 1] * we[j:j + 1, :]
        if relus[i]:
            acc = jnp.maximum(acc, 0.0)
        h = acc
    o_ref[...] = h.astype(o_ref.dtype)


def fused_mlp(x, layers, relus, extra=None, out_dtype=jnp.bfloat16):
    """Apply an entire MLP (list of (w, b)) in one row-tiled Pallas kernel."""
    assert len(layers) == len(relus)
    orig_shape = x.shape
    din = orig_shape[-1]
    d0 = layers[0][0].shape[1]
    dout = layers[-1][0].shape[1]

    x2 = x.reshape(-1, din)
    m = x2.shape[0]
    # 512-row tiles amortize per-step overhead better once the row count is large
    # (review: ~63% of HBM roofline at 256 vs ~85% at 512).
    tm_target = 512 if m >= 1024 else 256
    if m <= tm_target:
        # Give v7x's second TensorCore work when we can split cleanly (8-divisible tiles).
        tm = m // 2 if (m >= 16 and m % 16 == 0) else m
        mp = m
    else:
        tm = tm_target
        mp = pl.cdiv(m, tm) * tm
        if mp != m:                          # single pad per MLP (not per layer)
            x2 = jnp.pad(x2, ((0, mp - m), (0, 0)))

    flat_inputs = [x2]
    in_specs = [pl.BlockSpec((tm, din), lambda i: (i, 0))]

    num_extra_cols = 0
    if extra is not None:
        xe, we = extra                       # (..., de) activation, (de, d0) f32 weight
        de = xe.shape[-1]
        num_extra_cols = de
        xe2 = xe.reshape(-1, de).astype(jnp.float32)
        if mp != m:
            xe2 = jnp.pad(xe2, ((0, mp - m), (0, 0)))
        flat_inputs += [xe2, we]
        in_specs += [pl.BlockSpec((tm, de), lambda i: (i, 0)),
                     pl.BlockSpec((de, d0), lambda i: (0, 0))]

    for (w, b) in layers:                    # weights already bf16, biases (1, dout) f32
        dli, dlo = w.shape
        flat_inputs += [w, b]
        in_specs += [pl.BlockSpec((dli, dlo), lambda i: (0, 0)),
                     pl.BlockSpec((1, dlo), lambda i: (0, 0))]

    kernel = functools.partial(_fused_mlp_kernel, num_layers=len(layers),
                               relus=tuple(relus), num_extra_cols=num_extra_cols)
    out = pl.pallas_call(
        kernel,
        out_shape=jax.ShapeDtypeStruct((mp, dout), out_dtype),
        grid=(mp // tm,),
        in_specs=in_specs,
        out_specs=pl.BlockSpec((tm, dout), lambda i: (i, 0)),
        compiler_params=pltpu.CompilerParams(dimension_semantics=("parallel",)),
    )(*flat_inputs)
    if mp != m:
        out = out[:m]
    return out.reshape(orig_shape[:-1] + (dout,))


def apply_mlp(layers, x, final_relu=False):
    n = len(layers)
    relus = tuple((i < n - 1) or final_relu for i in range(n))
    return fused_mlp(x, layers, relus)


# ----------------------------------------------------------------------------
# Fused MultiHeadAttn kernels (QKV proj + heads-batched softmax attn + LN + FFN + LN)
# ----------------------------------------------------------------------------

def _attn_tail(q, k, v, wo_ref, bo_ref, g1_ref, b1_ref, g2_ref, b2_ref,
               num_heads, dim_out):
    """Heads-batched attention + residual LayerNorms + ReLU FFN.

    PyTorch semantics:
        attn = gather_h( softmax(q_h k_h^T / sqrt(dim_out)) v_h )
        out  = LN1(q + attn)
        out  = LN2(out + relu(fc_out(out)))
    """
    dh = dim_out // num_heads
    # NOTE: PyTorch source divides by sqrt(dim_out), not sqrt(dh).  Fold the scale into
    # q once (tq x 128 multiply) instead of scaling the (H, tq, Nk) logits.
    qb = (q * (1.0 / math.sqrt(dim_out))).astype(jnp.bfloat16)
    kb = k.astype(jnp.bfloat16)
    vb = v.astype(jnp.bfloat16)

    # Heads as a leading batch dim -> two batched MXU matmuls instead of 8 serialized
    # push/pop sequences and per-head masked partial stores.
    qh = jnp.stack([qb[:, h * dh:(h + 1) * dh] for h in range(num_heads)], axis=0)
    kh = jnp.stack([kb[:, h * dh:(h + 1) * dh] for h in range(num_heads)], axis=0)
    vh = jnp.stack([vb[:, h * dh:(h + 1) * dh] for h in range(num_heads)], axis=0)

    s = jnp.einsum('hqd,hkd->hqk', qh, kh,
                   preferred_element_type=jnp.float32)          # (H, tq, Nk) f32
    s = s - jnp.max(s, axis=-1, keepdims=True)
    e = jnp.exp(s)
    p = e * pl.reciprocal(jnp.sum(e, axis=-1, keepdims=True), approx=True)
    pv = jnp.einsum('hqk,hkd->hqd', p.astype(jnp.bfloat16), vh,
                    preferred_element_type=jnp.float32)         # (H, tq, dh) f32
    # Single lane-dense gather back to the full 128-wide vreg.
    attn = jnp.concatenate([pv[h] for h in range(num_heads)], axis=-1)  # (tq, D)

    def layer_norm(z, g, b):
        mu = jnp.mean(z, axis=-1, keepdims=True)
        var = jnp.mean((z - mu) ** 2, axis=-1, keepdims=True)
        return (z - mu) * jax.lax.rsqrt(var + 1e-5) * g + b

    out = layer_norm(q + attn, g1_ref[...], b1_ref[...])
    ff = jnp.dot(out.astype(jnp.bfloat16), wo_ref[...],
                 preferred_element_type=jnp.float32) + bo_ref[...]
    out = layer_norm(out + jnp.maximum(ff, 0.0), g2_ref[...], b2_ref[...])
    return out


def _mha_self_kernel(xq_ref, x_ref, wq_ref, wkv_ref, wo_ref, bo_ref,
                     g1_ref, b1_ref, g2_ref, b2_ref, o_ref, *, num_heads, dim_out):
    """Self-attention: fused (D, 2D) K/V projection -> 256-wide MXU output."""
    xq = xq_ref[0].astype(jnp.bfloat16)    # (tq, D)
    x = x_ref[0].astype(jnp.bfloat16)      # (Nk, D)
    q = jnp.dot(xq, wq_ref[...], preferred_element_type=jnp.float32)
    kv = jnp.dot(x, wkv_ref[...], preferred_element_type=jnp.float32)   # (Nk, 2D)
    k = kv[:, :dim_out]
    v = kv[:, dim_out:]
    out = _attn_tail(q, k, v, wo_ref, bo_ref, g1_ref, b1_ref, g2_ref, b2_ref,
                     num_heads, dim_out)
    o_ref[0] = out.astype(o_ref.dtype)


def _mha_cross_kernel(xq_ref, xk_ref, xv_ref, wq_ref, wk_ref, wv_ref, wo_ref, bo_ref,
                      g1_ref, b1_ref, g2_ref, b2_ref, o_ref, *, num_heads, dim_out):
    """Cross-attention: k and v come from different inputs -> separate projections."""
    q = jnp.dot(xq_ref[0].astype(jnp.bfloat16), wq_ref[...],
                preferred_element_type=jnp.float32)
    k = jnp.dot(xk_ref[0].astype(jnp.bfloat16), wk_ref[...],
                preferred_element_type=jnp.float32)
    v = jnp.dot(xv_ref[0].astype(jnp.bfloat16), wv_ref[...],
                preferred_element_type=jnp.float32)
    out = _attn_tail(q, k, v, wo_ref, bo_ref, g1_ref, b1_ref, g2_ref, b2_ref,
                     num_heads, dim_out)
    o_ref[0] = out.astype(o_ref.dtype)


def multi_head_attn(xq, xk, xv, params, num_heads=8, tq_target=256, self_attn=False):
    B, Nq, Dq = xq.shape
    _, Nk, Dk = xk.shape
    Dv = xv.shape[-1]
    D = params["wq"].shape[1]

    # Query-axis tiling keeps the per-block working set bounded; when there would be
    # only one grid step, split it so v7x's two TensorCores both get work.
    if Nq <= tq_target:
        tq = Nq // 2 if (B == 1 and Nq >= 16 and Nq % 16 == 0) else Nq
        nq_p = Nq
    else:
        tq = tq_target
        nq_p = pl.cdiv(Nq, tq) * tq
    xq_p = xq if nq_p == Nq else jnp.pad(xq, ((0, 0), (0, nq_p - Nq), (0, 0)))
    T = nq_p // tq
    # TODO(synk): for multi-thousand Nk, tile the KV axis with an online-softmax inner
    # loop (flash-style) so the full-Nk K/V + f32 logits stay under v7x's 64 MiB VMEM.

    def rep(shape):
        return pl.BlockSpec(shape, lambda b, t: (0, 0))

    common_specs = [rep((D, D)), rep((1, D)), rep((1, D)), rep((1, D)),
                    rep((1, D)), rep((1, D))]
    common_args = [params["wo"], params["bo"], params["g1"], params["b1"],
                   params["g2"], params["b2"]]

    if self_attn:
        kernel = functools.partial(_mha_self_kernel, num_heads=num_heads, dim_out=D)
        in_specs = [pl.BlockSpec((1, tq, Dq), lambda b, t: (b, t, 0)),
                    pl.BlockSpec((1, Nk, Dk), lambda b, t: (b, 0, 0)),
                    rep((Dq, D)), rep((Dk, 2 * D))] + common_specs
        args = [xq_p, xk, params["wq"], params["wkv"]] + common_args
    else:
        kernel = functools.partial(_mha_cross_kernel, num_heads=num_heads, dim_out=D)
        in_specs = [pl.BlockSpec((1, tq, Dq), lambda b, t: (b, t, 0)),
                    pl.BlockSpec((1, Nk, Dk), lambda b, t: (b, 0, 0)),
                    pl.BlockSpec((1, Nk, Dv), lambda b, t: (b, 0, 0)),
                    rep((Dq, D)), rep((Dk, D)), rep((Dv, D))] + common_specs
        args = [xq_p, xk, xv, params["wq"], params["wk"], params["wv"]] + common_args

    out = pl.pallas_call(
        kernel,
        out_shape=jax.ShapeDtypeStruct((B, nq_p, D), jnp.bfloat16),
        grid=(B, T),
        in_specs=in_specs,
        out_specs=pl.BlockSpec((1, tq, D), lambda b, t: (b, t, 0)),
        compiler_params=pltpu.CompilerParams(
            dimension_semantics=("parallel", "parallel")),
    )(*args)
    return out[:, :Nq] if nq_p != Nq else out


# ----------------------------------------------------------------------------
# Gaussian log-likelihood (plain XLA per perf review: lane-sparse as a kernel)
# ----------------------------------------------------------------------------

def gaussian_ll(mu, sigma, y):
    """Normal(mu, sigma).log_prob(y).sum(-1)  -> shape (B, N)."""
    logp = (-0.5 * math.log(2.0 * math.pi)
            - jnp.log(sigma)
            - 0.5 * jnp.square((y - mu) / sigma))
    return jnp.sum(logp, axis=-1)


# ----------------------------------------------------------------------------
# Parameter construction (deterministic, PyTorch-Linear-style init, bf16 weights ONCE)
# ----------------------------------------------------------------------------

def init_linear(key, din, dout, bias=True, w_dtype=jnp.bfloat16):
    k1, k2 = jax.random.split(key)
    bound = 1.0 / math.sqrt(din)
    w = jax.random.uniform(k1, (din, dout), jnp.float32, -bound, bound).astype(w_dtype)
    if bias:
        b = jax.random.uniform(k2, (1, dout), jnp.float32, -bound, bound)
    else:
        b = jnp.zeros((1, dout), jnp.float32)
    return w, b


def init_mlp(key, din, dhid, dout, depth):
    dims = [(din, dhid)] + [(dhid, dhid)] * (depth - 2) + [(dhid, dout)]
    keys = jax.random.split(key, len(dims))
    return [init_linear(k, a, b) for k, (a, b) in zip(keys, dims)]


def init_mha(key, dim_q, dim_k, dim_v, dim_out, fuse_kv=False):
    ks = jax.random.split(key, 4)
    wq, _ = init_linear(ks[0], dim_q, dim_out, bias=False)
    wk, _ = init_linear(ks[1], dim_k, dim_out, bias=False)
    wv, _ = init_linear(ks[2], dim_v, dim_out, bias=False)
    wo, bo = init_linear(ks[3], dim_out, dim_out, bias=True)
    p = dict(wq=wq, wo=wo, bo=bo,
             g1=jnp.ones((1, dim_out), jnp.float32),
             b1=jnp.zeros((1, dim_out), jnp.float32),
             g2=jnp.ones((1, dim_out), jnp.float32),
             b2=jnp.zeros((1, dim_out), jnp.float32))
    if fuse_kv:
        assert dim_k == dim_v
        p["wkv"] = jnp.concatenate([wk, wv], axis=1)   # (dim_k, 2*dim_out) bf16
    else:
        p["wk"], p["wv"] = wk, wv
    return p


def init_canp(key, dim_x=1, dim_y=1, dim_hid=128,
              enc_v_depth=4, enc_qk_depth=2, enc_pre_depth=4, enc_post_depth=2,
              dec_depth=3):
    ks = jax.random.split(key, 8)
    params = {}
    # enc1 = CrossAttnEncoder(self_attn=True)
    params["enc1_net_v"] = init_mlp(ks[0], dim_x + dim_y, dim_hid, dim_hid, enc_v_depth - 2)
    params["enc1_self_attn"] = init_mha(ks[1], dim_hid, dim_hid, dim_hid, dim_hid, fuse_kv=True)
    params["enc1_net_qk"] = init_mlp(ks[2], dim_x, dim_hid, dim_hid, enc_qk_depth)
    params["enc1_attn"] = init_mha(ks[3], dim_hid, dim_hid, dim_hid, dim_hid, fuse_kv=False)
    # enc2 = PoolingEncoder(self_attn=True)
    params["enc2_net_pre"] = init_mlp(ks[4], dim_x + dim_y, dim_hid, dim_hid, enc_pre_depth - 2)
    params["enc2_self_attn"] = init_mha(ks[5], dim_hid, dim_hid, dim_hid, dim_hid, fuse_kv=True)
    params["enc2_net_post"] = init_mlp(ks[6], dim_hid, dim_hid, dim_hid, enc_post_depth)
    # dec = Decoder(dim_enc = 2*dim_hid); first layer split into [encoded | xt] parts so
    # the Pallas contraction is a clean K=256 (no ragged 257-wide input).
    dim_enc = 2 * dim_hid
    din0 = dim_x + dim_enc
    dks = jax.random.split(ks[7], dec_depth)
    k1, k2 = jax.random.split(dks[0])
    bound0 = 1.0 / math.sqrt(din0)
    w0 = jax.random.uniform(k1, (din0, dim_hid), jnp.float32, -bound0, bound0)
    b0 = jax.random.uniform(k2, (1, dim_hid), jnp.float32, -bound0, bound0)
    hidden = [(w0[:dim_enc].astype(jnp.bfloat16), b0)]
    for k in dks[1:-1]:
        hidden.append(init_linear(k, dim_hid, dim_hid))
    w_last, b_last = init_linear(dks[-1], dim_hid, 2 * dim_y, w_dtype=jnp.float32)
    params["dec"] = dict(hidden=hidden, w0_extra=w0[dim_enc:],   # (dim_x, dim_hid) f32
                         w_last=w_last, b_last=b_last)
    return params


# ----------------------------------------------------------------------------
# CANP forward (plain-JAX glue around the Pallas kernels)
# ----------------------------------------------------------------------------

def cross_attn_encoder(params, xc, yc, xt):
    Nt = xt.shape[1]
    # Shared qk MLP: one fused launch over [xt ; xc] rows, split q/k afterwards.
    qk = apply_mlp(params["enc1_net_qk"], jnp.concatenate([xt, xc], axis=1))
    q, k = qk[:, :Nt], qk[:, Nt:]
    v = apply_mlp(params["enc1_net_v"], jnp.concatenate([xc, yc], -1))
    v = multi_head_attn(v, v, v, params["enc1_self_attn"], self_attn=True)
    return multi_head_attn(q, k, v, params["enc1_attn"], self_attn=False)


def pooling_encoder(params, xc, yc):
    # net_pre = Sequential(MLP(pre_depth-2), ReLU, SelfAttn)
    h = apply_mlp(params["enc2_net_pre"], jnp.concatenate([xc, yc], -1), final_relu=True)
    h = multi_head_attn(h, h, h, params["enc2_self_attn"], self_attn=True)
    # Mean over context points in XLA (standalone kernel is launch/DMA dominated).
    h = jnp.mean(h.astype(jnp.float32), axis=1)
    return apply_mlp(params["enc2_net_post"], h)


def decoder(dec, encoded, xt):
    hidden = dec["hidden"]
    h = fused_mlp(encoded, hidden, relus=(True,) * len(hidden),
                  extra=(xt, dec["w0_extra"]))
    # Final 2-wide projection + softplus in XLA: a 2-lane Pallas output would hit
    # masked partial stores and isn't worth a kernel (perf review).
    out = jnp.matmul(h.astype(jnp.float32), dec["w_last"]) + dec["b_last"]
    dy = out.shape[-1] // 2
    mu, sigma_raw = out[..., :dy], out[..., dy:]
    sigma = 0.1 + 0.9 * jax.nn.softplus(sigma_raw)
    return mu, sigma


def canp_predict(params, xc, yc, xt):
    theta1 = cross_attn_encoder(params, xc, yc, xt)             # (B, Nt, H) bf16
    theta2 = pooling_encoder(params, xc, yc)                    # (B, H)     bf16
    B, Nt, _ = theta1.shape
    theta2_rep = jnp.broadcast_to(theta2[:, None, :], (B, Nt, theta2.shape[-1]))
    encoded = jnp.concatenate([theta1, theta2_rep], -1)         # (B, Nt, 2H) bf16
    return decoder(params["dec"], encoded, xt)


def canp_forward(params, xc, yc, x, y, training=False):
    num_ctx = xc.shape[-2]
    mu, sigma = canp_predict(params, xc, yc, x)
    ll = gaussian_ll(mu, sigma, y)                              # (B, N)

    outs = {}
    if training:
        outs["loss"] = -jnp.mean(ll)
    else:
        outs["ctx_loss"] = jnp.mean(ll[..., :num_ctx])
        outs["tar_loss"] = jnp.mean(ll[..., num_ctx:])

    # TODO(synk): compute_nll() is not defined in the provided source; assumed to be the
    # per-point Gaussian log-likelihood summed over dim_y (identical to `ll`), so reuse it
    # instead of recomputing on slices.
    outs["ctx_ll"] = jnp.mean(ll[..., :num_ctx])
    outs["tar_ll"] = jnp.mean(ll[..., num_ctx:])
    return outs


# ----------------------------------------------------------------------------
# Example run
# ----------------------------------------------------------------------------

if __name__ == "__main__":
    key = jax.random.PRNGKey(0)
    kp, kxc, kyc, kxt, kyt = jax.random.split(key, 5)

    B, Nc, Nt = 2, 4, 4
    dim_x, dim_y, dim_hid = 1, 1, 128

    params = init_canp(kp, dim_x=dim_x, dim_y=dim_y, dim_hid=dim_hid)

    xc = jax.random.normal(kxc, (B, Nc, dim_x), jnp.float32)
    yc = jax.random.normal(kyc, (B, Nc, dim_y), jnp.float32)
    xt = jax.random.normal(kxt, (B, Nt, dim_x), jnp.float32)
    yt = jax.random.normal(kyt, (B, Nt, dim_y), jnp.float32)

    x = jnp.concatenate([xc, xt], axis=1)   # batch.x  (context + target)
    y = jnp.concatenate([yc, yt], axis=1)   # batch.y

    fwd = jax.jit(lambda p, a, b, c, d: canp_forward(p, a, b, c, d, training=False))
    outs = fwd(params, xc, yc, x, y)
    outs = jax.tree_util.tree_map(jax.block_until_ready, outs)

    for name in ("ctx_loss", "tar_loss", "ctx_ll", "tar_ll"):
        assert jnp.isfinite(outs[name]), name

    print("KERNEL_OK")
</pallas_src>

<mosaic_0001>
module attributes {stable_mosaic.version = 11 : i64} {
  func.func @_fused_mlp_kernel(%arg0: i32, %arg1: memref<24x1xf32, #tpu.memory_space<vmem>>, %arg2: memref<1x128xbf16, #tpu.memory_space<vmem>>, %arg3: memref<1x128xf32, #tpu.memory_space<vmem>>, %arg4: memref<128x128xbf16, #tpu.memory_space<vmem>>, %arg5: memref<1x128xf32, #tpu.memory_space<vmem>>, %arg6: memref<24x128xbf16, #tpu.memory_space<vmem>>) attributes {dimension_semantics = [#tpu.dimension_semantics<parallel>], iteration_bounds = array<i64: 1>, scalar_prefetch = 0 : i64, scratch_operands = 0 : i64, tpu.core_type = #tpu.core_type<tc>, window_params = [{transform_indices = @transform_0, window_bounds = array<i64: 24, 1>}, {pipeline_mode = #tpu.pipeline_mode<synchronous>, transform_indices = @transform_1, window_bounds = array<i64: 1, 128>}, {pipeline_mode = #tpu.pipeline_mode<synchronous>, transform_indices = @transform_2, window_bounds = array<i64: 1, 128>}, {pipeline_mode = #tpu.pipeline_mode<synchronous>, transform_indices = @transform_3, window_bounds = array<i64: 128, 128>}, {pipeline_mode = #tpu.pipeline_mode<synchronous>, transform_indices = @transform_4, window_bounds = array<i64: 1, 128>}, {transform_indices = @transform_5, window_bounds = array<i64: 24, 128>}]} {
    %c0 = arith.constant 0 : index
    %c0_0 = arith.constant 0 : index
    %0 = vector.load %arg1[%c0, %c0_0] : memref<24x1xf32, #tpu.memory_space<vmem>>, vector<24x1xf32>
    %1 = arith.truncf %0 : vector<24x1xf32> to vector<24x1xbf16>
    %c0_1 = arith.constant 0 : index
    %c0_2 = arith.constant 0 : index
    %2 = vector.load %arg2[%c0_1, %c0_2] : memref<1x128xbf16, #tpu.memory_space<vmem>>, vector<1x128xbf16>
    %cst = arith.constant dense<0.000000e+00> : vector<24x128xf32>
    %3 = tpu.matmul %1, %2, %cst {dimension_numbers = #tpu.dot_dimension_numbers<[1], [0], [0], [1], [0, 0, 1, 1], [], []>} : vector<24x1xbf16>, vector<1x128xbf16>, vector<24x128xf32> -> vector<24x128xf32>
    %c0_3 = arith.constant 0 : index
    %c0_4 = arith.constant 0 : index
    %4 = vector.load %arg3[%c0_3, %c0_4] : memref<1x128xf32, #tpu.memory_space<vmem>>, vector<1x128xf32>
    %5 = vector.broadcast %4 : vector<1x128xf32> to vector<24x128xf32>
    %6 = arith.addf %3, %5 : vector<24x128xf32>
    %cst_5 = arith.constant 0.000000e+00 : f32
    %7 = vector.broadcast %cst_5 : f32 to vector<24x128xf32>
    %8 = arith.maximumf %6, %7 : vector<24x128xf32>
    %9 = arith.truncf %8 : vector<24x128xf32> to vector<24x128xbf16>
    %c0_6 = arith.constant 0 : index
    %c0_7 = arith.constant 0 : index
    %10 = vector.load %arg4[%c0_6, %c0_7] : memref<128x128xbf16, #tpu.memory_space<vmem>>, vector<128x128xbf16>
    %cst_8 = arith.constant dense<0.000000e+00> : vector<24x128xf32>
    %11 = tpu.matmul %9, %10, %cst_8 {dimension_numbers = #tpu.dot_dimension_numbers<[1], [0], [0], [1], [0, 0, 1, 1], [], []>} : vector<24x128xbf16>, vector<128x128xbf16>, vector<24x128xf32> -> vector<24x128xf32>
    %c0_9 = arith.constant 0 : index
    %c0_10 = arith.constant 0 : index
    %12 = vector.load %arg5[%c0_9, %c0_10] : memref<1x128xf32, #tpu.memory_space<vmem>>, vector<1x128xf32>
    %13 = vector.broadcast %12 : vector<1x128xf32> to vector<24x128xf32>
    %14 = arith.addf %11, %13 : vector<24x128xf32>
    %15 = arith.truncf %14 : vector<24x128xf32> to vector<24x128xbf16>
    %c0_11 = arith.constant 0 : index
    %c0_12 = arith.constant 0 : index
    %16 = vector.load %arg6[%c0_11, %c0_12] : memref<24x128xbf16, #tpu.memory_space<vmem>>, vector<24x128xbf16>
    tpu.vector_store %arg6[%c0_11, %c0_12], %15 {strides = array<i32>} : memref<24x128xbf16, #tpu.memory_space<vmem>>, vector<24x128xbf16>,
    return
  }
  func.func @transform_0(%arg0: i32) -> (i32, i32) {
    %c0_i32 = arith.constant 0 : i32
    %c0_i32_0 = arith.constant 0 : i32
    return %arg0, %c0_i32 : i32, i32
  }
  func.func @transform_1(%arg0: i32) -> (i32, i32) {
    %c0_i32 = arith.constant 0 : i32
    %c0_i32_0 = arith.constant 0 : i32
    %c0_i32_1 = arith.constant 0 : i32
    return %c0_i32, %c0_i32_0 : i32, i32
  }
  func.func @transform_2(%arg0: i32) -> (i32, i32) {
    %c0_i32 = arith.constant 0 : i32
    %c0_i32_0 = arith.constant 0 : i32
    %c0_i32_1 = arith.constant 0 : i32
    return %c0_i32, %c0_i32_0 : i32, i32
  }
  func.func @transform_3(%arg0: i32) -> (i32, i32) {
    %c0_i32 = arith.constant 0 : i32
    %c0_i32_0 = arith.constant 0 : i32
    %c0_i32_1 = arith.constant 0 : i32
    return %c0_i32, %c0_i32_0 : i32, i32
  }
  func.func @transform_4(%arg0: i32) -> (i32, i32) {
    %c0_i32 = arith.constant 0 : i32
    %c0_i32_0 = arith.constant 0 : i32
    %c0_i32_1 = arith.constant 0 : i32
    return %c0_i32, %c0_i32_0 : i32, i32
  }
  func.func @transform_5(%arg0: i32) -> (i32, i32) {
    %c0_i32 = arith.constant 0 : i32
    %c0_i32_0 = arith.constant 0 : i32
    return %arg0, %c0_i32 : i32, i32
  }
}

module attributes {stable_mosaic.version = 11 : i64} {
  func.func @_fused_mlp_kernel(%arg0: i32, %arg1: memref<8x2xf32, #tpu.memory_space<vmem>>, %arg2: memref<2x128xbf16, #tpu.memory_space<vmem>>, %arg3: memref<1x128xf32, #tpu.memory_space<vmem>>, %arg4: memref<128x128xbf16, #tpu.memory_space<vmem>>, %arg5: memref<1x128xf32, #tpu.memory_space<vmem>>, %arg6: memref<8x128xbf16, #tpu.memory_space<vmem>>) attributes {dimension_semantics = [#tpu.dimension_semantics<parallel>], iteration_bounds = array<i64: 1>, scalar_prefetch = 0 : i64, scratch_operands = 0 : i64, tpu.core_type = #tpu.core_type<tc>, window_params = [{transform_indices = @transform_0, window_bounds = array<i64: 8, 2>}, {pipeline_mode = #tpu.pipeline_mode<synchronous>, transform_indices = @transform_1, window_bounds = array<i64: 2, 128>}, {pipeline_mode = #tpu.pipeline_mode<synchronous>, transform_indices = @transform_2, window_bounds = array<i64: 1, 128>}, {pipeline_mode = #tpu.pipeline_mode<synchronous>, transform_indices = @transform_3, window_bounds = array<i64: 128, 128>}, {pipeline_mode = #tpu.pipeline_mode<synchronous>, transform_indices = @transform_4, window_bounds = array<i64: 1, 128>}, {transform_indices = @transform_5, window_bounds = array<i64: 8, 128>}]} {
    %c0 = arith.constant 0 : index
    %c0_0 = arith.constant 0 : index
    %0 = vector.load %arg1[%c0, %c0_0] : memref<8x2xf32, #tpu.memory_space<vmem>>, vector<8x2xf32>
    %1 = arith.truncf %0 : vector<8x2xf32> to vector<8x2xbf16>
    %c0_1 = arith.constant 0 : index
    %c0_2 = arith.constant 0 : index
    %2 = vector.load %arg2[%c0_1, %c0_2] : memref<2x128xbf16, #tpu.memory_space<vmem>>, vector<2x128xbf16>
    %cst = arith.constant dense<0.000000e+00> : vector<8x128xf32>
    %3 = tpu.matmul %1, %2, %cst {dimension_numbers = #tpu.dot_dimension_numbers<[1], [0], [0], [1], [0, 0, 1, 1], [], []>} : vector<8x2xbf16>, vector<2x128xbf16>, vector<8x128xf32> -> vector<8x128xf32>
    %c0_3 = arith.constant 0 : index
    %c0_4 = arith.constant 0 : index
    %4 = vector.load %arg3[%c0_3, %c0_4] : memref<1x128xf32, #tpu.memory_space<vmem>>, vector<1x128xf32>
    %5 = vector.broadcast %4 : vector<1x128xf32> to vector<8x128xf32>
    %6 = arith.addf %3, %5 : vector<8x128xf32>
    %cst_5 = arith.constant 0.000000e+00 : f32
    %7 = vector.broadcast %cst_5 : f32 to vector<8x128xf32>
    %8 = arith.maximumf %6, %7 : vector<8x128xf32>
    %9 = arith.truncf %8 : vector<8x128xf32> to vector<8x128xbf16>
    %c0_6 = arith.constant 0 : index
    %c0_7 = arith.constant 0 : index
    %10 = vector.load %arg4[%c0_6, %c0_7] : memref<128x128xbf16, #tpu.memory_space<vmem>>, vector<128x128xbf16>
    %cst_8 = arith.constant dense<0.000000e+00> : vector<8x128xf32>
    %11 = tpu.matmul %9, %10, %cst_8 {dimension_numbers = #tpu.dot_dimension_numbers<[1], [0], [0], [1], [0, 0, 1, 1], [], []>} : vector<8x128xbf16>, vector<128x128xbf16>, vector<8x128xf32> -> vector<8x128xf32>
    %c0_9 = arith.constant 0 : index
    %c0_10 = arith.constant 0 : index
    %12 = vector.load %arg5[%c0_9, %c0_10] : memref<1x128xf32, #tpu.memory_space<vmem>>, vector<1x128xf32>
    %13 = vector.broadcast %12 : vector<1x128xf32> to vector<8x128xf32>
    %14 = arith.addf %11, %13 : vector<8x128xf32>
    %15 = arith.truncf %14 : vector<8x128xf32> to vector<8x128xbf16>
    %c0_11 = arith.constant 0 : index
    %c0_12 = arith.constant 0 : index
    %16 = vector.load %arg6[%c0_11, %c0_12] : memref<8x128xbf16, #tpu.memory_space<vmem>>, vector<8x128xbf16>
    tpu.vector_store %arg6[%c0_11, %c0_12], %15 {strides = array<i32>} : memref<8x128xbf16, #tpu.memory_space<vmem>>, vector<8x128xbf16>,
    return
  }
  func.func @transform_0(%arg0: i32) -> (i32, i32) {
    %c0_i32 = arith.constant 0 : i32
    %c0_i32_0 = arith.constant 0 : i32
    return %arg0, %c0_i32 : i32, i32
  }
  func.func @transform_1(%arg0: i32) -> (i32, i32) {
    %c0_i32 = arith.constant 0 : i32
    %c0_i32_0 = arith.constant 0 : i32
    %c0_i32_1 = arith.constant 0 : i32
    return %c0_i32, %c0_i32_0 : i32, i32
  }
  func.func @transform_2(%arg0: i32) -> (i32, i32) {
    %c0_i32 = arith.constant 0 : i32
    %c0_i32_0 = arith.constant 0 : i32
    %c0_i32_1 = arith.constant 0 : i32
    return %c0_i32, %c0_i32_0 : i32, i32
  }
  func.func @transform_3(%arg0: i32) -> (i32, i32) {
    %c0_i32 = arith.constant 0 : i32
    %c0_i32_0 = arith.constant 0 : i32
    %c0_i32_1 = arith.constant 0 : i32
    return %c0_i32, %c0_i32_0 : i32, i32
  }
  func.func @transform_4(%arg0: i32) -> (i32, i32) {
    %c0_i32 = arith.constant 0 : i32
    %c0_i32_0 = arith.constant 0 : i32
    %c0_i32_1 = arith.constant 0 : i32
    return %c0_i32, %c0_i32_0 : i32, i32
  }
  func.func @transform_5(%arg0: i32) -> (i32, i32) {
    %c0_i32 = arith.constant 0 : i32
    %c0_i32_0 = arith.constant 0 : i32
    return %arg0, %c0_i32 : i32, i32
  }
}

module attributes {stable_mosaic.version = 11 : i64} {
  func.func @_mha_cross_kernel(%arg0: i32, %arg1: i32, %arg2: memref<1x8x128xbf16, #tpu.memory_space<vmem>>, %arg3: memref<1x4x128xbf16, #tpu.memory_space<vmem>>, %arg4: memref<1x4x128xbf16, #tpu.memory_space<vmem>>, %arg5: memref<128x128xbf16, #tpu.memory_space<vmem>>, %arg6: memref<128x128xbf16, #tpu.memory_space<vmem>>, %arg7: memref<128x128xbf16, #tpu.memory_space<vmem>>, %arg8: memref<128x128xbf16, #tpu.memory_space<vmem>>, %arg9: memref<1x128xf32, #tpu.memory_space<vmem>>, %arg10: memref<1x128xf32, #tpu.memory_space<vmem>>, %arg11: memref<1x128xf32, #tpu.memory_space<vmem>>, %arg12: memref<1x128xf32, #tpu.memory_space<vmem>>, %arg13: memref<1x128xf32, #tpu.memory_space<vmem>>, %arg14: memref<1x8x128xbf16, #tpu.memory_space<vmem>>) attributes {dimension_semantics = [#tpu.dimension_semantics<parallel>, #tpu.dimension_semantics<parallel>], iteration_bounds = array<i64: 2, 1>, scalar_prefetch = 0 : i64, scratch_operands = 0 : i64, tpu.core_type = #tpu.core_type<tc>, window_params = [{transform_indices = @transform_0, window_bounds = array<i64: 1, 8, 128>}, {transform_indices = @transform_1, window_bounds = array<i64: 1, 4, 128>}, {transform_indices = @transform_2, window_bounds = array<i64: 1, 4, 128>}, {pipeline_mode = #tpu.pipeline_mode<synchronous>, transform_indices = @transform_3, window_bounds = array<i64: 128, 128>}, {pipeline_mode = #tpu.pipeline_mode<synchronous>, transform_indices = @transform_4, window_bounds = array<i64: 128, 128>}, {pipeline_mode = #tpu.pipeline_mode<synchronous>, transform_indices = @transform_5, window_bounds = array<i64: 128, 128>}, {pipeline_mode = #tpu.pipeline_mode<synchronous>, transform_indices = @transform_6, window_bounds = array<i64: 128, 128>}, {pipeline_mode = #tpu.pipeline_mode<synchronous>, transform_indices = @transform_7, window_bounds = array<i64: 1, 128>}, {pipeline_mode = #tpu.pipeline_mode<synchronous>, transform_indices = @transform_8, window_bounds = array<i64: 1, 128>}, {pipeline_mode = #tpu.pipeline_mode<synchronous>, transform_indices = @transform_9, window_bounds = array<i64: 1, 128>}, {pipeline_mode = #tpu.pipeline_mode<synchronous>, transform_indices = @transform_10, window_bounds = array<i64: 1, 128>}, {pipeline_mode = #tpu.pipeline_mode<synchronous>, transform_indices = @transform_11, window_bounds = array<i64: 1, 128>}, {transform_indices = @transform_12, window_bounds = array<i64: 1, 8, 128>}]} {
    %c0 = arith.constant 0 : index
    %c0_0 = arith.constant 0 : index
    %c0_1 = arith.constant 0 : index
    %0 = vector.load %arg2[%c0, %c0_0, %c0_1] : memref<1x8x128xbf16, #tpu.memory_space<vmem>>, vector<1x8x128xbf16>
    %1 = vector.shape_cast %0 : vector<1x8x128xbf16> to vector<8x128xbf16>
    %c0_2 = arith.constant 0 : index
    %c0_3 = arith.constant 0 : index
    %2 = vector.load %arg5[%c0_2, %c0_3] : memref<128x128xbf16, #tpu.memory_space<vmem>>, vector<128x128xbf16>
    %cst = arith.constant dense<0.000000e+00> : vector<8x128xf32>
    %3 = tpu.matmul %1, %2, %cst {dimension_numbers = #tpu.dot_dimension_numbers<[1], [0], [0], [1], [0, 0, 1, 1], [], []>} : vector<8x128xbf16>, vector<128x128xbf16>, vector<8x128xf32> -> vector<8x128xf32>
    %c0_4 = arith.constant 0 : index
    %c0_5 = arith.constant 0 : index
    %c0_6 = arith.constant 0 : index
    %4 = vector.load %arg3[%c0_4, %c0_5, %c0_6] : memref<1x4x128xbf16, #tpu.memory_space<vmem>>, vector<1x4x128xbf16>
    %5 = vector.shape_cast %4 : vector<1x4x128xbf16> to vector<4x128xbf16>
    %c0_7 = arith.constant 0 : index
    %c0_8 = arith.constant 0 : index
    %6 = vector.load %arg6[%c0_7, %c0_8] : memref<128x128xbf16, #tpu.memory_space<vmem>>, vector<128x128xbf16>
    %cst_9 = arith.constant dense<0.000000e+00> : vector<4x128xf32>
    %7 = tpu.matmul %5, %6, %cst_9 {dimension_numbers = #tpu.dot_dimension_numbers<[1], [0], [0], [1], [0, 0, 1, 1], [], []>} : vector<4x128xbf16>, vector<128x128xbf16>, vector<4x128xf32> -> vector<4x128xf32>
    %c0_10 = arith.constant 0 : index
    %c0_11 = arith.constant 0 : index
    %c0_12 = arith.constant 0 : index
    %8 = vector.load %arg4[%c0_10, %c0_11, %c0_12] : memref<1x4x128xbf16, #tpu.memory_space<vmem>>, vector<1x4x128xbf16>
    %9 = vector.shape_cast %8 : vector<1x4x128xbf16> to vector<4x128xbf16>
    %c0_13 = arith.constant 0 : index
    %c0_14 = arith.constant 0 : index
    %10 = vector.load %arg7[%c0_13, %c0_14] : memref<128x128xbf16, #tpu.memory_space<vmem>>, vector<128x128xbf16>
    %cst_15 = arith.constant dense<0.000000e+00> : vector<4x128xf32>
    %11 = tpu.matmul %9, %10, %cst_15 {dimension_numbers = #tpu.dot_dimension_numbers<[1], [0], [0], [1], [0, 0, 1, 1], [], []>} : vector<4x128xbf16>, vector<128x128xbf16>, vector<4x128xf32> -> vector<4x128xf32>
    %cst_16 = arith.constant 0.0883883461 : f32
    %12 = vector.broadcast %cst_16 : f32 to vector<8x128xf32>
    %13 = arith.mulf %3, %12 : vector<8x128xf32>
    %14 = arith.truncf %13 : vector<8x128xf32> to vector<8x128xbf16>
    %15 = arith.truncf %7 : vector<4x128xf32> to vector<4x128xbf16>
    %16 = arith.truncf %11 : vector<4x128xf32> to vector<4x128xbf16>
    %17 = vector.extract_strided_slice %14 {offsets = [0, 0], sizes = [8, 16], strides = [1, 1]} : vector<8x128xbf16> to vector<8x16xbf16>
    %18 = vector.extract_strided_slice %14 {offsets = [0, 16], sizes = [8, 16], strides = [1, 1]} : vector<8x128xbf16> to vector<8x16xbf16>
    %19 = vector.extract_strided_slice %14 {offsets = [0, 32], sizes = [8, 16], strides = [1, 1]} : vector<8x128xbf16> to vector<8x16xbf16>
    %20 = vector.extract_strided_slice %14 {offsets = [0, 48], sizes = [8, 16], strides = [1, 1]} : vector<8x128xbf16> to vector<8x16xbf16>
    %21 = vector.extract_strided_slice %14 {offsets = [0, 64], sizes = [8, 16], strides = [1, 1]} : vector<8x128xbf16> to vector<8x16xbf16>
    %22 = vector.extract_strided_slice %14 {offsets = [0, 80], sizes = [8, 16], strides = [1, 1]} : vector<8x128xbf16> to vector<8x16xbf16>
    %23 = vector.extract_strided_slice %14 {offsets = [0, 96], sizes = [8, 16], strides = [1, 1]} : vector<8x128xbf16> to vector<8x16xbf16>
    %24 = vector.extract_strided_slice %14 {offsets = [0, 112], sizes = [8, 16], strides = [1, 1]} : vector<8x128xbf16> to vector<8x16xbf16>
    %25 = vector.shape_cast %17 : vector<8x16xbf16> to vector<1x8x16xbf16>
    %26 = vector.shape_cast %18 : vector<8x16xbf16> to vector<1x8x16xbf16>
    %27 = vector.shape_cast %19 : vector<8x16xbf16> to vector<1x8x16xbf16>
    %28 = vector.shape_cast %20 : vector<8x16xbf16> to vector<1x8x16xbf16>
    %29 = vector.shape_cast %21 : vector<8x16xbf16> to vector<1x8x16xbf16>
    %30 = vector.shape_cast %22 : vector<8x16xbf16> to vector<1x8x16xbf16>
    %31 = vector.shape_cast %23 : vector<8x16xbf16> to vector<1x8x16xbf16>
    %32 = vector.shape_cast %24 : vector<8x16xbf16> to vector<1x8x16xbf16>
    %33 = tpu.concatenate %25, %26, %27, %28, %29, %30, %31, %32 in 0 : vector<1x8x16xbf16>, vector<1x8x16xbf16>, vector<1x8x16xbf16>, vector<1x8x16xbf16>, vector<1x8x16xbf16>, vector<1x8x16xbf16>, vector<1x8x16xbf16>, vector<1x8x16xbf16> -> vector<8x8x16xbf16>
    %34 = vector.extract_strided_slice %15 {offsets = [0, 0], sizes = [4, 16], strides = [1, 1]} : vector<4x128xbf16> to vector<4x16xbf16>
    %35 = vector.extract_strided_slice %15 {offsets = [0, 16], sizes = [4, 16], strides = [1, 1]} : vector<4x128xbf16> to vector<4x16xbf16>
    %36 = vector.extract_strided_slice %15 {offsets = [0, 32], sizes = [4, 16], strides = [1, 1]} : vector<4x128xbf16> to vector<4x16xbf16>
    %37 = vector.extract_strided_slice %15 {offsets = [0, 48], sizes = [4, 16], strides = [1, 1]} : vector<4x128xbf16> to vector<4x16xbf16>
    %38 = vector.extract_strided_slice %15 {offsets = [0, 64], sizes = [4, 16], strides = [1, 1]} : vector<4x128xbf16> to vector<4x16xbf16>
    %39 = vector.extract_strided_slice %15 {offsets = [0, 80], sizes = [4, 16], strides = [1, 1]} : vector<4x128xbf16> to vector<4x16xbf16>
    %40 = vector.extract_strided_slice %15 {offsets = [0, 96], sizes = [4, 16], strides = [1, 1]} : vector<4x128xbf16> to vector<4x16xbf16>
    %41 = vector.extract_strided_slice %15 {offsets = [0, 112], sizes = [4, 16], strides = [1, 1]} : vector<4x128xbf16> to vector<4x16xbf16>
    %42 = vector.shape_cast %34 : vector<4x16xbf16> to vector<1x4x16xbf16>
    %43 = vector.shape_cast %35 : vector<4x16xbf16> to vector<1x4x16xbf16>
    %44 = vector.shape_cast %36 : vector<4x16xbf16> to vector<1x4x16xbf16>
    %45 = vector.shape_cast %37 : vector<4x16xbf16> to vector<1x4x16xbf16>
    %46 = vector.shape_cast %38 : vector<4x16xbf16> to vector<1x4x16xbf16>
    %47 = vector.shape_cast %39 : vector<4x16xbf16> to vector<1x4x16xbf16>
    %48 = vector.shape_cast %40 : vector<4x16xbf16> to vector<1x4x16xbf16>
    %49 = vector.shape_cast %41 : vector<4x16xbf16> to vector<1x4x16xbf16>
    %50 = tpu.concatenate %42, %43, %44, %45, %46, %47, %48, %49 in 0 : vector<1x4x16xbf16>, vector<1x4x16xbf16>, vector<1x4x16xbf16>, vector<1x4x16xbf16>, vector<1x4x16xbf16>, vector<1x4x16xbf16>, vector<1x4x16xbf16>, vector<1x4x16xbf16> -> vector<8x4x16xbf16>
    %51 = vector.extract_strided_slice %16 {offsets = [0, 0], sizes = [4, 16], strides = [1, 1]} : vector<4x128xbf16> to vector<4x16xbf16>
    %52 = vector.extract_strided_slice %16 {offsets = [0, 16], sizes = [4, 16], strides = [1, 1]} : vector<4x128xbf16> to vector<4x16xbf16>
    %53 = vector.extract_strided_slice %16 {offsets = [0, 32], sizes = [4, 16], strides = [1, 1]} : vector<4x128xbf16> to vector<4x16xbf16>
    %54 = vector.extract_strided_slice %16 {offsets = [0, 48], sizes = [4, 16], strides = [1, 1]} : vector<4x128xbf16> to vector<4x16xbf16>
    %55 = vector.extract_strided_slice %16 {offsets = [0, 64], sizes = [4, 16], strides = [1, 1]} : vector<4x128xbf16> to vector<4x16xbf16>
    %56 = vector.extract_strided_slice %16 {offsets = [0, 80], sizes = [4, 16], strides = [1, 1]} : vector<4x128xbf16> to vector<4x16xbf16>
    %57 = vector.extract_strided_slice %16 {offsets = [0, 96], sizes = [4, 16], strides = [1, 1]} : vector<4x128xbf16> to vector<4x16xbf16>
    %58 = vector.extract_strided_slice %16 {offsets = [0, 112], sizes = [4, 16], strides = [1, 1]} : vector<4x128xbf16> to vector<4x16xbf16>
    %59 = vector.shape_cast %51 : vector<4x16xbf16> to vector<1x4x16xbf16>
    %60 = vector.shape_cast %52 : vector<4x16xbf16> to vector<1x4x16xbf16>
    %61 = vector.shape_cast %53 : vector<4x16xbf16> to vector<1x4x16xbf16>
    %62 = vector.shape_cast %54 : vector<4x16xbf16> to vector<1x4x16xbf16>
    %63 = vector.shape_cast %55 : vector<4x16xbf16> to vector<1x4x16xbf16>
    %64 = vector.shape_cast %56 : vector<4x16xbf16> to vector<1x4x16xbf16>
    %65 = vector.shape_cast %57 : vector<4x16xbf16> to vector<1x4x16xbf16>
    %66 = vector.shape_cast %58 : vector<4x16xbf16> to vector<1x4x16xbf16>
    %67 = tpu.concatenate %59, %60, %61, %62, %63, %64, %65, %66 in 0 : vector<1x4x16xbf16>, vector<1x4x16xbf16>, vector<1x4x16xbf16>, vector<1x4x16xbf16>, vector<1x4x16xbf16>, vector<1x4x16xbf16>, vector<1x4x16xbf16>, vector<1x4x16xbf16> -> vector<8x4x16xbf16>
    "tpu.trace_start"() <{level = 10 : i32, message = "hqd,hkd->hqk"}> : () -> ()
    %cst_17 = arith.constant dense<0.000000e+00> : vector<8x8x4xf32>
    %68 = tpu.matmul %33, %50, %cst_17 {dimension_numbers = #tpu.dot_dimension_numbers<[2], [2], [1], [1], [0, 0, 0, 1, 1, 1], [0], [0]>} : vector<8x8x16xbf16>, vector<8x4x16xbf16>, vector<8x8x4xf32> -> vector<8x8x4xf32>
    "tpu.trace_stop"() : () -> ()
    %cst_18 = arith.constant dense<0xFF800000> : vector<8x8xf32>
    %69 = vector.multi_reduction <maximumf>, %68, %cst_18 [2] : vector<8x8x4xf32> to vector<8x8xf32>
    %70 = vector.shape_cast %69 : vector<8x8xf32> to vector<8x8x1xf32>
    %71 = vector.broadcast %70 : vector<8x8x1xf32> to vector<8x8x4xf32>
    %72 = arith.subf %68, %71 : vector<8x8x4xf32>
    %73 = math.exp %72 : vector<8x8x4xf32>
    %cst_19 = arith.constant dense<0.000000e+00> : vector<8x8xf32>
    %74 = vector.multi_reduction <add>, %73, %cst_19 [2] : vector<8x8x4xf32> to vector<8x8xf32>
    %75 = vector.shape_cast %74 : vector<8x8xf32> to vector<8x8x1xf32>
    %76 = tpu.reciprocal %75 {approx = true} : vector<8x8x1xf32> -> vector<8x8x1xf32>
    %77 = vector.broadcast %76 : vector<8x8x1xf32> to vector<8x8x4xf32>
    %78 = arith.mulf %73, %77 : vector<8x8x4xf32>
    %79 = arith.truncf %78 : vector<8x8x4xf32> to vector<8x8x4xbf16>
    "tpu.trace_start"() <{level = 10 : i32, message = "hqk,hkd->hqd"}> : () -> ()
    %cst_20 = arith.constant dense<0.000000e+00> : vector<8x8x16xf32>
    %80 = tpu.matmul %79, %67, %cst_20 {dimension_numbers = #tpu.dot_dimension_numbers<[2], [1], [1], [2], [0, 0, 0, 1, 1, 2], [0], [0]>} : vector<8x8x4xbf16>, vector<8x4x16xbf16>, vector<8x8x16xf32> -> vector<8x8x16xf32>
    "tpu.trace_stop"() : () -> ()
    %81 = vector.extract_strided_slice %80 {offsets = [0, 0, 0], sizes = [1, 8, 16], strides = [1, 1, 1]} : vector<8x8x16xf32> to vector<1x8x16xf32>
    %82 = vector.shape_cast %81 : vector<1x8x16xf32> to vector<8x16xf32>
    %83 = vector.extract_strided_slice %80 {offsets = [1, 0, 0], sizes = [1, 8, 16], strides = [1, 1, 1]} : vector<8x8x16xf32> to vector<1x8x16xf32>
    %84 = vector.shape_cast %83 : vector<1x8x16xf32> to vector<8x16xf32>
    %85 = vector.extract_strided_slice %80 {offsets = [2, 0, 0], sizes = [1, 8, 16], strides = [1, 1, 1]} : vector<8x8x16xf32> to vector<1x8x16xf32>
    %86 = vector.shape_cast %85 : vector<1x8x16xf32> to vector<8x16xf32>
    %87 = vector.extract_strided_slice %80 {offsets = [3, 0, 0], sizes = [1, 8, 16], strides = [1, 1, 1]} : vector<8x8x16xf32> to vector<1x8x16xf32>
    %88 = vector.shape_cast %87 : vector<1x8x16xf32> to vector<8x16xf32>
    %89 = vector.extract_strided_slice %80 {offsets = [4, 0, 0], sizes = [1, 8, 16], strides = [1, 1, 1]} : vector<8x8x16xf32> to vector<1x8x16xf32>
    %90 = vector.shape_cast %89 : vector<1x8x16xf32> to vector<8x16xf32>
    %91 = vector.extract_strided_slice %80 {offsets = [5, 0, 0], sizes = [1, 8, 16], strides = [1, 1, 1]} : vector<8x8x16xf32> to vector<1x8x16xf32>
    %92 = vector.shape_cast %91 : vector<1x8x16xf32> to vector<8x16xf32>
    %93 = vector.extract_strided_slice %80 {offsets = [6, 0, 0], sizes = [1, 8, 16], strides = [1, 1, 1]} : vector<8x8x16xf32> to vector<1x8x16xf32>
    %94 = vector.shape_cast %93 : vector<1x8x16xf32> to vector<8x16xf32>
    %95 = vector.extract_strided_slice %80 {offsets = [7, 0, 0], sizes = [1, 8, 16], strides = [1, 1, 1]} : vector<8x8x16xf32> to vector<1x8x16xf32>
    %96 = vector.shape_cast %95 : vector<1x8x16xf32> to vector<8x16xf32>
    %97 = tpu.concatenate %82, %84, %86, %88, %90, %92, %94, %96 in 1 : vector<8x16xf32>, vector<8x16xf32>, vector<8x16xf32>, vector<8x16xf32>, vector<8x16xf32>, vector<8x16xf32>, vector<8x16xf32>, vector<8x16xf32> -> vector<8x128xf32>
    %98 = arith.addf %3, %97 : vector<8x128xf32>
    %c0_21 = arith.constant 0 : index
    %c0_22 = arith.constant 0 : index
    %99 = vector.load %arg10[%c0_21, %c0_22] : memref<1x128xf32, #tpu.memory_space<vmem>>, vector<1x128xf32>
    %c0_23 = arith.constant 0 : index
    %c0_24 = arith.constant 0 : index
    %100 = vector.load %arg11[%c0_23, %c0_24] : memref<1x128xf32, #tpu.memory_space<vmem>>, vector<1x128xf32>
    %cst_25 = arith.constant dense<0.000000e+00> : vector<8xf32>
    %101 = vector.multi_reduction <add>, %98, %cst_25 [1] : vector<8x128xf32> to vector<8xf32>
    %102 = vector.shape_cast %101 : vector<8xf32> to vector<8x1xf32>
    %cst_26 = arith.constant 1.280000e+02 : f32
    %103 = vector.broadcast %cst_26 : f32 to vector<8x1xf32>
    %104 = arith.divf %102, %103 : vector<8x1xf32>
    %105 = vector.broadcast %104 : vector<8x1xf32> to vector<8x128xf32>
    %106 = arith.subf %98, %105 : vector<8x128xf32>
    %107 = arith.mulf %106, %106 : vector<8x128xf32>
    %cst_27 = arith.constant dense<0.000000e+00> : vector<8xf32>
    %108 = vector.multi_reduction <add>, %107, %cst_27 [1] : vector<8x128xf32> to vector<8xf32>
    %109 = vector.shape_cast %108 : vector<8xf32> to vector<8x1xf32>
    %cst_28 = arith.constant 1.280000e+02 : f32
    %110 = vector.broadcast %cst_28 : f32 to vector<8x1xf32>
    %111 = arith.divf %109, %110 : vector<8x1xf32>
    %112 = vector.broadcast %104 : vector<8x1xf32> to vector<8x128xf32>
    %113 = arith.subf %98, %112 : vector<8x128xf32>
    %cst_29 = arith.constant 9.99999974E-6 : f32
    %114 = vector.broadcast %cst_29 : f32 to vector<8x1xf32>
    %115 = arith.addf %111, %114 : vector<8x1xf32>
    %116 = math.rsqrt %115 : vector<8x1xf32>
    %117 = vector.broadcast %116 : vector<8x1xf32> to vector<8x128xf32>
    %118 = arith.mulf %113, %117 : vector<8x128xf32>
    %119 = vector.broadcast %99 : vector<1x128xf32> to vector<8x128xf32>
    %120 = arith.mulf %118, %119 : vector<8x128xf32>
    %121 = vector.broadcast %100 : vector<1x128xf32> to vector<8x128xf32>
    %122 = arith.addf %120, %121 : vector<8x128xf32>
    %123 = arith.truncf %122 : vector<8x128xf32> to vector<8x128xbf16>
    %c0_30 = arith.constant 0 : index
    %c0_31 = arith.constant 0 : index
    %124 = vector.load %arg8[%c0_30, %c0_31] : memref<128x128xbf16, #tpu.memory_space<vmem>>, vector<128x128xbf16>
    %cst_32 = arith.constant dense<0.000000e+00> : vector<8x128xf32>
    %125 = tpu.matmul %123, %124, %cst_32 {dimension_numbers = #tpu.dot_dimension_numbers<[1], [0], [0], [1], [0, 0, 1, 1], [], []>} : vector<8x128xbf16>, vector<128x128xbf16>, vector<8x128xf32> -> vector<8x128xf32>
    %c0_33 = arith.constant 0 : index
    %c0_34 = arith.constant 0 : index
    %126 = vector.load %arg9[%c0_33, %c0_34] : memref<1x128xf32, #tpu.memory_space<vmem>>, vector<1x128xf32>
    %127 = vector.broadcast %126 : vector<1x128xf32> to vector<8x128xf32>
    %128 = arith.addf %125, %127 : vector<8x128xf32>
    %cst_35 = arith.constant 0.000000e+00 : f32
    %129 = vector.broadcast %cst_35 : f32 to vector<8x128xf32>
    %130 = arith.maximumf %128, %129 : vector<8x128xf32>
    %131 = arith.addf %122, %130 : vector<8x128xf32>
    %c0_36 = arith.constant 0 : index
    %c0_37 = arith.constant 0 : index
    %132 = vector.load %arg12[%c0_36, %c0_37] : memref<1x128xf32, #tpu.memory_space<vmem>>, vector<1x128xf32>
    %c0_38 = arith.constant 0 : index
    %c0_39 = arith.constant 0 : index
    %133 = vector.load %arg13[%c0_38, %c0_39] : memref<1x128xf32, #tpu.memory_space<vmem>>, vector<1x128xf32>
    %cst_40 = arith.constant dense<0.000000e+00> : vector<8xf32>
    %134 = vector.multi_reduction <add>, %131, %cst_40 [1] : vector<8x128xf32> to vector<8xf32>
    %135 = vector.shape_cast %134 : vector<8xf32> to vector<8x1xf32>
    %cst_41 = arith.constant 1.280000e+02 : f32
    %136 = vector.broadcast %cst_41 : f32 to vector<8x1xf32>
    %137 = arith.divf %135, %136 : vector<8x1xf32>
    %138 = vector.broadcast %137 : vector<8x1xf32> to vector<8x128xf32>
    %139 = arith.subf %131, %138 : vector<8x128xf32>
    %140 = arith.mulf %139, %139 : vector<8x128xf32>
    %cst_42 = arith.constant dense<0.000000e+00> : vector<8xf32>
    %141 = vector.multi_reduction <add>, %140, %cst_42 [1] : vector<8x128xf32> to vector<8xf32>
    %142 = vector.shape_cast %141 : vector<8xf32> to vector<8x1xf32>
    %cst_43 = arith.constant 1.280000e+02 : f32
    %143 = vector.broadcast %cst_43 : f32 to vector<8x1xf32>
    %144 = arith.divf %142, %143 : vector<8x1xf32>
    %145 = vector.broadcast %137 : vector<8x1xf32> to vector<8x128xf32>
    %146 = arith.subf %131, %145 : vector<8x128xf32>
    %cst_44 = arith.constant 9.99999974E-6 : f32
    %147 = vector.broadcast %cst_44 : f32 to vector<8x1xf32>
    %148 = arith.addf %144, %147 : vector<8x1xf32>
    %149 = math.rsqrt %148 : vector<8x1xf32>
    %150 = vector.broadcast %149 : vector<8x1xf32> to vector<8x128xf32>
    %151 = arith.mulf %146, %150 : vector<8x128xf32>
    %152 = vector.broadcast %132 : vector<1x128xf32> to vector<8x128xf32>
    %153 = arith.mulf %151, %152 : vector<8x128xf32>
    %154 = vector.broadcast %133 : vector<1x128xf32> to vector<8x128xf32>
    %155 = arith.addf %153, %154 : vector<8x128xf32>
    %156 = arith.truncf %155 : vector<8x128xf32> to vector<8x128xbf16>
    %c0_45 = arith.constant 0 : index
    %c0_46 = arith.constant 0 : index
    %c0_47 = arith.constant 0 : index
    %157 = vector.load %arg14[%c0_45, %c0_46, %c0_47] : memref<1x8x128xbf16, #tpu.memory_space<vmem>>, vector<1x8x128xbf16>
    %158 = vector.shape_cast %157 : vector<1x8x128xbf16> to vector<8x128xbf16>
    %159 = vector.shape_cast %156 : vector<8x128xbf16> to vector<1x8x128xbf16>
    tpu.vector_store %arg14[%c0_45, %c0_46, %c0_47], %159 {strides = array<i32>} : memref<1x8x128xbf16, #tpu.memory_space<vmem>>, vector<1x8x128xbf16>,
    return
  }
  func.func @transform_0(%arg0: i32, %arg1: i32) -> (i32, i32, i32) {
    %c0_i32 = arith.constant 0 : i32
    %c0_i32_0 = arith.constant 0 : i32
    return %arg0, %arg1, %c0_i32 : i32, i32, i32
  }
  func.func @transform_1(%arg0: i32, %arg1: i32) -> (i32, i32, i32) {
    %c0_i32 = arith.constant 0 : i32
    %c0_i32_0 = arith.constant 0 : i32
    %c0_i32_1 = arith.constant 0 : i32
    return %arg0, %c0_i32, %c0_i32_0 : i32, i32, i32
  }
  func.func @transform_2(%arg0: i32, %arg1: i32) -> (i32, i32, i32) {
    %c0_i32 = arith.constant 0 : i32
    %c0_i32_0 = arith.constant 0 : i32
    %c0_i32_1 = arith.constant 0 : i32
    return %arg0, %c0_i32, %c0_i32_0 : i32, i32, i32
  }
  func.func @transform_3(%arg0: i32, %arg1: i32) -> (i32, i32) {
    %c0_i32 = arith.constant 0 : i32
    %c0_i32_0 = arith.constant 0 : i32
    %c0_i32_1 = arith.constant 0 : i32
    return %c0_i32, %c0_i32_0 : i32, i32
  }
  func.func @transform_4(%arg0: i32, %arg1: i32) -> (i32, i32) {
    %c0_i32 = arith.constant 0 : i32
    %c0_i32_0 = arith.constant 0 : i32
    %c0_i32_1 = arith.constant 0 : i32
    return %c0_i32, %c0_i32_0 : i32, i32
  }
  func.func @transform_5(%arg0: i32, %arg1: i32) -> (i32, i32) {
    %c0_i32 = arith.constant 0 : i32
    %c0_i32_0 = arith.constant 0 : i32
    %c0_i32_1 = arith.constant 0 : i32
    return %c0_i32, %c0_i32_0 : i32, i32
  }
  func.func @transform_6(%arg0: i32, %arg1: i32) -> (i32, i32) {
    %c0_i32 = arith.constant 0 : i32
    %c0_i32_0 = arith.constant 0 : i32
    %c0_i32_1 = arith.constant 0 : i32
    return %c0_i32, %c0_i32_0 : i32, i32
  }
  func.func @transform_7(%arg0: i32, %arg1: i32) -> (i32, i32) {
    %c0_i32 = arith.constant 0 : i32
    %c0_i32_0 = arith.constant 0 : i32
    %c0_i32_1 = arith.constant 0 : i32
    return %c0_i32, %c0_i32_0 : i32, i32
  }
  func.func @transform_8(%arg0: i32, %arg1: i32) -> (i32, i32) {
    %c0_i32 = arith.constant 0 : i32
    %c0_i32_0 = arith.constant 0 : i32
    %c0_i32_1 = arith.constant 0 : i32
    return %c0_i32, %c0_i32_0 : i32, i32
  }
  func.func @transform_9(%arg0: i32, %arg1: i32) -> (i32, i32) {
    %c0_i32 = arith.constant 0 : i32
    %c0_i32_0 = arith.constant 0 : i32
    %c0_i32_1 = arith.constant 0 : i32
    return %c0_i32, %c0_i32_0 : i32, i32
  }
  func.func @transform_10(%arg0: i32, %arg1: i32) -> (i32, i32) {
    %c0_i32 = arith.constant 0 : i32
    %c0_i32_0 = arith.constant 0 : i32
    %c0_i32_1 = arith.constant 0 : i32
    return %c0_i32, %c0_i32_0 : i32, i32
  }
  func.func @transform_11(%arg0: i32, %arg1: i32) -> (i32, i32) {
    %c0_i32 = arith.constant 0 : i32
    %c0_i32_0 = arith.constant 0 : i32
    %c0_i32_1 = arith.constant 0 : i32
    return %c0_i32, %c0_i32_0 : i32, i32
  }
  func.func @transform_12(%arg0: i32, %arg1: i32) -> (i32, i32, i32) {
    %c0_i32 = arith.constant 0 : i32
    %c0_i32_0 = arith.constant 0 : i32
    return %arg0, %arg1, %c0_i32 : i32, i32, i32
  }
}

module attributes {stable_mosaic.version = 11 : i64} {
  func.func @_mha_self_kernel(%arg0: i32, %arg1: i32, %arg2: memref<1x4x128xbf16, #tpu.memory_space<vmem>>, %arg3: memref<1x4x128xbf16, #tpu.memory_space<vmem>>, %arg4: memref<128x128xbf16, #tpu.memory_space<vmem>>, %arg5: memref<128x256xbf16, #tpu.memory_space<vmem>>, %arg6: memref<128x128xbf16, #tpu.memory_space<vmem>>, %arg7: memref<1x128xf32, #tpu.memory_space<vmem>>, %arg8: memref<1x128xf32, #tpu.memory_space<vmem>>, %arg9: memref<1x128xf32, #tpu.memory_space<vmem>>, %arg10: memref<1x128xf32, #tpu.memory_space<vmem>>, %arg11: memref<1x128xf32, #tpu.memory_space<vmem>>, %arg12: memref<1x4x128xbf16, #tpu.memory_space<vmem>>) attributes {dimension_semantics = [#tpu.dimension_semantics<parallel>, #tpu.dimension_semantics<parallel>], iteration_bounds = array<i64: 2, 1>, scalar_prefetch = 0 : i64, scratch_operands = 0 : i64, tpu.core_type = #tpu.core_type<tc>, window_params = [{transform_indices = @transform_0, window_bounds = array<i64: 1, 4, 128>}, {transform_indices = @transform_1, window_bounds = array<i64: 1, 4, 128>}, {pipeline_mode = #tpu.pipeline_mode<synchronous>, transform_indices = @transform_2, window_bounds = array<i64: 128, 128>}, {pipeline_mode = #tpu.pipeline_mode<synchronous>, transform_indices = @transform_3, window_bounds = array<i64: 128, 256>}, {pipeline_mode = #tpu.pipeline_mode<synchronous>, transform_indices = @transform_4, window_bounds = array<i64: 128, 128>}, {pipeline_mode = #tpu.pipeline_mode<synchronous>, transform_indices = @transform_5, window_bounds = array<i64: 1, 128>}, {pipeline_mode = #tpu.pipeline_mode<synchronous>, transform_indices = @transform_6, window_bounds = array<i64: 1, 128>}, {pipeline_mode = #tpu.pipeline_mode<synchronous>, transform_indices = @transform_7, window_bounds = array<i64: 1, 128>}, {pipeline_mode = #tpu.pipeline_mode<synchronous>, transform_indices = @transform_8, window_bounds = array<i64: 1, 128>}, {pipeline_mode = #tpu.pipeline_mode<synchronous>, transform_indices = @transform_9, window_bounds = array<i64: 1, 128>}, {transform_indices = @transform_10, window_bounds = array<i64: 1, 4, 128>}]} {
    %c0 = arith.constant 0 : index
    %c0_0 = arith.constant 0 : index
    %c0_1 = arith.constant 0 : index
    %0 = vector.load %arg2[%c0, %c0_0, %c0_1] : memref<1x4x128xbf16, #tpu.memory_space<vmem>>, vector<1x4x128xbf16>
    %1 = vector.shape_cast %0 : vector<1x4x128xbf16> to vector<4x128xbf16>
    %c0_2 = arith.constant 0 : index
    %c0_3 = arith.constant 0 : index
    %c0_4 = arith.constant 0 : index
    %2 = vector.load %arg3[%c0_2, %c0_3, %c0_4] : memref<1x4x128xbf16, #tpu.memory_space<vmem>>, vector<1x4x128xbf16>
    %3 = vector.shape_cast %2 : vector<1x4x128xbf16> to vector<4x128xbf16>
    %c0_5 = arith.constant 0 : index
    %c0_6 = arith.constant 0 : index
    %4 = vector.load %arg4[%c0_5, %c0_6] : memref<128x128xbf16, #tpu.memory_space<vmem>>, vector<128x128xbf16>
    %cst = arith.constant dense<0.000000e+00> : vector<4x128xf32>
    %5 = tpu.matmul %1, %4, %cst {dimension_numbers = #tpu.dot_dimension_numbers<[1], [0], [0], [1], [0, 0, 1, 1], [], []>} : vector<4x128xbf16>, vector<128x128xbf16>, vector<4x128xf32> -> vector<4x128xf32>
    %c0_7 = arith.constant 0 : index
    %c0_8 = arith.constant 0 : index
    %6 = vector.load %arg5[%c0_7, %c0_8] : memref<128x256xbf16, #tpu.memory_space<vmem>>, vector<128x256xbf16>
    %cst_9 = arith.constant dense<0.000000e+00> : vector<4x256xf32>
    %7 = tpu.matmul %3, %6, %cst_9 {dimension_numbers = #tpu.dot_dimension_numbers<[1], [0], [0], [1], [0, 0, 1, 1], [], []>} : vector<4x128xbf16>, vector<128x256xbf16>, vector<4x256xf32> -> vector<4x256xf32>
    %8 = vector.extract_strided_slice %7 {offsets = [0, 0], sizes = [4, 128], strides = [1, 1]} : vector<4x256xf32> to vector<4x128xf32>
    %9 = vector.extract_strided_slice %7 {offsets = [0, 128], sizes = [4, 128], strides = [1, 1]} : vector<4x256xf32> to vector<4x128xf32>
    %cst_10 = arith.constant 0.0883883461 : f32
    %10 = vector.broadcast %cst_10 : f32 to vector<4x128xf32>
    %11 = arith.mulf %5, %10 : vector<4x128xf32>
    %12 = arith.truncf %11 : vector<4x128xf32> to vector<4x128xbf16>
    %13 = arith.truncf %8 : vector<4x128xf32> to vector<4x128xbf16>
    %14 = arith.truncf %9 : vector<4x128xf32> to vector<4x128xbf16>
    %15 = vector.extract_strided_slice %12 {offsets = [0, 0], sizes = [4, 16], strides = [1, 1]} : vector<4x128xbf16> to vector<4x16xbf16>
    %16 = vector.extract_strided_slice %12 {offsets = [0, 16], sizes = [4, 16], strides = [1, 1]} : vector<4x128xbf16> to vector<4x16xbf16>
    %17 = vector.extract_strided_slice %12 {offsets = [0, 32], sizes = [4, 16], strides = [1, 1]} : vector<4x128xbf16> to vector<4x16xbf16>
    %18 = vector.extract_strided_slice %12 {offsets = [0, 48], sizes = [4, 16], strides = [1, 1]} : vector<4x128xbf16> to vector<4x16xbf16>
    %19 = vector.extract_strided_slice %12 {offsets = [0, 64], sizes = [4, 16], strides = [1, 1]} : vector<4x128xbf16> to vector<4x16xbf16>
    %20 = vector.extract_strided_slice %12 {offsets = [0, 80], sizes = [4, 16], strides = [1, 1]} : vector<4x128xbf16> to vector<4x16xbf16>
    %21 = vector.extract_strided_slice %12 {offsets = [0, 96], sizes = [4, 16], strides = [1, 1]} : vector<4x128xbf16> to vector<4x16xbf16>
    %22 = vector.extract_strided_slice %12 {offsets = [0, 112], sizes = [4, 16], strides = [1, 1]} : vector<4x128xbf16> to vector<4x16xbf16>
    %23 = vector.shape_cast %15 : vector<4x16xbf16> to vector<1x4x16xbf16>
    %24 = vector.shape_cast %16 : vector<4x16xbf16> to vector<1x4x16xbf16>
    %25 = vector.shape_cast %17 : vector<4x16xbf16> to vector<1x4x16xbf16>
    %26 = vector.shape_cast %18 : vector<4x16xbf16> to vector<1x4x16xbf16>
    %27 = vector.shape_cast %19 : vector<4x16xbf16> to vector<1x4x16xbf16>
    %28 = vector.shape_cast %20 : vector<4x16xbf16> to vector<1x4x16xbf16>
    %29 = vector.shape_cast %21 : vector<4x16xbf16> to vector<1x4x16xbf16>
    %30 = vector.shape_cast %22 : vector<4x16xbf16> to vector<1x4x16xbf16>
    %31 = tpu.concatenate %23, %24, %25, %26, %27, %28, %29, %30 in 0 : vector<1x4x16xbf16>, vector<1x4x16xbf16>, vector<1x4x16xbf16>, vector<1x4x16xbf16>, vector<1x4x16xbf16>, vector<1x4x16xbf16>, vector<1x4x16xbf16>, vector<1x4x16xbf16> -> vector<8x4x16xbf16>
    %32 = vector.extract_strided_slice %13 {offsets = [0, 0], sizes = [4, 16], strides = [1, 1]} : vector<4x128xbf16> to vector<4x16xbf16>
    %33 = vector.extract_strided_slice %13 {offsets = [0, 16], sizes = [4, 16], strides = [1, 1]} : vector<4x128xbf16> to vector<4x16xbf16>
    %34 = vector.extract_strided_slice %13 {offsets = [0, 32], sizes = [4, 16], strides = [1, 1]} : vector<4x128xbf16> to vector<4x16xbf16>
    %35 = vector.extract_strided_slice %13 {offsets = [0, 48], sizes = [4, 16], strides = [1, 1]} : vector<4x128xbf16> to vector<4x16xbf16>
    %36 = vector.extract_strided_slice %13 {offsets = [0, 64], sizes = [4, 16], strides = [1, 1]} : vector<4x128xbf16> to vector<4x16xbf16>
    %37 = vector.extract_strided_slice %13 {offsets = [0, 80], sizes = [4, 16], strides = [1, 1]} : vector<4x128xbf16> to vector<4x16xbf16>
    %38 = vector.extract_strided_slice %13 {offsets = [0, 96], sizes = [4, 16], strides = [1, 1]} : vector<4x128xbf16> to vector<4x16xbf16>
    %39 = vector.extract_strided_slice %13 {offsets = [0, 112], sizes = [4, 16], strides = [1, 1]} : vector<4x128xbf16> to vector<4x16xbf16>
    %40 = vector.shape_cast %32 : vector<4x16xbf16> to vector<1x4x16xbf16>
    %41 = vector.shape_cast %33 : vector<4x16xbf16> to vector<1x4x16xbf16>
    %42 = vector.shape_cast %34 : vector<4x16xbf16> to vector<1x4x16xbf16>
    %43 = vector.shape_cast %35 : vector<4x16xbf16> to vector<1x4x16xbf16>
    %44 = vector.shape_cast %36 : vector<4x16xbf16> to vector<1x4x16xbf16>
    %45 = vector.shape_cast %37 : vector<4x16xbf16> to vector<1x4x16xbf16>
    %46 = vector.shape_cast %38 : vector<4x16xbf16> to vector<1x4x16xbf16>
    %47 = vector.shape_cast %39 : vector<4x16xbf16> to vector<1x4x16xbf16>
    %48 = tpu.concatenate %40, %41, %42, %43, %44, %45, %46, %47 in 0 : vector<1x4x16xbf16>, vector<1x4x16xbf16>, vector<1x4x16xbf16>, vector<1x4x16xbf16>, vector<1x4x16xbf16>, vector<1x4x16xbf16>, vector<1x4x16xbf16>, vector<1x4x16xbf16> -> vector<8x4x16xbf16>
    %49 = vector.extract_strided_slice %14 {offsets = [0, 0], sizes = [4, 16], strides = [1, 1]} : vector<4x128xbf16> to vector<4x16xbf16>
    %50 = vector.extract_strided_slice %14 {offsets = [0, 16], sizes = [4, 16], strides = [1, 1]} : vector<4x128xbf16> to vector<4x16xbf16>
    %51 = vector.extract_strided_slice %14 {offsets = [0, 32], sizes = [4, 16], strides = [1, 1]} : vector<4x128xbf16> to vector<4x16xbf16>
    %52 = vector.extract_strided_slice %14 {offsets = [0, 48], sizes = [4, 16], strides = [1, 1]} : vector<4x128xbf16> to vector<4x16xbf16>
    %53 = vector.extract_strided_slice %14 {offsets = [0, 64], sizes = [4, 16], strides = [1, 1]} : vector<4x128xbf16> to vector<4x16xbf16>
    %54 = vector.extract_strided_slice %14 {offsets = [0, 80], sizes = [4, 16], strides = [1, 1]} : vector<4x128xbf16> to vector<4x16xbf16>
    %55 = vector.extract_strided_slice %14 {offsets = [0, 96], sizes = [4, 16], strides = [1, 1]} : vector<4x128xbf16> to vector<4x16xbf16>
    %56 = vector.extract_strided_slice %14 {offsets = [0, 112], sizes = [4, 16], strides = [1, 1]} : vector<4x128xbf16> to vector<4x16xbf16>
    %57 = vector.shape_cast %49 : vector<4x16xbf16> to vector<1x4x16xbf16>
    %58 = vector.shape_cast %50 : vector<4x16xbf16> to vector<1x4x16xbf16>
    %59 = vector.shape_cast %51 : vector<4x16xbf16> to vector<1x4x16xbf16>
    %60 = vector.shape_cast %52 : vector<4x16xbf16> to vector<1x4x16xbf16>
    %61 = vector.shape_cast %53 : vector<4x16xbf16> to vector<1x4x16xbf16>
    %62 = vector.shape_cast %54 : vector<4x16xbf16> to vector<1x4x16xbf16>
    %63 = vector.shape_cast %55 : vector<4x16xbf16> to vector<1x4x16xbf16>
    %64 = vector.shape_cast %56 : vector<4x16xbf16> to vector<1x4x16xbf16>
    %65 = tpu.concatenate %57, %58, %59, %60, %61, %62, %63, %64 in 0 : vector<1x4x16xbf16>, vector<1x4x16xbf16>, vector<1x4x16xbf16>, vector<1x4x16xbf16>, vector<1x4x16xbf16>, vector<1x4x16xbf16>, vector<1x4x16xbf16>, vector<1x4x16xbf16> -> vector<8x4x16xbf16>
    "tpu.trace_start"() <{level = 10 : i32, message = "hqd,hkd->hqk"}> : () -> ()
    %cst_11 = arith.constant dense<0.000000e+00> : vector<8x4x4xf32>
    %66 = tpu.matmul %31, %48, %cst_11 {dimension_numbers = #tpu.dot_dimension_numbers<[2], [2], [1], [1], [0, 0, 0, 1, 1, 1], [0], [0]>} : vector<8x4x16xbf16>, vector<8x4x16xbf16>, vector<8x4x4xf32> -> vector<8x4x4xf32>
    "tpu.trace_stop"() : () -> ()
    %cst_12 = arith.constant dense<0xFF800000> : vector<8x4xf32>
    %67 = vector.multi_reduction <maximumf>, %66, %cst_12 [2] : vector<8x4x4xf32> to vector<8x4xf32>
    %68 = vector.shape_cast %67 : vector<8x4xf32> to vector<8x4x1xf32>
    %69 = vector.broadcast %68 : vector<8x4x1xf32> to vector<8x4x4xf32>
    %70 = arith.subf %66, %69 : vector<8x4x4xf32>
    %71 = math.exp %70 : vector<8x4x4xf32>
    %cst_13 = arith.constant dense<0.000000e+00> : vector<8x4xf32>
    %72 = vector.multi_reduction <add>, %71, %cst_13 [2] : vector<8x4x4xf32> to vector<8x4xf32>
    %73 = vector.shape_cast %72 : vector<8x4xf32> to vector<8x4x1xf32>
    %74 = tpu.reciprocal %73 {approx = true} : vector<8x4x1xf32> -> vector<8x4x1xf32>
    %75 = vector.broadcast %74 : vector<8x4x1xf32> to vector<8x4x4xf32>
    %76 = arith.mulf %71, %75 : vector<8x4x4xf32>
    %77 = arith.truncf %76 : vector<8x4x4xf32> to vector<8x4x4xbf16>
    "tpu.trace_start"() <{level = 10 : i32, message = "hqk,hkd->hqd"}> : () -> ()
    %cst_14 = arith.constant dense<0.000000e+00> : vector<8x4x16xf32>
    %78 = tpu.matmul %77, %65, %cst_14 {dimension_numbers = #tpu.dot_dimension_numbers<[2], [1], [1], [2], [0, 0, 0, 1, 1, 2], [0], [0]>} : vector<8x4x4xbf16>, vector<8x4x16xbf16>, vector<8x4x16xf32> -> vector<8x4x16xf32>
    "tpu.trace_stop"() : () -> ()
    %79 = vector.extract_strided_slice %78 {offsets = [0, 0, 0], sizes = [1, 4, 16], strides = [1, 1, 1]} : vector<8x4x16xf32> to vector<1x4x16xf32>
    %80 = vector.shape_cast %79 : vector<1x4x16xf32> to vector<4x16xf32>
    %81 = vector.extract_strided_slice %78 {offsets = [1, 0, 0], sizes = [1, 4, 16], strides = [1, 1, 1]} : vector<8x4x16xf32> to vector<1x4x16xf32>
    %82 = vector.shape_cast %81 : vector<1x4x16xf32> to vector<4x16xf32>
    %83 = vector.extract_strided_slice %78 {offsets = [2, 0, 0], sizes = [1, 4, 16], strides = [1, 1, 1]} : vector<8x4x16xf32> to vector<1x4x16xf32>
    %84 = vector.shape_cast %83 : vector<1x4x16xf32> to vector<4x16xf32>
    %85 = vector.extract_strided_slice %78 {offsets = [3, 0, 0], sizes = [1, 4, 16], strides = [1, 1, 1]} : vector<8x4x16xf32> to vector<1x4x16xf32>
    %86 = vector.shape_cast %85 : vector<1x4x16xf32> to vector<4x16xf32>
    %87 = vector.extract_strided_slice %78 {offsets = [4, 0, 0], sizes = [1, 4, 16], strides = [1, 1, 1]} : vector<8x4x16xf32> to vector<1x4x16xf32>
    %88 = vector.shape_cast %87 : vector<1x4x16xf32> to vector<4x16xf32>
    %89 = vector.extract_strided_slice %78 {offsets = [5, 0, 0], sizes = [1, 4, 16], strides = [1, 1, 1]} : vector<8x4x16xf32> to vector<1x4x16xf32>
    %90 = vector.shape_cast %89 : vector<1x4x16xf32> to vector<4x16xf32>
    %91 = vector.extract_strided_slice %78 {offsets = [6, 0, 0], sizes = [1, 4, 16], strides = [1, 1, 1]} : vector<8x4x16xf32> to vector<1x4x16xf32>
    %92 = vector.shape_cast %91 : vector<1x4x16xf32> to vector<4x16xf32>
    %93 = vector.extract_strided_slice %78 {offsets = [7, 0, 0], sizes = [1, 4, 16], strides = [1, 1, 1]} : vector<8x4x16xf32> to vector<1x4x16xf32>
    %94 = vector.shape_cast %93 : vector<1x4x16xf32> to vector<4x16xf32>
    %95 = tpu.concatenate %80, %82, %84, %86, %88, %90, %92, %94 in 1 : vector<4x16xf32>, vector<4x16xf32>, vector<4x16xf32>, vector<4x16xf32>, vector<4x16xf32>, vector<4x16xf32>, vector<4x16xf32>, vector<4x16xf32> -> vector<4x128xf32>
    %96 = arith.addf %5, %95 : vector<4x128xf32>
    %c0_15 = arith.constant 0 : index
    %c0_16 = arith.constant 0 : index
    %97 = vector.load %arg8[%c0_15, %c0_16] : memref<1x128xf32, #tpu.memory_space<vmem>>, vector<1x128xf32>
    %c0_17 = arith.constant 0 : index
    %c0_18 = arith.constant 0 : index
    %98 = vector.load %arg9[%c0_17, %c0_18] : memref<1x128xf32, #tpu.memory_space<vmem>>, vector<1x128xf32>
    %cst_19 = arith.constant dense<0.000000e+00> : vector<4xf32>
    %99 = vector.multi_reduction <add>, %96, %cst_19 [1] : vector<4x128xf32> to vector<4xf32>
    %100 = vector.shape_cast %99 : vector<4xf32> to vector<4x1xf32>
    %cst_20 = arith.constant 1.280000e+02 : f32
    %101 = vector.broadcast %cst_20 : f32 to vector<4x1xf32>
    %102 = arith.divf %100, %101 : vector<4x1xf32>
    %103 = vector.broadcast %102 : vector<4x1xf32> to vector<4x128xf32>
    %104 = arith.subf %96, %103 : vector<4x128xf32>
    %105 = arith.mulf %104, %104 : vector<4x128xf32>
    %cst_21 = arith.constant dense<0.000000e+00> : vector<4xf32>
    %106 = vector.multi_reduction <add>, %105, %cst_21 [1] : vector<4x128xf32> to vector<4xf32>
    %107 = vector.shape_cast %106 : vector<4xf32> to vector<4x1xf32>
    %cst_22 = arith.constant 1.280000e+02 : f32
    %108 = vector.broadcast %cst_22 : f32 to vector<4x1xf32>
    %109 = arith.divf %107, %108 : vector<4x1xf32>
    %110 = vector.broadcast %102 : vector<4x1xf32> to vector<4x128xf32>
    %111 = arith.subf %96, %110 : vector<4x128xf32>
    %cst_23 = arith.constant 9.99999974E-6 : f32
    %112 = vector.broadcast %cst_23 : f32 to vector<4x1xf32>
    %113 = arith.addf %109, %112 : vector<4x1xf32>
    %114 = math.rsqrt %113 : vector<4x1xf32>
    %115 = vector.broadcast %114 : vector<4x1xf32> to vector<4x128xf32>
    %116 = arith.mulf %111, %115 : vector<4x128xf32>
    %117 = vector.broadcast %97 : vector<1x128xf32> to vector<4x128xf32>
    %118 = arith.mulf %116, %117 : vector<4x128xf32>
    %119 = vector.broadcast %98 : vector<1x128xf32> to vector<4x128xf32>
    %120 = arith.addf %118, %119 : vector<4x128xf32>
    %121 = arith.truncf %120 : vector<4x128xf32> to vector<4x128xbf16>
    %c0_24 = arith.constant 0 : index
    %c0_25 = arith.constant 0 : index
    %122 = vector.load %arg6[%c0_24, %c0_25] : memref<128x128xbf16, #tpu.memory_space<vmem>>, vector<128x128xbf16>
    %cst_26 = arith.constant dense<0.000000e+00> : vector<4x128xf32>
    %123 = tpu.matmul %121, %122, %cst_26 {dimension_numbers = #tpu.dot_dimension_numbers<[1], [0], [0], [1], [0, 0, 1, 1], [], []>} : vector<4x128xbf16>, vector<128x128xbf16>, vector<4x128xf32> -> vector<4x128xf32>
    %c0_27 = arith.constant 0 : index
    %c0_28 = arith.constant 0 : index
    %124 = vector.load %arg7[%c0_27, %c0_28] : memref<1x128xf32, #tpu.memory_space<vmem>>, vector<1x128xf32>
    %125 = vector.broadcast %124 : vector<1x128xf32> to vector<4x128xf32>
    %126 = arith.addf %123, %125 : vector<4x128xf32>
    %cst_29 = arith.constant 0.000000e+00 : f32
    %127 = vector.broadcast %cst_29 : f32 to vector<4x128xf32>
    %128 = arith.maximumf %126, %127 : vector<4x128xf32>
    %129 = arith.addf %120, %128 : vector<4x128xf32>
    %c0_30 = arith.constant 0 : index
    %c0_31 = arith.constant 0 : index
    %130 = vector.load %arg10[%c0_30, %c0_31] : memref<1x128xf32, #tpu.memory_space<vmem>>, vector<1x128xf32>
    %c0_32 = arith.constant 0 : index
    %c0_33 = arith.constant 0 : index
    %131 = vector.load %arg11[%c0_32, %c0_33] : memref<1x128xf32, #tpu.memory_space<vmem>>, vector<1x128xf32>
    %cst_34 = arith.constant dense<0.000000e+00> : vector<4xf32>
    %132 = vector.multi_reduction <add>, %129, %cst_34 [1] : vector<4x128xf32> to vector<4xf32>
    %133 = vector.shape_cast %132 : vector<4xf32> to vector<4x1xf32>
    %cst_35 = arith.constant 1.280000e+02 : f32
    %134 = vector.broadcast %cst_35 : f32 to vector<4x1xf32>
    %135 = arith.divf %133, %134 : vector<4x1xf32>
    %136 = vector.broadcast %135 : vector<4x1xf32> to vector<4x128xf32>
    %137 = arith.subf %129, %136 : vector<4x128xf32>
    %138 = arith.mulf %137, %137 : vector<4x128xf32>
    %cst_36 = arith.constant dense<0.000000e+00> : vector<4xf32>
    %139 = vector.multi_reduction <add>, %138, %cst_36 [1] : vector<4x128xf32> to vector<4xf32>
    %140 = vector.shape_cast %139 : vector<4xf32> to vector<4x1xf32>
    %cst_37 = arith.constant 1.280000e+02 : f32
    %141 = vector.broadcast %cst_37 : f32 to vector<4x1xf32>
    %142 = arith.divf %140, %141 : vector<4x1xf32>
    %143 = vector.broadcast %135 : vector<4x1xf32> to vector<4x128xf32>
    %144 = arith.subf %129, %143 : vector<4x128xf32>
    %cst_38 = arith.constant 9.99999974E-6 : f32
    %145 = vector.broadcast %cst_38 : f32 to vector<4x1xf32>
    %146 = arith.addf %142, %145 : vector<4x1xf32>
    %147 = math.rsqrt %146 : vector<4x1xf32>
    %148 = vector.broadcast %147 : vector<4x1xf32> to vector<4x128xf32>
    %149 = arith.mulf %144, %148 : vector<4x128xf32>
    %150 = vector.broadcast %130 : vector<1x128xf32> to vector<4x128xf32>
    %151 = arith.mulf %149, %150 : vector<4x128xf32>
    %152 = vector.broadcast %131 : vector<1x128xf32> to vector<4x128xf32>
    %153 = arith.addf %151, %152 : vector<4x128xf32>
    %154 = arith.truncf %153 : vector<4x128xf32> to vector<4x128xbf16>
    %c0_39 = arith.constant 0 : index
    %c0_40 = arith.constant 0 : index
    %c0_41 = arith.constant 0 : index
    %155 = vector.load %arg12[%c0_39, %c0_40, %c0_41] : memref<1x4x128xbf16, #tpu.memory_space<vmem>>, vector<1x4x128xbf16>
    %156 = vector.shape_cast %155 : vector<1x4x128xbf16> to vector<4x128xbf16>
    %157 = vector.shape_cast %154 : vector<4x128xbf16> to vector<1x4x128xbf16>
    tpu.vector_store %arg12[%c0_39, %c0_40, %c0_41], %157 {strides = array<i32>} : memref<1x4x128xbf16, #tpu.memory_space<vmem>>, vector<1x4x128xbf16>,
    return
  }
  func.func @transform_0(%arg0: i32, %arg1: i32) -> (i32, i32, i32) {
    %c0_i32 = arith.constant 0 : i32
    %c0_i32_0 = arith.constant 0 : i32
    return %arg0, %arg1, %c0_i32 : i32, i32, i32
  }
  func.func @transform_1(%arg0: i32, %arg1: i32) -> (i32, i32, i32) {
    %c0_i32 = arith.constant 0 : i32
    %c0_i32_0 = arith.constant 0 : i32
    %c0_i32_1 = arith.constant 0 : i32
    return %arg0, %c0_i32, %c0_i32_0 : i32, i32, i32
  }
  func.func @transform_2(%arg0: i32, %arg1: i32) -> (i32, i32) {
    %c0_i32 = arith.constant 0 : i32
    %c0_i32_0 = arith.constant 0 : i32
    %c0_i32_1 = arith.constant 0 : i32
    return %c0_i32, %c0_i32_0 : i32, i32
  }
  func.func @transform_3(%arg0: i32, %arg1: i32) -> (i32, i32) {
    %c0_i32 = arith.constant 0 : i32
    %c0_i32_0 = arith.constant 0 : i32
    %c0_i32_1 = arith.constant 0 : i32
    return %c0_i32, %c0_i32_0 : i32, i32
  }
  func.func @transform_4(%arg0: i32, %arg1: i32) -> (i32, i32) {
    %c0_i32 = arith.constant 0 : i32
    %c0_i32_0 = arith.constant 0 : i32
    %c0_i32_1 = arith.constant 0 : i32
    return %c0_i32, %c0_i32_0 : i32, i32
  }
  func.func @transform_5(%arg0: i32, %arg1: i32) -> (i32, i32) {
    %c0_i32 = arith.constant 0 : i32
    %c0_i32_0 = arith.constant 0 : i32
    %c0_i32_1 = arith.constant 0 : i32
    return %c0_i32, %c0_i32_0 : i32, i32
  }
  func.func @transform_6(%arg0: i32, %arg1: i32) -> (i32, i32) {
    %c0_i32 = arith.constant 0 : i32
    %c0_i32_0 = arith.constant 0 : i32
    %c0_i32_1 = arith.constant 0 : i32
    return %c0_i32, %c0_i32_0 : i32, i32
  }
  func.func @transform_7(%arg0: i32, %arg1: i32) -> (i32, i32) {
    %c0_i32 = arith.constant 0 : i32
    %c0_i32_0 = arith.constant 0 : i32
    %c0_i32_1 = arith.constant 0 : i32
    return %c0_i32, %c0_i32_0 : i32, i32
  }
  func.func @transform_8(%arg0: i32, %arg1: i32) -> (i32, i32) {
    %c0_i32 = arith.constant 0 : i32
    %c0_i32_0 = arith.constant 0 : i32
    %c0_i32_1 = arith.constant 0 : i32
    return %c0_i32, %c0_i32_0 : i32, i32
  }
  func.func @transform_9(%arg0: i32, %arg1: i32) -> (i32, i32) {
    %c0_i32 = arith.constant 0 : i32
    %c0_i32_0 = arith.constant 0 : i32
    %c0_i32_1 = arith.constant 0 : i32
    return %c0_i32, %c0_i32_0 : i32, i32
  }
  func.func @transform_10(%arg0: i32, %arg1: i32) -> (i32, i32, i32) {
    %c0_i32 = arith.constant 0 : i32
    %c0_i32_0 = arith.constant 0 : i32
    return %arg0, %arg1, %c0_i32 : i32, i32, i32
  }
}

module attributes {stable_mosaic.version = 11 : i64} {
  func.func @_fused_mlp_kernel(%arg0: i32, %arg1: memref<8x2xf32, #tpu.memory_space<vmem>>, %arg2: memref<2x128xbf16, #tpu.memory_space<vmem>>, %arg3: memref<1x128xf32, #tpu.memory_space<vmem>>, %arg4: memref<128x128xbf16, #tpu.memory_space<vmem>>, %arg5: memref<1x128xf32, #tpu.memory_space<vmem>>, %arg6: memref<8x128xbf16, #tpu.memory_space<vmem>>) attributes {dimension_semantics = [#tpu.dimension_semantics<parallel>], iteration_bounds = array<i64: 1>, scalar_prefetch = 0 : i64, scratch_operands = 0 : i64, tpu.core_type = #tpu.core_type<tc>, window_params = [{transform_indices = @transform_0, window_bounds = array<i64: 8, 2>}, {pipeline_mode = #tpu.pipeline_mode<synchronous>, transform_indices = @transform_1, window_bounds = array<i64: 2, 128>}, {pipeline_mode = #tpu.pipeline_mode<synchronous>, transform_indices = @transform_2, window_bounds = array<i64: 1, 128>}, {pipeline_mode = #tpu.pipeline_mode<synchronous>, transform_indices = @transform_3, window_bounds = array<i64: 128, 128>}, {pipeline_mode = #tpu.pipeline_mode<synchronous>, transform_indices = @transform_4, window_bounds = array<i64: 1, 128>}, {transform_indices = @transform_5, window_bounds = array<i64: 8, 128>}]} {
    %c0 = arith.constant 0 : index
    %c0_0 = arith.constant 0 : index
    %0 = vector.load %arg1[%c0, %c0_0] : memref<8x2xf32, #tpu.memory_space<vmem>>, vector<8x2xf32>
    %1 = arith.truncf %0 : vector<8x2xf32> to vector<8x2xbf16>
    %c0_1 = arith.constant 0 : index
    %c0_2 = arith.constant 0 : index
    %2 = vector.load %arg2[%c0_1, %c0_2] : memref<2x128xbf16, #tpu.memory_space<vmem>>, vector<2x128xbf16>
    %cst = arith.constant dense<0.000000e+00> : vector<8x128xf32>
    %3 = tpu.matmul %1, %2, %cst {dimension_numbers = #tpu.dot_dimension_numbers<[1], [0], [0], [1], [0, 0, 1, 1], [], []>} : vector<8x2xbf16>, vector<2x128xbf16>, vector<8x128xf32> -> vector<8x128xf32>
    %c0_3 = arith.constant 0 : index
    %c0_4 = arith.constant 0 : index
    %4 = vector.load %arg3[%c0_3, %c0_4] : memref<1x128xf32, #tpu.memory_space<vmem>>, vector<1x128xf32>
    %5 = vector.broadcast %4 : vector<1x128xf32> to vector<8x128xf32>
    %6 = arith.addf %3, %5 : vector<8x128xf32>
    %cst_5 = arith.constant 0.000000e+00 : f32
    %7 = vector.broadcast %cst_5 : f32 to vector<8x128xf32>
    %8 = arith.maximumf %6, %7 : vector<8x128xf32>
    %9 = arith.truncf %8 : vector<8x128xf32> to vector<8x128xbf16>
    %c0_6 = arith.constant 0 : index
    %c0_7 = arith.constant 0 : index
    %10 = vector.load %arg4[%c0_6, %c0_7] : memref<128x128xbf16, #tpu.memory_space<vmem>>, vector<128x128xbf16>
    %cst_8 = arith.constant dense<0.000000e+00> : vector<8x128xf32>
    %11 = tpu.matmul %9, %10, %cst_8 {dimension_numbers = #tpu.dot_dimension_numbers<[1], [0], [0], [1], [0, 0, 1, 1], [], []>} : vector<8x128xbf16>, vector<128x128xbf16>, vector<8x128xf32> -> vector<8x128xf32>
    %c0_9 = arith.constant 0 : index
    %c0_10 = arith.constant 0 : index
    %12 = vector.load %arg5[%c0_9, %c0_10] : memref<1x128xf32, #tpu.memory_space<vmem>>, vector<1x128xf32>
    %13 = vector.broadcast %12 : vector<1x128xf32> to vector<8x128xf32>
    %14 = arith.addf %11, %13 : vector<8x128xf32>
    %cst_11 = arith.constant 0.000000e+00 : f32
    %15 = vector.broadcast %cst_11 : f32 to vector<8x128xf32>
    %16 = arith.maximumf %14, %15 : vector<8x128xf32>
    %17 = arith.truncf %16 : vector<8x128xf32> to vector<8x128xbf16>
    %c0_12 = arith.constant 0 : index
    %c0_13 = arith.constant 0 : index
    %18 = vector.load %arg6[%c0_12, %c0_13] : memref<8x128xbf16, #tpu.memory_space<vmem>>, vector<8x128xbf16>
    tpu.vector_store %arg6[%c0_12, %c0_13], %17 {strides = array<i32>} : memref<8x128xbf16, #tpu.memory_space<vmem>>, vector<8x128xbf16>,
    return
  }
  func.func @transform_0(%arg0: i32) -> (i32, i32) {
    %c0_i32 = arith.constant 0 : i32
    %c0_i32_0 = arith.constant 0 : i32
    return %arg0, %c0_i32 : i32, i32
  }
  func.func @transform_1(%arg0: i32) -> (i32, i32) {
    %c0_i32 = arith.constant 0 : i32
    %c0_i32_0 = arith.constant 0 : i32
    %c0_i32_1 = arith.constant 0 : i32
    return %c0_i32, %c0_i32_0 : i32, i32
  }
  func.func @transform_2(%arg0: i32) -> (i32, i32) {
    %c0_i32 = arith.constant 0 : i32
    %c0_i32_0 = arith.constant 0 : i32
    %c0_i32_1 = arith.constant 0 : i32
    return %c0_i32, %c0_i32_0 : i32, i32
  }
  func.func @transform_3(%arg0: i32) -> (i32, i32) {
    %c0_i32 = arith.constant 0 : i32
    %c0_i32_0 = arith.constant 0 : i32
    %c0_i32_1 = arith.constant 0 : i32
    return %c0_i32, %c0_i32_0 : i32, i32
  }
  func.func @transform_4(%arg0: i32) -> (i32, i32) {
    %c0_i32 = arith.constant 0 : i32
    %c0_i32_0 = arith.constant 0 : i32
    %c0_i32_1 = arith.constant 0 : i32
    return %c0_i32, %c0_i32_0 : i32, i32
  }
  func.func @transform_5(%arg0: i32) -> (i32, i32) {
    %c0_i32 = arith.constant 0 : i32
    %c0_i32_0 = arith.constant 0 : i32
    return %arg0, %c0_i32 : i32, i32
  }
}

module attributes {stable_mosaic.version = 11 : i64} {
  func.func @_fused_mlp_kernel(%arg0: i32, %arg1: memref<2x128xf32, #tpu.memory_space<vmem>>, %arg2: memref<128x128xbf16, #tpu.memory_space<vmem>>, %arg3: memref<1x128xf32, #tpu.memory_space<vmem>>, %arg4: memref<128x128xbf16, #tpu.memory_space<vmem>>, %arg5: memref<1x128xf32, #tpu.memory_space<vmem>>, %arg6: memref<2x128xbf16, #tpu.memory_space<vmem>>) attributes {dimension_semantics = [#tpu.dimension_semantics<parallel>], iteration_bounds = array<i64: 1>, scalar_prefetch = 0 : i64, scratch_operands = 0 : i64, tpu.core_type = #tpu.core_type<tc>, window_params = [{transform_indices = @transform_0, window_bounds = array<i64: 2, 128>}, {pipeline_mode = #tpu.pipeline_mode<synchronous>, transform_indices = @transform_1, window_bounds = array<i64: 128, 128>}, {pipeline_mode = #tpu.pipeline_mode<synchronous>, transform_indices = @transform_2, window_bounds = array<i64: 1, 128>}, {pipeline_mode = #tpu.pipeline_mode<synchronous>, transform_indices = @transform_3, window_bounds = array<i64: 128, 128>}, {pipeline_mode = #tpu.pipeline_mode<synchronous>, transform_indices = @transform_4, window_bounds = array<i64: 1, 128>}, {transform_indices = @transform_5, window_bounds = array<i64: 2, 128>}]} {
    %c0 = arith.constant 0 : index
    %c0_0 = arith.constant 0 : index
    %0 = vector.load %arg1[%c0, %c0_0] : memref<2x128xf32, #tpu.memory_space<vmem>>, vector<2x128xf32>
    %1 = arith.truncf %0 : vector<2x128xf32> to vector<2x128xbf16>
    %c0_1 = arith.constant 0 : index
    %c0_2 = arith.constant 0 : index
    %2 = vector.load %arg2[%c0_1, %c0_2] : memref<128x128xbf16, #tpu.memory_space<vmem>>, vector<128x128xbf16>
    %cst = arith.constant dense<0.000000e+00> : vector<2x128xf32>
    %3 = tpu.matmul %1, %2, %cst {dimension_numbers = #tpu.dot_dimension_numbers<[1], [0], [0], [1], [0, 0, 1, 1], [], []>} : vector<2x128xbf16>, vector<128x128xbf16>, vector<2x128xf32> -> vector<2x128xf32>
    %c0_3 = arith.constant 0 : index
    %c0_4 = arith.constant 0 : index
    %4 = vector.load %arg3[%c0_3, %c0_4] : memref<1x128xf32, #tpu.memory_space<vmem>>, vector<1x128xf32>
    %5 = vector.broadcast %4 : vector<1x128xf32> to vector<2x128xf32>
    %6 = arith.addf %3, %5 : vector<2x128xf32>
    %cst_5 = arith.constant 0.000000e+00 : f32
    %7 = vector.broadcast %cst_5 : f32 to vector<2x128xf32>
    %8 = arith.maximumf %6, %7 : vector<2x128xf32>
    %9 = arith.truncf %8 : vector<2x128xf32> to vector<2x128xbf16>
    %c0_6 = arith.constant 0 : index
    %c0_7 = arith.constant 0 : index
    %10 = vector.load %arg4[%c0_6, %c0_7] : memref<128x128xbf16, #tpu.memory_space<vmem>>, vector<128x128xbf16>
    %cst_8 = arith.constant dense<0.000000e+00> : vector<2x128xf32>
    %11 = tpu.matmul %9, %10, %cst_8 {dimension_numbers = #tpu.dot_dimension_numbers<[1], [0], [0], [1], [0, 0, 1, 1], [], []>} : vector<2x128xbf16>, vector<128x128xbf16>, vector<2x128xf32> -> vector<2x128xf32>
    %c0_9 = arith.constant 0 : index
    %c0_10 = arith.constant 0 : index
    %12 = vector.load %arg5[%c0_9, %c0_10] : memref<1x128xf32, #tpu.memory_space<vmem>>, vector<1x128xf32>
    %13 = vector.broadcast %12 : vector<1x128xf32> to vector<2x128xf32>
    %14 = arith.addf %11, %13 : vector<2x128xf32>
    %15 = arith.truncf %14 : vector<2x128xf32> to vector<2x128xbf16>
    %c0_11 = arith.constant 0 : index
    %c0_12 = arith.constant 0 : index
    %16 = vector.load %arg6[%c0_11, %c0_12] : memref<2x128xbf16, #tpu.memory_space<vmem>>, vector<2x128xbf16>
    tpu.vector_store %arg6[%c0_11, %c0_12], %15 {strides = array<i32>} : memref<2x128xbf16, #tpu.memory_space<vmem>>, vector<2x128xbf16>,
    return
  }
  func.func @transform_0(%arg0: i32) -> (i32, i32) {
    %c0_i32 = arith.constant 0 : i32
    %c0_i32_0 = arith.constant 0 : i32
    return %arg0, %c0_i32 : i32, i32
  }
  func.func @transform_1(%arg0: i32) -> (i32, i32) {
    %c0_i32 = arith.constant 0 : i32
    %c0_i32_0 = arith.constant 0 : i32
    %c0_i32_1 = arith.constant 0 : i32
    return %c0_i32, %c0_i32_0 : i32, i32
  }
  func.func @transform_2(%arg0: i32) -> (i32, i32) {
    %c0_i32 = arith.constant 0 : i32
    %c0_i32_0 = arith.constant 0 : i32
    %c0_i32_1 = arith.constant 0 : i32
    return %c0_i32, %c0_i32_0 : i32, i32
  }
  func.func @transform_3(%arg0: i32) -> (i32, i32) {
    %c0_i32 = arith.constant 0 : i32
    %c0_i32_0 = arith.constant 0 : i32
    %c0_i32_1 = arith.constant 0 : i32
    return %c0_i32, %c0_i32_0 : i32, i32
  }
  func.func @transform_4(%arg0: i32) -> (i32, i32) {
    %c0_i32 = arith.constant 0 : i32
    %c0_i32_0 = arith.constant 0 : i32
    %c0_i32_1 = arith.constant 0 : i32
    return %c0_i32, %c0_i32_0 : i32, i32
  }
  func.func @transform_5(%arg0: i32) -> (i32, i32) {
    %c0_i32 = arith.constant 0 : i32
    %c0_i32_0 = arith.constant 0 : i32
    return %arg0, %c0_i32 : i32, i32
  }
}

module attributes {stable_mosaic.version = 11 : i64} {
  func.func @_fused_mlp_kernel(%arg0: i32, %arg1: memref<8x256xbf16, #tpu.memory_space<vmem>>, %arg2: memref<8x1xf32, #tpu.memory_space<vmem>>, %arg3: memref<1x128xf32, #tpu.memory_space<vmem>>, %arg4: memref<256x128xbf16, #tpu.memory_space<vmem>>, %arg5: memref<1x128xf32, #tpu.memory_space<vmem>>, %arg6: memref<128x128xbf16, #tpu.memory_space<vmem>>, %arg7: memref<1x128xf32, #tpu.memory_space<vmem>>, %arg8: memref<8x128xbf16, #tpu.memory_space<vmem>>) attributes {dimension_semantics = [#tpu.dimension_semantics<parallel>], iteration_bounds = array<i64: 2>, scalar_prefetch = 0 : i64, scratch_operands = 0 : i64, tpu.core_type = #tpu.core_type<tc>, window_params = [{transform_indices = @transform_0, window_bounds = array<i64: 8, 256>}, {transform_indices = @transform_1, window_bounds = array<i64: 8, 1>}, {pipeline_mode = #tpu.pipeline_mode<synchronous>, transform_indices = @transform_2, window_bounds = array<i64: 1, 128>}, {pipeline_mode = #tpu.pipeline_mode<synchronous>, transform_indices = @transform_3, window_bounds = array<i64: 256, 128>}, {pipeline_mode = #tpu.pipeline_mode<synchronous>, transform_indices = @transform_4, window_bounds = array<i64: 1, 128>}, {pipeline_mode = #tpu.pipeline_mode<synchronous>, transform_indices = @transform_5, window_bounds = array<i64: 128, 128>}, {pipeline_mode = #tpu.pipeline_mode<synchronous>, transform_indices = @transform_6, window_bounds = array<i64: 1, 128>}, {transform_indices = @transform_7, window_bounds = array<i64: 8, 128>}]} {
    %c0 = arith.constant 0 : index
    %c0_0 = arith.constant 0 : index
    %0 = vector.load %arg1[%c0, %c0_0] : memref<8x256xbf16, #tpu.memory_space<vmem>>, vector<8x256xbf16>
    %c0_1 = arith.constant 0 : index
    %c0_2 = arith.constant 0 : index
    %1 = vector.load %arg4[%c0_1, %c0_2] : memref<256x128xbf16, #tpu.memory_space<vmem>>, vector<256x128xbf16>
    %cst = arith.constant dense<0.000000e+00> : vector<8x128xf32>
    %2 = tpu.matmul %0, %1, %cst {dimension_numbers = #tpu.dot_dimension_numbers<[1], [0], [0], [1], [0, 0, 1, 1], [], []>} : vector<8x256xbf16>, vector<256x128xbf16>, vector<8x128xf32> -> vector<8x128xf32>
    %c0_3 = arith.constant 0 : index
    %c0_4 = arith.constant 0 : index
    %3 = vector.load %arg5[%c0_3, %c0_4] : memref<1x128xf32, #tpu.memory_space<vmem>>, vector<1x128xf32>
    %4 = vector.broadcast %3 : vector<1x128xf32> to vector<8x128xf32>
    %5 = arith.addf %2, %4 : vector<8x128xf32>
    %c0_5 = arith.constant 0 : index
    %c0_6 = arith.constant 0 : index
    %6 = vector.load %arg2[%c0_5, %c0_6] : memref<8x1xf32, #tpu.memory_space<vmem>>, vector<8x1xf32>
    %c0_7 = arith.constant 0 : index
    %c0_8 = arith.constant 0 : index
    %7 = vector.load %arg3[%c0_7, %c0_8] : memref<1x128xf32, #tpu.memory_space<vmem>>, vector<1x128xf32>
    %8 = vector.broadcast %6 : vector<8x1xf32> to vector<8x128xf32>
    %9 = vector.broadcast %7 : vector<1x128xf32> to vector<8x128xf32>
    %10 = arith.mulf %8, %9 : vector<8x128xf32>
    %11 = arith.addf %5, %10 : vector<8x128xf32>
    %cst_9 = arith.constant 0.000000e+00 : f32
    %12 = vector.broadcast %cst_9 : f32 to vector<8x128xf32>
    %13 = arith.maximumf %11, %12 : vector<8x128xf32>
    %14 = arith.truncf %13 : vector<8x128xf32> to vector<8x128xbf16>
    %c0_10 = arith.constant 0 : index
    %c0_11 = arith.constant 0 : index
    %15 = vector.load %arg6[%c0_10, %c0_11] : memref<128x128xbf16, #tpu.memory_space<vmem>>, vector<128x128xbf16>
    %cst_12 = arith.constant dense<0.000000e+00> : vector<8x128xf32>
    %16 = tpu.matmul %14, %15, %cst_12 {dimension_numbers = #tpu.dot_dimension_numbers<[1], [0], [0], [1], [0, 0, 1, 1], [], []>} : vector<8x128xbf16>, vector<128x128xbf16>, vector<8x128xf32> -> vector<8x128xf32>
    %c0_13 = arith.constant 0 : index
    %c0_14 = arith.constant 0 : index
    %17 = vector.load %arg7[%c0_13, %c0_14] : memref<1x128xf32, #tpu.memory_space<vmem>>, vector<1x128xf32>
    %18 = vector.broadcast %17 : vector<1x128xf32> to vector<8x128xf32>
    %19 = arith.addf %16, %18 : vector<8x128xf32>
    %cst_15 = arith.constant 0.000000e+00 : f32
    %20 = vector.broadcast %cst_15 : f32 to vector<8x128xf32>
    %21 = arith.maximumf %19, %20 : vector<8x128xf32>
    %22 = arith.truncf %21 : vector<8x128xf32> to vector<8x128xbf16>
    %c0_16 = arith.constant 0 : index
    %c0_17 = arith.constant 0 : index
    %23 = vector.load %arg8[%c0_16, %c0_17] : memref<8x128xbf16, #tpu.memory_space<vmem>>, vector<8x128xbf16>
    tpu.vector_store %arg8[%c0_16, %c0_17], %22 {strides = array<i32>} : memref<8x128xbf16, #tpu.memory_space<vmem>>, vector<8x128xbf16>,
    return
  }
  func.func @transform_0(%arg0: i32) -> (i32, i32) {
    %c0_i32 = arith.constant 0 : i32
    %c0_i32_0 = arith.constant 0 : i32
    return %arg0, %c0_i32 : i32, i32
  }
  func.func @transform_1(%arg0: i32) -> (i32, i32) {
    %c0_i32 = arith.constant 0 : i32
    %c0_i32_0 = arith.constant 0 : i32
    return %arg0, %c0_i32 : i32, i32
  }
  func.func @transform_2(%arg0: i32) -> (i32, i32) {
    %c0_i32 = arith.constant 0 : i32
    %c0_i32_0 = arith.constant 0 : i32
    %c0_i32_1 = arith.constant 0 : i32
    return %c0_i32, %c0_i32_0 : i32, i32
  }
  func.func @transform_3(%arg0: i32) -> (i32, i32) {
    %c0_i32 = arith.constant 0 : i32
    %c0_i32_0 = arith.constant 0 : i32
    %c0_i32_1 = arith.constant 0 : i32
    return %c0_i32, %c0_i32_0 : i32, i32
  }
  func.func @transform_4(%arg0: i32) -> (i32, i32) {
    %c0_i32 = arith.constant 0 : i32
    %c0_i32_0 = arith.constant 0 : i32
    %c0_i32_1 = arith.constant 0 : i32
    return %c0_i32, %c0_i32_0 : i32, i32
  }
  func.func @transform_5(%arg0: i32) -> (i32, i32) {
    %c0_i32 = arith.constant 0 : i32
    %c0_i32_0 = arith.constant 0 : i32
    %c0_i32_1 = arith.constant 0 : i32
    return %c0_i32, %c0_i32_0 : i32, i32
  }
  func.func @transform_6(%arg0: i32) -> (i32, i32) {
    %c0_i32 = arith.constant 0 : i32
    %c0_i32_0 = arith.constant 0 : i32
    %c0_i32_1 = arith.constant 0 : i32
    return %c0_i32, %c0_i32_0 : i32, i32
  }
  func.func @transform_7(%arg0: i32) -> (i32, i32) {
    %c0_i32 = arith.constant 0 : i32
    %c0_i32_0 = arith.constant 0 : i32
    return %arg0, %c0_i32 : i32, i32
  }
}

</mosaic_0001>

<bundles_post_ra>
// kernel: _lambda_.8
= control target key start
LH: loop header
LB: loop body
LE: loop exit
PB: predicated region body
PF: predicated region fallthrough
CT: control target
= control target key end

     0   :  { %vm41_vm0 = vcmask 1040384   ;;  %v310_v1 = vmov 0   ;;  %vm34_vm1 = vcmask 7168   ;;  %s389_s1 = inlined_call_operand.vmem [shape: bf16[1,128], index: 1, kind: input, shape index: {}]   ;;  %s390_s0 = inlined_call_operand.vmem [shape: f32[24,1], index: 0, kind: input, shape index: {}]   ;;  %s391_s3 = inlined_call_operand.vmem [shape: bf16[128,128], index: 3, kind: input, shape index: {}]   ;;  %s392_s2 = inlined_call_operand.vmem [shape: f32[1,128], index: 2, kind: input, shape index: {}]   ;;  %s393_s4 = inlined_call_operand.vmem [shape: f32[1,128], index: 4, kind: input, shape index: {}]   ;;  %s394_s5 = inlined_call_operand.vmem [shape: bf16[24,128], index: 5, kind: output, shape index: {}]  }
   0x1   :  { %v26_v0 = vld [vmem:[%s389_s1] sm:$0x1]  ;;  %v43_v2 = vsel %vm41_vm0, 65535, %v310_v1  ;;  %v22_v4 = vld [vmem:[%s390_s0 + $0x8] sm:$0xff]  ;;  %v23_v6 = vld [vmem:[%s390_s0 + $0x10] sm:$0xff] }
   0x2   :  { %v21_v3 = vld [vmem:[%s390_s0] sm:$0xff]  ;;  %v45_v5 = vand.u32 %v43_v2, %v26_v0  ;;  %v25_v9 = vpack.c.bf16 %v23_v6, %v23_v6  ;;  %v303_v10 = vld [vmem:[%s391_s3 + $0x8] sm:$0xff]   ;;  %v304_v11 = vld [vmem:[%s391_s3 + $0x10] sm:$0xff]  }
   0x3   :  { %v24_v7 = vpack.c.bf16 %v22_v4, %v21_v3  ;;  %v302_v8 = vld [vmem:[%s391_s3] sm:$0xff]   ;;  %v305_v12 = vld [vmem:[%s391_s3 + $0x18] sm:$0xff]   ;;  %v307_v14 = vld [vmem:[%s391_s3 + $0x28] sm:$0xff]  }
   0x4   :  { %275 = vmatprep.subr.bf16.mxu0 %v45_v5  ;;  %281 = vmatprep.subr.bf16.mxu1 %v302_v8  ;;  %v306_v13 = vld [vmem:[%s391_s3 + $0x20] sm:$0xff]   ;;  %v308_v15 = vld [vmem:[%s391_s3 + $0x30] sm:$0xff]   ;;  %v309_v16 = vld [vmem:[%s391_s3 + $0x38] sm:$0xff]  }
   0x5   :  { %277 = vmatprep.mubr.msk.bf16.mxu0 %vm34_vm1, %v24_v7  ;;  %276 = vmatpush3.bf16.msra.mxu0 %v45_v5  ;;  %v239_v17 = vld [vmem:[%s392_s2] ss:$0 sm:$0xff] }
   0x6   :  { %282 = vmatpush3.bf16.msra.mxu1 %v302_v8  ;;  %v242_v30 = vld [vmem:[%s393_s4] ss:$0 sm:$0xff] }
   0x7   :  { %283 = vmatprep.subr.bf16.mxu1 %v303_v10 }
   0x8   :  { %278 = vmatmul.mubr.msk.bf16.vlgmr.msra.gmra.mrb[0].mxu0 %vm34_vm1, %v25_v9 }
   0xa   :  { %284 = vmatpush3.bf16.msra.mxu1 %v303_v10 }
   0xb   :  { %285 = vmatprep.subr.bf16.mxu1 %v304_v11 }
   0xe   :  { %286 = vmatpush3.bf16.msra.mxu1 %v304_v11 }
   0xf   :  { %287 = vmatprep.subr.bf16.mxu1 %v305_v12 }
  0x12   :  { %288 = vmatpush3.bf16.msra.mxu1 %v305_v12 }
  0x13   :  { %289 = vmatprep.subr.bf16.mxu1 %v306_v13 }
  0x16   :  { %290 = vmatpush3.bf16.msra.mxu1 %v306_v13 }
  0x17   :  { %291 = vmatprep.subr.bf16.mxu1 %v307_v14 }
  0x1a   :  { %292 = vmatpush3.bf16.msra.mxu1 %v307_v14 }
  0x1b   :  { %293 = vmatprep.subr.bf16.mxu1 %v308_v15 }
  0x1e   :  { %294 = vmatpush3.bf16.msra.mxu1 %v308_v15 }
  0x1f   :  { %295 = vmatprep.subr.bf16.mxu1 %v309_v16 }
  0x22   :  { %296 = vmatpush3.bf16.msra.mxu1 %v309_v16 }
  0xdb   :  { %v279_v18 = vpop.f32.mrb[0].mxu0 }
  0xdc   :  { %v90_v19 = vadd.f32 %v279_v18, %v239_v17  ;;  %v81_v20 = vpop.f32.mrb[1].mxu0 }
  0xdd   :  { %v82_v21 = vadd.f32 %v239_v17, %v81_v20  ;;  %v280_v22 = vpop.f32.mrb[2].mxu0 }
  0xde   :  { %v84_v23 = vpop.f32.mrb[3].mxu0  ;;  %v97_v25 = vmax.f32 %v90_v19, 0.0 }
  0xdf   :  { %v85_v24 = vadd.f32 %v239_v17, %v84_v23  ;;  %v95_v26 = vmax.f32 %v82_v21, 0.0 }
  0xe0   :  { %v99_v29 = vpack.c.bf16 %v97_v25, %v97_v25 }
  0xe1   :  { %v96_v27 = vmax.f32 %v85_v24, 0.0 }
  0xe3   :  { %v98_v28 = vpack.c.bf16 %v96_v27, %v95_v26 }
  0xe5   :  { %297 = vmatprep.mubr.bf16.mxu1 %v98_v28 }
  0xe6   :  { %298 = vmatmul.mubr.bf16.vlgmr.msra.gmra.mrb[0].mxu1 %v99_v29 }
 0x1b9   :  { %v299_v31 = vpop.f32.mrb[0].mxu1 }
 0x1ba   :  { %v214_v32 = vadd.f32 %v299_v31, %v242_v30  ;;  %v205_v33 = vpop.f32.mrb[1].mxu1 }
 0x1bb   :  { %v300_v34 = vpop.f32.mrb[2].mxu1  ;;  %v206_v37 = vadd.f32 %v242_v30, %v205_v33 }
 0x1bc   :  { %v256_v35 = vpack.c.bf16 %v214_v32, %v214_v32  ;;  %v208_v36 = vpop.f32.mrb[3].mxu1 }
 0x1bd   :  { %v209_v38 = vadd.f32 %v242_v30, %v208_v36 }
 0x1be   :  { %234 = vst [vmem:[%s394_s5 + $0x8] sm:$0xf] %v256_v35 }
 0x1bf   :  { %v260_v39 = vpack.c.bf16 %v209_v38, %v206_v37 }
 0x1c1   :  { %261 = vst [vmem:[%s394_s5] sm:$0xff] %v260_v39  }

// kernel: _lambda_.9
= control target key start
LH: loop header
LB: loop body
LE: loop exit
PB: predicated region body
PF: predicated region fallthrough
CT: control target
= control target key end

     0   :  { %vm35_vm0 = vcmask 1040384   ;;  %v256_v0 = vmov 0.0   ;;  %vm257_vm1 = vmmov 0   ;;  %vm31_vm2 = vcmask 15360   ;;  %s327_s1 = inlined_call_operand.vmem [shape: bf16[2,128], index: 1, kind: input, shape index: {}]   ;;  %s328_s0 = inlined_call_operand.vmem [shape: f32[8,2], index: 0, kind: input, shape index: {}]   ;;  %s329_s3 = inlined_call_operand.vmem [shape: bf16[128,128], index: 3, kind: input, shape index: {}]   ;;  %s330_s2 = inlined_call_operand.vmem [shape: f32[1,128], index: 2, kind: input, shape index: {}]   ;;  %s331_s4 = inlined_call_operand.vmem [shape: f32[1,128], index: 4, kind: input, shape index: {}]   ;;  %s332_s5 = inlined_call_operand.vmem [shape: bf16[8,128], index: 5, kind: output, shape index: {}]  }
   0x1   :  { %220 = vmatprep.subr.bf16.mxu0 %v256_v0  ;;  %v23_v1 = vld [vmem:[%s327_s1] sm:$0x1]  ;;  %222 = vmatprep.mubr.msk.bf16.mxu0 %vm257_vm1, %v256_v0  ;;  %v249_v6 = vld [vmem:[%s329_s3 + $0x8] sm:$0xff]   ;;  %v250_v7 = vld [vmem:[%s329_s3 + $0x10] sm:$0xff]  }
   0x2   :  { %v21_v2 = vld [vmem:[%s328_s0] sm:$0xff]  ;;  %v37_v3 = vsel %vm35_vm0, %v23_v1, 0  ;;  %226 = vmatprep.subr.bf16.mxu1 %v256_v0  ;;  %242 = vmatprep.mubr.msk.bf16.mxu1 %vm257_vm1, %v256_v0  ;;  %v251_v8 = vld [vmem:[%s329_s3 + $0x18] sm:$0xff]   ;;  %v253_v10 = vld [vmem:[%s329_s3 + $0x28] sm:$0xff]  }
   0x3   :  { %v22_v4 = vpack.c.bf16 %v21_v2, %v21_v2  ;;  %v248_v5 = vld [vmem:[%s329_s3] sm:$0xff]   ;;  %221 = vmatpush3.bf16.msra.mxu0 %v37_v3  ;;  %v254_v11 = vld [vmem:[%s329_s3 + $0x30] sm:$0xff]   ;;  %v255_v12 = vld [vmem:[%s329_s3 + $0x38] sm:$0xff]  }
   0x4   :  { %227 = vmatpush3.bf16.msra.mxu1 %v248_v5  ;;  %v252_v9 = vld [vmem:[%s329_s3 + $0x20] sm:$0xff]  }
   0x5   :  { %228 = vmatprep.subr.bf16.mxu1 %v256_v0  ;;  %v198_v13 = vld [vmem:[%s330_s2] ss:$0 sm:$0xff] }
   0x6   :  { %223 = vmatmul.mubr.msk.bf16.vlgmr.msra.gmra.mrb[0].mxu0 %vm31_vm2, %v22_v4  ;;  %v200_v21 = vld [vmem:[%s331_s4] ss:$0 sm:$0xff] }
   0x8   :  { %229 = vmatpush3.bf16.msra.mxu1 %v249_v6 }
   0x9   :  { %230 = vmatprep.subr.bf16.mxu1 %v256_v0 }
   0xc   :  { %231 = vmatpush3.bf16.msra.mxu1 %v250_v7 }
   0xd   :  { %232 = vmatprep.subr.bf16.mxu1 %v256_v0 }
  0x10   :  { %233 = vmatpush3.bf16.msra.mxu1 %v251_v8 }
  0x11   :  { %234 = vmatprep.subr.bf16.mxu1 %v256_v0 }
  0x14   :  { %235 = vmatpush3.bf16.msra.mxu1 %v252_v9 }
  0x15   :  { %236 = vmatprep.subr.bf16.mxu1 %v256_v0 }
  0x18   :  { %237 = vmatpush3.bf16.msra.mxu1 %v253_v10 }
  0x19   :  { %238 = vmatprep.subr.bf16.mxu1 %v256_v0 }
  0x1c   :  { %239 = vmatpush3.bf16.msra.mxu1 %v254_v11 }
  0x1d   :  { %240 = vmatprep.subr.bf16.mxu1 %v256_v0 }
  0x20   :  { %241 = vmatpush3.bf16.msra.mxu1 %v255_v12 }
  0xd9   :  { %v73_v14 = vpop.f32.mrb[0].mxu0 }
  0xda   :  { %v74_v15 = vadd.f32 %v198_v13, %v73_v14  ;;  %v224_v16 = vpop.f32.mrb[1].mxu0 }
  0xdb   :  { %v76_v17 = vpop.f32.mrb[2].mxu0 }
  0xdc   :  { %v79_v18 = vmax.f32 %v74_v15, 0.0  ;;  %v225_v19 = vpop.f32.mrb[3].mxu0 }
  0xde   :  { %v80_v20 = vpack.c.bf16 %v79_v18, %v79_v18 }
  0xe0   :  { %243 = vmatmul.mubr.bf16.vlgmr.msra.gmra.mrb[0].mxu1 %v80_v20 }
 0x1b3   :  { %v186_v22 = vpop.f32.mrb[0].mxu1 }
 0x1b4   :  { %v187_v23 = vadd.f32 %v200_v21, %v186_v22  ;;  %v244_v24 = vpop.f32.mrb[1].mxu1 }
 0x1b5   :  { %v189_v25 = vpop.f32.mrb[2].mxu1 }
 0x1b6   :  { %v192_v26 = vpack.c.bf16 %v187_v23, %v187_v23  ;;  %v245_v27 = vpop.f32.mrb[3].mxu1 }
 0x1b8   :  { %193 = vst [vmem:[%s332_s5] sm:$0xf] %v192_v26 }

// kernel: _lambda_.12
= control target key start
LH: loop header
LB: loop body
LE: loop exit
PB: predicated region body
PF: predicated region fallthrough
CT: control target
= control target key end

     0   :  { %vm35_vm0 = vcmask 1040384   ;;  %v257_v0 = vmov 0.0   ;;  %vm258_vm1 = vmmov 0   ;;  %vm31_vm2 = vcmask 15360   ;;  %s328_s1 = inlined_call_operand.vmem [shape: bf16[2,128], index: 1, kind: input, shape index: {}]   ;;  %s329_s0 = inlined_call_operand.vmem [shape: f32[8,2], index: 0, kind: input, shape index: {}]   ;;  %s330_s3 = inlined_call_operand.vmem [shape: bf16[128,128], index: 3, kind: input, shape index: {}]   ;;  %s331_s2 = inlined_call_operand.vmem [shape: f32[1,128], index: 2, kind: input, shape index: {}]   ;;  %s332_s4 = inlined_call_operand.vmem [shape: f32[1,128], index: 4, kind: input, shape index: {}]   ;;  %s333_s5 = inlined_call_operand.vmem [shape: bf16[8,128], index: 5, kind: output, shape index: {}]  }
   0x1   :  { %221 = vmatprep.subr.bf16.mxu0 %v257_v0  ;;  %v23_v1 = vld [vmem:[%s328_s1] sm:$0x1]  ;;  %223 = vmatprep.mubr.msk.bf16.mxu0 %vm258_vm1, %v257_v0  ;;  %v250_v6 = vld [vmem:[%s330_s3 + $0x8] sm:$0xff]   ;;  %v251_v7 = vld [vmem:[%s330_s3 + $0x10] sm:$0xff]  }
   0x2   :  { %v21_v2 = vld [vmem:[%s329_s0] sm:$0xff]  ;;  %v37_v3 = vsel %vm35_vm0, %v23_v1, 0  ;;  %227 = vmatprep.subr.bf16.mxu1 %v257_v0  ;;  %243 = vmatprep.mubr.msk.bf16.mxu1 %vm258_vm1, %v257_v0  ;;  %v252_v8 = vld [vmem:[%s330_s3 + $0x18] sm:$0xff]   ;;  %v254_v10 = vld [vmem:[%s330_s3 + $0x28] sm:$0xff]  }
   0x3   :  { %v22_v4 = vpack.c.bf16 %v21_v2, %v21_v2  ;;  %v249_v5 = vld [vmem:[%s330_s3] sm:$0xff]   ;;  %222 = vmatpush3.bf16.msra.mxu0 %v37_v3  ;;  %v255_v11 = vld [vmem:[%s330_s3 + $0x30] sm:$0xff]   ;;  %v256_v12 = vld [vmem:[%s330_s3 + $0x38] sm:$0xff]  }
   0x4   :  { %228 = vmatpush3.bf16.msra.mxu1 %v249_v5  ;;  %v253_v9 = vld [vmem:[%s330_s3 + $0x20] sm:$0xff]  }
   0x5   :  { %229 = vmatprep.subr.bf16.mxu1 %v257_v0  ;;  %v199_v13 = vld [vmem:[%s331_s2] ss:$0 sm:$0xff] }
   0x6   :  { %224 = vmatmul.mubr.msk.bf16.vlgmr.msra.gmra.mrb[0].mxu0 %vm31_vm2, %v22_v4  ;;  %v201_v21 = vld [vmem:[%s332_s4] ss:$0 sm:$0xff] }
   0x8   :  { %230 = vmatpush3.bf16.msra.mxu1 %v250_v6 }
   0x9   :  { %231 = vmatprep.subr.bf16.mxu1 %v257_v0 }
   0xc   :  { %232 = vmatpush3.bf16.msra.mxu1 %v251_v7 }
   0xd   :  { %233 = vmatprep.subr.bf16.mxu1 %v257_v0 }
  0x10   :  { %234 = vmatpush3.bf16.msra.mxu1 %v252_v8 }
  0x11   :  { %235 = vmatprep.subr.bf16.mxu1 %v257_v0 }
  0x14   :  { %236 = vmatpush3.bf16.msra.mxu1 %v253_v9 }
  0x15   :  { %237 = vmatprep.subr.bf16.mxu1 %v257_v0 }
  0x18   :  { %238 = vmatpush3.bf16.msra.mxu1 %v254_v10 }
  0x19   :  { %239 = vmatprep.subr.bf16.mxu1 %v257_v0 }
  0x1c   :  { %240 = vmatpush3.bf16.msra.mxu1 %v255_v11 }
  0x1d   :  { %241 = vmatprep.subr.bf16.mxu1 %v257_v0 }
  0x20   :  { %242 = vmatpush3.bf16.msra.mxu1 %v256_v12 }
  0xd9   :  { %v73_v14 = vpop.f32.mrb[0].mxu0 }
  0xda   :  { %v74_v15 = vadd.f32 %v199_v13, %v73_v14  ;;  %v225_v16 = vpop.f32.mrb[1].mxu0 }
  0xdb   :  { %v76_v17 = vpop.f32.mrb[2].mxu0 }
  0xdc   :  { %v79_v18 = vmax.f32 %v74_v15, 0.0  ;;  %v226_v19 = vpop.f32.mrb[3].mxu0 }
  0xde   :  { %v80_v20 = vpack.c.bf16 %v79_v18, %v79_v18 }
  0xe0   :  { %244 = vmatmul.mubr.bf16.vlgmr.msra.gmra.mrb[0].mxu1 %v80_v20 }
 0x1b3   :  { %v186_v22 = vpop.f32.mrb[0].mxu1 }
 0x1b4   :  { %v187_v23 = vadd.f32 %v201_v21, %v186_v22  ;;  %v245_v24 = vpop.f32.mrb[1].mxu1 }
 0x1b5   :  { %v189_v25 = vpop.f32.mrb[2].mxu1 }
 0x1b6   :  { %v192_v26 = vmax.f32 %v187_v23, 0.0  ;;  %v246_v27 = vpop.f32.mrb[3].mxu1 }
 0x1b8   :  { %v193_v28 = vpack.c.bf16 %v192_v26, %v192_v26 }
 0x1ba   :  { %194 = vst [vmem:[%s333_s5] sm:$0xf] %v193_v28 }

// kernel: _lambda_.10
= control target key start
LH: loop header
LB: loop body
LE: loop exit
PB: predicated region body
PF: predicated region fallthrough
CT: control target
= control target key end

     0   :  { %s2284_s13 = smov 0   ;;  %s2286_s14 = smov 0   ;;  %s2627_s0 = inlined_call_operand.vmem [shape: bf16[2,4,128], index: 0, kind: input, shape index: {}, may-alias: {0,1}]   ;;  %s2628_s1 = inlined_call_operand.vmem [shape: bf16[2,4,128], index: 1, kind: input, shape index: {}, may-alias: {0,1}]   ;;  %s2629_s2 = inlined_call_operand.vmem [shape: bf16[128,128], index: 2, kind: input, shape index: {}]   ;;  %s2630_s3 = inlined_call_operand.vmem [shape: bf16[128,256], index: 3, kind: input, shape index: {}]   ;;  %s2631_s4 = inlined_call_operand.vmem [shape: bf16[128,128], index: 4, kind: input, shape index: {}]   ;;  %s2632_s5 = inlined_call_operand.vmem [shape: f32[1,128], index: 5, kind: input, shape index: {}]   ;;  %s2633_s6 = inlined_call_operand.vmem [shape: f32[1,128], index: 6, kind: input, shape index: {}]   ;;  %s2634_s7 = inlined_call_operand.vmem [shape: f32[1,128], index: 7, kind: input, shape index: {}]   ;;  %s2635_s8 = inlined_call_operand.vmem [shape: f32[1,128], index: 8, kind: input, shape index: {}]   ;;  %s2636_s9 = inlined_call_operand.vmem [shape: f32[1,128], index: 9, kind: input, shape index: {}]   ;;  %s2637_s10 = inlined_call_operand.vmem [shape: bf16[2,4,128], index: 10, kind: output, shape index: {}]  }
   0x1   :  { %s2288_s15 = smov 0  }
   0x2 LB: > { %s32_s16 = sadd.s32 1, %s2213_s14  ;;  %p1840_p0 = scmp.ge.s32.totalorder %s2217_s15, 1  ;;  %s2217_s15 = sphi %s2288_s15, %s20_s15   ;;  %s2213_s14 = sphi %s2286_s14, %s2639_s14   ;;  %s2209_s13 = sphi %s2284_s13, %s2638_s13  }
   0x3   : > { %p34_p1 = scmp.ge.s32.totalorder %s32_s16, 2  ;;  %p339_p2 = scmp.lt.s32.totalorder %s2217_s15, 3 }
   0x5   : > { %s2641_s16 = smov (%p34_p1, %s32_s16), 0  ;;  %p340_p3 = pnand %p1840_p0, %p339_p2 }
   0x6   : > { %v2119_v0 = vld [vmem:[%s2630_s3 + $0x4] ss:$8 sps:$4 sm:$0xff] (!%p340_p3)   ;;  %v2121_v1 = vld [vmem:[%s2630_s3] ss:$8 sps:$4 sm:$0xff] (!%p340_p3)   ;;  %v2219_v2 = vmov (!%p340_p3), 0.0   ;;  %v2220_v3 = vmov (!%p340_p3), 0  }
   0x7   : > { %343 = sbr.rel (%p340_p3) target bundleno = 2161 (0x871), region = 60  ;;  %1949 = vmatprep.subr.bf16.mxu0 (!%p340_p3), %v2219_v2  ;;  %638 = vmatprep.mubr.bf16.mxu1 (!%p340_p3), %v2220_v3  ;;  %v2122_v4 = vld [vmem:[%s2629_s2] sm:$0xff] (!%p340_p3)   ;;  %v2123_v5 = vld [vmem:[%s2630_s3 + $0x14] ss:$8 sps:$4 sm:$0xff] (!%p340_p3)   ;;  %v2125_v6 = vld [vmem:[%s2630_s3 + $0x10] ss:$8 sps:$4 sm:$0xff] (!%p340_p3)  }
   0x8   : > { %606 = vmatprep.subr.bf16.mxu1 (!%p340_p3), %v2119_v0  ;;  %vm2221_vm0 = vmmov (!%p340_p3), 0   ;;  %1950 = vmatpush3.bf16.msra.mxu0 (!%p340_p3), %v2122_v4  ;;  %v2126_v7 = vld [vmem:[%s2629_s2 + $0x8] sm:$0xff] (!%p340_p3)   ;;  %v2130_v10 = vld [vmem:[%s2629_s2 + $0x10] sm:$0xff] (!%p340_p3)   ;;  %v2134_v13 = vld [vmem:[%s2629_s2 + $0x18] sm:$0xff] (!%p340_p3)   ;;  %p385_p4 = scmp.lt.s32.totalorder (!%p340_p3), %s2209_s13, 1  ;;  %vm696_vm1 = vcmask (!%p340_p3), 130048  }
   0x9   : > { %607 = vmatpush1.bf16.msra.mxu1 (!%p340_p3), %v2121_v1  ;;  %1965 = vmatprep.mubr.msk.bf16.mxu0 (!%p340_p3), %vm2221_vm0, %v2219_v2  ;;  %v2127_v8 = vld [vmem:[%s2630_s3 + $0x24] ss:$8 sps:$4 sm:$0xff] (!%p340_p3)   ;;  %v2129_v9 = vld [vmem:[%s2630_s3 + $0x20] ss:$8 sps:$4 sm:$0xff] (!%p340_p3)   ;;  %v2131_v11 = vld [vmem:[%s2630_s3 + $0x34] ss:$8 sps:$4 sm:$0xff] (!%p340_p3)  }
   0xa   : > { %608 = vmatprep.subr.bf16.mxu1 (!%p340_p3), %v2123_v5  ;;  %1951 = vmatprep.subr.bf16.mxu0 (!%p340_p3), %v2219_v2  ;;  %v2133_v12 = vld [vmem:[%s2630_s3 + $0x30] ss:$8 sps:$4 sm:$0xff] (!%p340_p3)   ;;  %v2135_v14 = vld [vmem:[%s2630_s3 + $0x44] ss:$8 sps:$4 sm:$0xff] (!%p340_p3)   ;;  %v2137_v15 = vld [vmem:[%s2630_s3 + $0x40] ss:$8 sps:$4 sm:$0xff] (!%p340_p3)  }
   0xb   : > { %v2138_v16 = vld [vmem:[%s2629_s2 + $0x20] sm:$0xff] (!%p340_p3)   ;;  %v2139_v17 = vld [vmem:[%s2630_s3 + $0x54] ss:$8 sps:$4 sm:$0xff] (!%p340_p3)   ;;  %v2141_v18 = vld [vmem:[%s2630_s3 + $0x50] ss:$8 sps:$4 sm:$0xff] (!%p340_p3)   ;;  %s2222_s23 = smov (!%p340_p3), 96  }
   0xc   : > { %1952 = vmatpush3.bf16.msra.mxu0 (!%p340_p3), %v2126_v7  ;;  %v2142_v19 = vld [vmem:[%s2629_s2 + $0x28] sm:$0xff] (!%p340_p3)   ;;  %v2146_v22 = vld [vmem:[%s2629_s2 + $0x30] sm:$0xff] (!%p340_p3)   ;;  %v2150_v25 = vld [vmem:[%s2629_s2 + $0x38] sm:$0xff] (!%p340_p3)   ;;  %s2223_s24 = smov (!%p340_p3), 112   ;;  %s2224_s25 = smov (!%p340_p3), 64   ;;  %vm1166_vm2 = vcmask (!%p340_p3), 1041408  }
   0xd   : > { %609 = vmatpush1.bf16.msra.mxu1 (!%p340_p3), %v2125_v6  ;;  %1953 = vmatprep.subr.bf16.mxu0 (!%p340_p3), %v2219_v2  ;;  %v2143_v20 = vld [vmem:[%s2630_s3 + $0x64] ss:$8 sps:$4 sm:$0xff] (!%p340_p3)   ;;  %v2145_v21 = vld [vmem:[%s2630_s3 + $0x60] ss:$8 sps:$4 sm:$0xff] (!%p340_p3)   ;;  %v2147_v23 = vld [vmem:[%s2630_s3 + $0x74] ss:$8 sps:$4 sm:$0xff] (!%p340_p3)  }
   0xe   : > { %610 = vmatprep.subr.bf16.mxu1 %v2127_v8  ;;  %s2643_s13 = smov (!%p385_p4, %s2209_s13), 1  ;;  %v2149_v24 = vld [vmem:[%s2630_s3 + $0x70] ss:$8 sps:$4 sm:$0xff]   ;;  %s2225_s26 = smov 80   ;;  %vm1065_vm3 = vcmask 27648   ;;  %vm1162_vm4 = vcmask 31744  }
   0xf   : > { %s2381_s29 = sshll.u32 %s2643_s13, 1  ;;  %s2226_s27 = smov 48   ;;  %vm1561_vm5 = vcmask 261120   ;;  %vm1563_vm6 = vcmask 392192   ;;  %vm1565_vm7 = vcmask 523264   ;;  %vm1567_vm8 = vcmask 654336  }
  0x10   : > { %1954 = vmatpush3.bf16.msra.mxu0 %v2130_v10  ;;  %s395_s20 = scalar_lea.vmem %s2628_s1, %s2381_s29  ;;  %s391_s22 = scalar_lea.vmem %s2627_s0, %s2381_s29  ;;  %vm1569_vm9 = vcmask 785408   ;;  %vm1571_vm10 = vcmask 916480   ;;  %vm1576_vm11 = vcmask 1043456  }
  0x11   : > { %611 = vmatpush1.bf16.msra.mxu1 %v2129_v9  ;;  %1955 = vmatprep.subr.bf16.mxu0 %v2219_v2  ;;  %v405_v26 = vld [vmem:[%s395_s20] sm:$0x3]  ;;  %s2227_s28 = smov 32   ;;  %s2228_s30 = smov 16  }
  0x12   : > { %612 = vmatprep.subr.bf16.mxu1 %v2131_v11  ;;  %v404_v27 = vld [vmem:[%s391_s22] sm:$0x3] }
  0x14   : > { %1956 = vmatpush3.bf16.msra.mxu0 %v2134_v13 }
  0x15   : > { %613 = vmatpush1.bf16.msra.mxu1 %v2133_v12  ;;  %1957 = vmatprep.subr.bf16.mxu0 %v2219_v2 }
  0x16   : > { %614 = vmatprep.subr.bf16.mxu1 %v2135_v14 }
  0x18   : > { %1958 = vmatpush3.bf16.msra.mxu0 %v2138_v16 }
  0x19   : > { %615 = vmatpush1.bf16.msra.mxu1 %v2137_v15  ;;  %1959 = vmatprep.subr.bf16.mxu0 %v2219_v2 }
  0x1a   : > { %616 = vmatprep.subr.bf16.mxu1 %v2139_v17 }
  0x1c   : > { %1960 = vmatpush3.bf16.msra.mxu0 %v2142_v19 }
  0x1d   : > { %617 = vmatpush1.bf16.msra.mxu1 %v2141_v18  ;;  %1961 = vmatprep.subr.bf16.mxu0 %v2219_v2 }
  0x1e   : > { %618 = vmatprep.subr.bf16.mxu1 %v2143_v20 }
  0x20   : > { %1962 = vmatpush3.bf16.msra.mxu0 %v2146_v22 }
  0x21   : > { %619 = vmatpush1.bf16.msra.mxu1 %v2145_v21  ;;  %1963 = vmatprep.subr.bf16.mxu0 %v2219_v2 }
  0x22   : > { %620 = vmatprep.subr.bf16.mxu1 %v2147_v23 }
  0x24   : > { %1964 = vmatpush3.bf16.msra.mxu0 %v2150_v25 }
  0x25   : > { %621 = vmatpush1.bf16.msra.mxu1 %v2149_v24  ;;  %1993 = vmatprep.subr.bf16.mxu0 %v2219_v2 }
  0x26   : > { %1969 = vmatprep.subr.bf16.mxu1 %v2219_v2 }
  0x27   : > { %1966 = vmatmul.mubr.bf16.vlgmr.msra.gmra.mrb[0].mxu0 %v404_v27 }
  0x28   : > { %639 = vmatmul.mubr.bf16.vlgmr.msra.gmra.mrb[0].mxu1 %v405_v26  ;;  %1995 = vmatprep.mubr.msk.bf16.mxu0 %vm2221_vm0, %v2219_v2 }
  0x29   : > { %1971 = vmatprep.mubr.msk.bf16.mxu1 %vm2221_vm0, %v2219_v2 }
  0xfa   : > { %v2404_v31 = vpop.f32.mrb[0].mxu0 }
  0xfb   : > { %v640_v28 = vpop.f32.mrb[0].mxu1  ;;  %v647_v32 = vmul.f32 0.088388346, %v2404_v31  ;;  %v1967_v34 = vpop.f32.mrb[1].mxu0 }
  0xfc   : > { %v649_v29 = vpack.c.bf16 %v640_v28, %v640_v28  ;;  %v642_v30 = vpop.f32.mrb[1].mxu1  ;;  %v507_v37 = vpop.f32.mrb[2].mxu0 }
  0xfd   : > { %v644_v33 = vpop.f32.mrb[2].mxu1  ;;  %v648_v38 = vpack.c.bf16 %v647_v32, %v647_v32  ;;  %v1968_v39 = vpop.f32.mrb[3].mxu0  ;;  %v2426_v40 = vpack.c.bf16 %v642_v30, %v642_v30 }
  0xfe   : > { %669 = vrot.lane.b32.xlu1 %v649_v29, %s2222_s23  ;;  %667 = vrot.lane.b32.xlu0 %v649_v29, %s2223_s24  ;;  %v645_v35 = vpop.f32.mrb[3].mxu1  ;;  %v701_v36 = vsel %vm696_vm1, %v649_v29, 0 }
  0xff   : > { %1970 = vmatpush3.bf16.xpose.msra.mxu1 %v701_v36  ;;  %v1168_v59 = vsel %vm1166_vm2, %v2426_v40, 0 }
 0x100   : > { %1975 = vmatprep.subr.bf16.mxu1 %v2219_v2 }
 0x102   : > { %654 = vrot.lane.b32.xlu1 %v648_v38, %s2222_s23  ;;  %652 = vrot.lane.b32.xlu0 %v648_v38, %s2223_s24 }
 0x106   : > { %673 = vrot.lane.b32.xlu1 %v649_v29, %s2224_s25  ;;  %671 = vrot.lane.b32.xlu0 %v649_v29, %s2225_s26 }
 0x107   : > { %1972 = vmatmul.mubr.msk.bf16.vlgmr.msra.gmra.mrb[4].mxu1 %vm696_vm1, %v648_v38 }
 0x108   : > { %1977 = vmatprep.mubr.msk.bf16.mxu1 %vm2221_vm0, %v2219_v2 }
 0x10a   : > { %675 = vrot.lane.b32.xlu1 %v649_v29, %s2226_s27  ;;  %656 = vrot.lane.b32.xlu0 %v648_v38, %s2225_s26 }
 0x10e   : > { %677 = vrot.lane.b32.xlu1 %v649_v29, %s2227_s28  ;;  %658 = vrot.lane.b32.xlu0 %v648_v38, %s2224_s25 }
 0x112   : > { %679 = vrot.lane.b32.xlu1 %v649_v29, %s2228_s30  ;;  %660 = vrot.lane.b32.xlu0 %v648_v38, %s2226_s27 }
 0x116   : > { %664 = vrot.lane.b32.xlu1 %v648_v38, %s2228_s30  ;;  %662 = vrot.lane.b32.xlu0 %v648_v38, %s2227_s28 }
 0x11a   : > { %682 = vrot.lane.b32.xlu1 %v2426_v40, %s2223_s24 }
 0x170   : > { %v670_v41 = vpop.permute.xlu1 %669  ;;  %v668_v42 = vpop.permute.xlu0 %667 }
 0x171   : > { %v747_v43 = vsel %vm696_vm1, %v668_v42, 0  ;;  %v793_v48 = vsel %vm696_vm1, %v670_v41, 0 }
 0x172   : > { %1976 = vmatpush3.bf16.xpose.msra.mxu1 %v747_v43 }
 0x173   : > { %1981 = vmatprep.subr.bf16.mxu1 %v2219_v2 }
 0x174   : > { %v655_v44 = vpop.permute.xlu1 %654  ;;  %v653_v45 = vpop.permute.xlu0 %652 }
 0x178   : > { %v674_v46 = vpop.permute.xlu1 %673  ;;  %v672_v47 = vpop.permute.xlu0 %671 }
 0x179   : > { %v885_v49 = vsel %vm696_vm1, %v674_v46, 0  ;;  %1978 = vmatmul.mubr.msk.bf16.vlgmr.msra.gmra.mrb[8].mxu1 %vm696_vm1, %v653_v45  ;;  %v839_v54 = vsel %vm696_vm1, %v672_v47, 0 }
 0x17a   : > { %1982 = vmatpush3.bf16.xpose.msra.mxu1 %v793_v48  ;;  %1994 = vmatpush3.bf16.xpose.msra.mxu0 %v885_v49 }
 0x17b   : > { %1983 = vmatprep.mubr.msk.bf16.mxu1 %vm2221_vm0, %v2219_v2  ;;  %1987 = vmatprep.subr.bf16.mxu1 %v2219_v2 }
 0x17c   : > { %v676_v50 = vpop.permute.xlu1 %675  ;;  %v657_v51 = vpop.permute.xlu0 %656  ;;  %2005 = vmatprep.subr.bf16.mxu0 %v2219_v2 }
 0x17d   : > { %v931_v58 = vsel %vm696_vm1, %v676_v50, 0 }
 0x180   : > { %v678_v52 = vpop.permute.xlu1 %677  ;;  %v659_v53 = vpop.permute.xlu0 %658 }
 0x181   : > { %v977_v55 = vsel %vm696_vm1, %v678_v52, 0  ;;  %1984 = vmatmul.mubr.msk.bf16.vlgmr.msra.gmra.mrb[12].mxu1 %vm696_vm1, %v655_v44  ;;  %1996 = vmatmul.mubr.msk.bf16.vlgmr.msra.gmra.mrb[4].mxu0 %vm696_vm1, %v659_v53 }
 0x182   : > { %1988 = vmatpush3.bf16.xpose.msra.mxu1 %v839_v54  ;;  %2006 = vmatpush3.bf16.xpose.msra.mxu0 %v977_v55 }
 0x183   : > { %2007 = vmatprep.mubr.msk.bf16.mxu0 %vm2221_vm0, %v2219_v2  ;;  %1989 = vmatprep.mubr.msk.bf16.mxu1 %vm2221_vm0, %v2219_v2 }
 0x184   : > { %v661_v56 = vpop.permute.xlu0 %660  ;;  %1999 = vmatprep.subr.bf16.mxu1 %v2219_v2  ;;  %2017 = vmatprep.subr.bf16.mxu0 %v2219_v2  ;;  %v680_v60 = vpop.permute.xlu1 %679 }
 0x185   : > { %v1023_v62 = vsel %vm696_vm1, %v680_v60, 0 }
 0x188   : > { %v663_v57 = vpop.permute.xlu0 %662  ;;  %v665_v61 = vpop.permute.xlu1 %664 }
 0x189   : > { %1990 = vmatmul.mubr.msk.bf16.vlgmr.msra.gmra.mrb[16].mxu1 %vm696_vm1, %v657_v51  ;;  %2008 = vmatmul.mubr.msk.bf16.vlgmr.msra.gmra.mrb[8].mxu0 %vm696_vm1, %v663_v57 }
 0x18a   : > { %2000 = vmatpush3.bf16.xpose.msra.mxu1 %v931_v58  ;;  %2018 = vmatpush3.bf16.msra.mxu0 %v1168_v59 }
 0x18b   : > { %2001 = vmatprep.mubr.msk.bf16.mxu1 %vm2221_vm0, %v2219_v2  ;;  %2011 = vmatprep.subr.bf16.mxu1 %v2219_v2 }
 0x18c   : > { %2019 = vmatprep.mubr.msk.bf16.mxu0 %vm2221_vm0, %v2219_v2  ;;  %2029 = vmatprep.subr.bf16.mxu0 %v2219_v2  ;;  %v683_v63 = vpop.permute.xlu1 %682 }
 0x18d   : > { %v1214_v0 = vsel %vm1166_vm2, %v683_v63, 0 }
 0x191   : > { %2002 = vmatmul.mubr.msk.bf16.vlgmr.msra.gmra.mrb[20].mxu1 %vm696_vm1, %v661_v56 }
 0x192   : > { %2012 = vmatpush3.bf16.xpose.msra.mxu1 %v1023_v62  ;;  %2013 = vmatprep.mubr.msk.bf16.mxu1 %vm2221_vm0, %v2219_v2 }
 0x193   : > { %2023 = vmatprep.subr.bf16.mxu1 %v2219_v2 }
 0x199   : > { %2014 = vmatmul.mubr.msk.bf16.vlgmr.msra.gmra.mrb[24].mxu1 %vm696_vm1, %v665_v61 }
 0x19a   : > { %2024 = vmatpush3.bf16.msra.mxu1 %v1214_v0  ;;  %2025 = vmatprep.mubr.msk.bf16.mxu1 %vm2221_vm0, %v2219_v2 }
 0x19b   : > { %2035 = vmatprep.subr.bf16.mxu1 %v2219_v2 }
 0x1da   : > { %v737_v1 = vpop.f32.mrb[4].mxu1 }
 0x1db   : > { %v1973_v3 = vpop.f32.mrb[5].mxu1  ;;  %v1066_v4 = vsel %vm1065_vm3, %v737_v1, -inf }
 0x1dc   : > { %1067 = vmax.xlane.f32.xlu0 %v1066_v4  ;;  %v740_v5 = vpop.f32.mrb[6].mxu1 }
 0x1dd   : > { %v1974_v6 = vpop.f32.mrb[7].mxu1 }
 0x24c   : > { %v783_v7 = vpop.f32.mrb[8].mxu1 }
 0x24d   : > { %v1979_v8 = vpop.f32.mrb[9].mxu1  ;;  %v1069_v9 = vsel %vm1065_vm3, %v783_v7, -inf }
 0x24e   : > { %1070 = vmax.xlane.f32.xlu1 %v1069_v9  ;;  %v786_v10 = vpop.f32.mrb[10].mxu1 }
 0x24f   : > { %v1980_v11 = vpop.f32.mrb[11].mxu1 }
 0x254   : > { %v829_v12 = vpop.f32.mrb[12].mxu1  ;;  %v921_v13 = vpop.f32.mrb[4].mxu0 }
 0x255   : > { %v1985_v14 = vpop.f32.mrb[13].mxu1  ;;  %v1997_v15 = vpop.f32.mrb[5].mxu0  ;;  %v1072_v16 = vsel %vm1065_vm3, %v829_v12, -inf  ;;  %v1078_v17 = vsel %vm1065_vm3, %v921_v13, -inf }
 0x256   : > { %1073 = vmax.xlane.f32.xlu0 %v1072_v16  ;;  %v832_v18 = vpop.f32.mrb[14].mxu1  ;;  %1079 = vmax.xlane.f32.xlu1 %v1078_v17  ;;  %v924_v19 = vpop.f32.mrb[6].mxu0 }
 0x257   : > { %v1986_v20 = vpop.f32.mrb[15].mxu1  ;;  %v1998_v21 = vpop.f32.mrb[7].mxu0 }
 0x25c   : > { %v875_v22 = vpop.f32.mrb[16].mxu1  ;;  %v2474_v23 = vpop.f32.mrb[8].mxu0 }
 0x25d   : > { %v1991_v24 = vpop.f32.mrb[17].mxu1  ;;  %v2009_v25 = vpop.f32.mrb[9].mxu0  ;;  %v1075_v26 = vsel %vm1065_vm3, %v875_v22, -inf  ;;  %v1084_v27 = vsel %vm1065_vm3, %v2474_v23, -inf }
 0x25e   : > { %1076 = vmax.xlane.f32.xlu0 %v1075_v26  ;;  %v878_v28 = vpop.f32.mrb[18].mxu1  ;;  %1085 = vmax.xlane.f32.xlu1 %v1084_v27  ;;  %v1016_v29 = vpop.f32.mrb[10].mxu0 }
 0x25f   : > { %v1992_v30 = vpop.f32.mrb[19].mxu1  ;;  %v2010_v32 = vpop.f32.mrb[11].mxu0 }
 0x264   : > { %v967_v33 = vpop.f32.mrb[20].mxu1 }
 0x265   : > { %v2003_v34 = vpop.f32.mrb[21].mxu1  ;;  %v1081_v35 = vsel %vm1065_vm3, %v967_v33, -inf }
 0x266   : > { %1082 = vmax.xlane.f32.xlu0 %v1081_v35  ;;  %v970_v36 = vpop.f32.mrb[22].mxu1 }
 0x267   : > { %v2004_v37 = vpop.f32.mrb[23].mxu1 }
 0x269   : > { %v1068_v44 = vpop.xlane.xlu0 %1067 }
 0x26a   : > { %v1090_v45 = vsub.f32 %v737_v1, %v1068_v44 }
 0x26c   : > { %v1059_v38 = vpop.f32.mrb[24].mxu1  ;;  %v1098_v46 = vmul.f32 1.442695, %v1090_v45 }
 0x26d   : > { %v2015_v39 = vpop.f32.mrb[25].mxu1  ;;  %v1087_v41 = vsel %vm1065_vm3, %v1059_v38, -inf }
 0x26e   : > { %1088 = vmax.xlane.f32.xlu0 %v1087_v41  ;;  %v1062_v42 = vpop.f32.mrb[26].mxu1  ;;  %2159 = vpow2.f32 %v1098_v46 }
 0x26f   : > { %v2016_v43 = vpop.f32.mrb[27].mxu1  ;;  %686 = vrot.lane.b32.xlu1 %v2426_v40, %s2225_s26 }
 0x278   : > { %v2160_v47 = vpop.eup %2159 }
 0x279   : > { %v1114_v48 = vsel %vm1065_vm3, %v2160_v47, 0.0 }
 0x284   : > { %684 = vrot.lane.b32.xlu0 %v2426_v40, %s2222_s23 }
 0x293   : > { %1115 = vadd.xlane.f32.xlu1 %v1114_v48 }
 0x2db   : > { %v1071_v49 = vpop.xlane.xlu1 %1070 }
 0x2dc   : > { %v1091_v50 = vsub.f32 %v783_v7, %v1071_v49 }
 0x2de   : > { %v1100_v51 = vmul.f32 1.442695, %v1091_v50 }
 0x2e0   : > { %2161 = vpow2.f32 %v1100_v51 }
 0x2e3   : > { %v1074_v52 = vpop.xlane.xlu0 %1073  ;;  %v1080_v53 = vpop.xlane.xlu1 %1079 }
 0x2e4   : > { %v1092_v54 = vsub.f32 %v829_v12, %v1074_v52  ;;  %v1094_v55 = vsub.f32 %v921_v13, %v1080_v53 }
 0x2e6   : > { %v1106_v56 = vmul.f32 1.442695, %v1094_v55  ;;  %v1102_v57 = vmul.f32 1.442695, %v1092_v54 }
 0x2e8   : > { %2163 = vpow2.f32 %v1106_v56 }
 0x2e9   : > { %2165 = vpow2.f32 %v1102_v57 }
 0x2ea   : > { %v2162_v58 = vpop.eup %2161 }
 0x2eb   : > { %v1077_v59 = vpop.xlane.xlu0 %1076  ;;  %v1117_v60 = vsel %vm1065_vm3, %v2162_v58, 0.0  ;;  %v1086_v6 = vpop.xlane.xlu1 %1085 }
 0x2ec   : > { %v1093_v61 = vsub.f32 %v875_v22, %v1077_v59  ;;  %1118 = vadd.xlane.f32.xlu0 %v1117_v60  ;;  %v1096_v7 = vsub.f32 %v2474_v23, %v1086_v6 }
 0x2ee   : > { %v1104_v62 = vmul.f32 1.442695, %v1093_v61  ;;  %v1110_v10 = vmul.f32 1.442695, %v1096_v7 }
 0x2ef   : > { %v687_v11 = vpop.permute.xlu1 %686 }
 0x2f0   : > { %2167 = vpow2.f32 %v1104_v62  ;;  %v1306_v35 = vsel %vm1166_vm2, %v687_v11, 0 }
 0x2f1   : > { %2169 = vpow2.f32 %v1110_v10 }
 0x2f2   : > { %v2487_v63 = vpop.eup %2163 }
 0x2f3   : > { %v1126_v0 = vsel %vm1065_vm3, %v2487_v63, 0.0  ;;  %v2166_v1 = vpop.eup %2165  ;;  %v1083_v8 = vpop.xlane.xlu0 %1082 }
 0x2f4   : > { %1127 = vadd.xlane.f32.xlu1 %v1126_v0  ;;  %v1120_v3 = vsel %vm1065_vm3, %v2166_v1, 0.0  ;;  %v1095_v9 = vsub.f32 %v967_v33, %v1083_v8 }
 0x2f6   : > { %v1108_v13 = vmul.f32 1.442695, %v1095_v9 }
 0x2f8   : > { %1121 = vadd.xlane.f32.xlu1 %v1120_v3 }
 0x2fa   : > { %v2492_v4 = vpop.eup %2167 }
 0x2fb   : > { %v1123_v5 = vsel %vm1065_vm3, %v2492_v4, 0.0  ;;  %v1089_v12 = vpop.xlane.xlu0 %1088  ;;  %v2501_v17 = vpop.eup %2169 }
 0x2fc   : > { %1124 = vadd.xlane.f32.xlu0 %v1123_v5  ;;  %v1097_v14 = vsub.f32 %v1059_v38, %v1089_v12  ;;  %v1132_v22 = vsel %vm1065_vm3, %v2501_v17, 0.0 }
 0x2fe   : > { %v1112_v16 = vmul.f32 1.442695, %v1097_v14 }
 0x2ff   : > { %v685_v21 = vpop.permute.xlu0 %684 }
 0x300   : > { %v1260_v24 = vsel %vm1166_vm2, %v685_v21, 0 }
 0x309   : > { %688 = vrot.lane.b32.xlu1 %v2426_v40, %s2224_s25 }
 0x312   : > { %690 = vrot.lane.b32.xlu0 %v2426_v40, %s2226_s27 }
 0x320   : > { %v1116_v15 = vpop.xlane.xlu1 %1115 }
 0x321   : > { %2171 = vrcp.f32 %v1116_v15 }
 0x322   : > { %2173 = vpow2.f32 %v1108_v13 }
 0x323   : > { %2175 = vpow2.f32 %v1112_v16 }
 0x32b   : > { %v2172_v18 = vpop.eup %2171 }
 0x32c   : > { %v1146_v19 = vmul.f32 %v2172_v18, %v2160_v47  ;;  %v2503_v20 = vpop.eup %2173 }
 0x32d   : > { %1133 = vadd.xlane.f32.xlu1 %v1132_v22  ;;  %v1129_v25 = vsel %vm1065_vm3, %v2503_v20, 0.0  ;;  %v2511_v26 = vpop.eup %2175 }
 0x32e   : > { %v1154_v23 = vpack.c.bf16 %v1146_v19, %v1146_v19  ;;  %v1135_v27 = vsel %vm1065_vm3, %v2511_v26, 0.0 }
 0x330   : > { %2020 = vmatmul.mubr.msk.bf16.vlgmr.msra.gmra.mrb[12].mxu0 %vm1162_vm4, %v1154_v23 }
 0x331   : > { %2030 = vmatpush3.bf16.msra.mxu0 %v1260_v24  ;;  %1130 = vadd.xlane.f32.xlu0 %v1129_v25 }
 0x332   : > { %2031 = vmatprep.mubr.msk.bf16.mxu0 %vm2221_vm0, %v2219_v2  ;;  %2041 = vmatprep.subr.bf16.mxu0 %v2219_v2 }
 0x335   : > { %1136 = vadd.xlane.f32.xlu0 %v1135_v27 }
 0x33e   : > { %692 = vrot.lane.b32.xlu1 %v2426_v40, %s2227_s28 }
 0x34b   : > { %694 = vrot.lane.b32.xlu0 %v2426_v40, %s2228_s30 }
 0x379   : > { %v1119_v28 = vpop.xlane.xlu0 %1118 }
 0x37a   : > { %2177 = vrcp.f32 %v1119_v28 }
 0x381   : > { %v1128_v29 = vpop.xlane.xlu1 %1127 }
 0x384   : > { %v2178_v30 = vpop.eup %2177 }
 0x385   : > { %v1147_v32 = vmul.f32 %v2178_v30, %v2162_v58  ;;  %v1122_v33 = vpop.xlane.xlu1 %1121 }
 0x386   : > { %2179 = vrcp.f32 %v1122_v33 }
 0x387   : > { %v1155_v34 = vpack.c.bf16 %v1147_v32, %v1147_v32 }
 0x389   : > { %2026 = vmatmul.mubr.msk.bf16.vlgmr.msra.gmra.mrb[28].mxu1 %vm1162_vm4, %v1155_v34  ;;  %v1125_v36 = vpop.xlane.xlu0 %1124  ;;  %v689_v38 = vpop.permute.xlu1 %688 }
 0x38a   : > { %2181 = vrcp.f32 %v1125_v36  ;;  %2036 = vmatpush3.bf16.msra.mxu1 %v1306_v35  ;;  %2037 = vmatprep.mubr.msk.bf16.mxu1 %vm2221_vm0, %v2219_v2  ;;  %v1352_v44 = vsel %vm1166_vm2, %v689_v38, 0 }
 0x38b   : > { %2183 = vrcp.f32 %v1128_v29  ;;  %2047 = vmatprep.subr.bf16.mxu1 %v2219_v2 }
 0x38d   : > { %v691_v45 = vpop.permute.xlu0 %690 }
 0x38e   : > { %v1398_v48 = vsel %vm1166_vm2, %v691_v45, 0 }
 0x390   : > { %v2180_v40 = vpop.eup %2179 }
 0x391   : > { %v1148_v37 = vmul.f32 %v2180_v40, %v2166_v1 }
 0x393   : > { %v1156_v41 = vpack.c.bf16 %v1148_v37, %v1148_v37 }
 0x394   : > { %v2182_v39 = vpop.eup %2181 }
 0x395   : > { %v2184_v42 = vpop.eup %2183  ;;  %v1149_v43 = vmul.f32 %v2182_v39, %v2492_v4  ;;  %2032 = vmatmul.mubr.msk.bf16.vlgmr.msra.gmra.mrb[16].mxu0 %vm1162_vm4, %v1156_v41 }
 0x396   : > { %2042 = vmatpush3.bf16.msra.mxu0 %v1352_v44  ;;  %2043 = vmatprep.mubr.msk.bf16.mxu0 %vm2221_vm0, %v2219_v2  ;;  %v1150_v47 = vmul.f32 %v2184_v42, %v2487_v63 }
 0x397   : > { %v1157_v46 = vpack.c.bf16 %v1149_v43, %v1149_v43  ;;  %2053 = vmatprep.subr.bf16.mxu0 %v2219_v2 }
 0x398   : > { %v1158_v49 = vpack.c.bf16 %v1150_v47, %v1150_v47 }
 0x399   : > { %2038 = vmatmul.mubr.msk.bf16.vlgmr.msra.gmra.mrb[32].mxu1 %vm1162_vm4, %v1157_v46 }
 0x39a   : > { %2048 = vmatpush3.bf16.msra.mxu1 %v1398_v48  ;;  %2049 = vmatprep.mubr.msk.bf16.mxu1 %vm2221_vm0, %v2219_v2 }
 0x39b   : > { %2059 = vmatprep.subr.bf16.mxu1 %v2219_v2 }
 0x39d   : > { %2044 = vmatmul.mubr.msk.bf16.vlgmr.msra.gmra.mrb[20].mxu0 %vm1162_vm4, %v1158_v49 }
 0x39e   : > { %2055 = vmatprep.mubr.msk.bf16.mxu0 %vm2221_vm0, %v2219_v2 }
 0x3ba   : > { %v1134_v50 = vpop.xlane.xlu1 %1133 }
 0x3bb   : > { %2185 = vrcp.f32 %v1134_v50 }
 0x3be   : > { %v1131_v51 = vpop.xlane.xlu0 %1130  ;;  %v693_v52 = vpop.permute.xlu1 %692 }
 0x3bf   : > { %2187 = vrcp.f32 %v1131_v51  ;;  %v1444_v53 = vsel %vm1166_vm2, %v693_v52, 0  ;;  %v2151_v52 = vld [vmem:[%s2631_s4] sm:$0xff]  }
 0x3c0   : > { %2054 = vmatpush3.bf16.msra.mxu0 %v1444_v53  ;;  %v2152_v53 = vld [vmem:[%s2631_s4 + $0x8] sm:$0xff]  }
 0x3c1   : > { %2065 = vmatprep.subr.bf16.mxu0 %v2219_v2 }
 0x3c2   : > { %v1137_v54 = vpop.xlane.xlu0 %1136 }
 0x3c3   : > { %2189 = vrcp.f32 %v1137_v54 }
 0x3c5   : > { %v2186_v55 = vpop.eup %2185 }
 0x3c6   : > { %v1152_v56 = vmul.f32 %v2186_v55, %v2501_v17  ;;  %v695_v60 = vpop.permute.xlu0 %694 }
 0x3c7   : > { %v1490_v63 = vsel %vm1166_vm2, %v695_v60, 0  ;;  %v2155_v60 = vld [vmem:[%s2631_s4 + $0x20] sm:$0xff]  }
 0x3c8   : > { %v1160_v58 = vpack.c.bf16 %v1152_v56, %v1152_v56 }
 0x3c9   : > { %v2188_v57 = vpop.eup %2187 }
 0x3ca   : > { %v1151_v59 = vmul.f32 %v2188_v57, %v2503_v20  ;;  %2056 = vmatmul.mubr.msk.bf16.vlgmr.msra.gmra.mrb[24].mxu0 %vm1162_vm4, %v1160_v58  ;;  %v2153_v58 = vld [vmem:[%s2631_s4 + $0x10] sm:$0xff]  }
 0x3cb   : > { %2081 = vmatprep.mubr.msk.bf16.mxu0 %vm2221_vm0, %v2219_v2  ;;  %2066 = vmatpush3.bf16.msra.mxu0 %v2151_v52 }
 0x3cc   : > { %v1159_v61 = vpack.c.bf16 %v1151_v59, %v1151_v59  ;;  %2067 = vmatprep.subr.bf16.mxu0 %v2219_v2  ;;  %v2154_v59 = vld [vmem:[%s2631_s4 + $0x18] sm:$0xff]  }
 0x3cd   : > { %v2190_v62 = vpop.eup %2189 }
 0x3ce   : > { %2050 = vmatmul.mubr.msk.bf16.vlgmr.msra.gmra.mrb[36].mxu1 %vm1162_vm4, %v1159_v61  ;;  %v1153_v0 = vmul.f32 %v2190_v62, %v2511_v26  ;;  %v2156_v61 = vld [vmem:[%s2631_s4 + $0x28] sm:$0xff]   ;;  %v2157_v62 = vld [vmem:[%s2631_s4 + $0x30] sm:$0xff]  }
 0x3cf   : > { %2060 = vmatpush3.bf16.msra.mxu1 %v1490_v63  ;;  %2061 = vmatprep.mubr.msk.bf16.mxu1 %vm2221_vm0, %v2219_v2  ;;  %v2158_v63 = vld [vmem:[%s2631_s4 + $0x38] sm:$0xff]  }
 0x3d0   : > { %v1161_v1 = vpack.c.bf16 %v1153_v0, %v1153_v0  ;;  %2068 = vmatpush3.bf16.msra.mxu0 %v2152_v53 }
 0x3d1   : > { %2069 = vmatprep.subr.bf16.mxu0 %v2219_v2 }
 0x3d4   : > { %2070 = vmatpush3.bf16.msra.mxu0 %v2153_v58 }
 0x3d5   : > { %2071 = vmatprep.subr.bf16.mxu0 %v2219_v2 }
 0x3d6   : > { %2062 = vmatmul.mubr.msk.bf16.vlgmr.msra.gmra.mrb[40].mxu1 %vm1162_vm4, %v1161_v1 }
 0x3d8   : > { %2072 = vmatpush3.bf16.msra.mxu0 %v2154_v59 }
 0x3d9   : > { %2073 = vmatprep.subr.bf16.mxu0 %v2219_v2 }
 0x3dc   : > { %2074 = vmatpush3.bf16.msra.mxu0 %v2155_v60 }
 0x3dd   : > { %2075 = vmatprep.subr.bf16.mxu0 %v2219_v2 }
 0x3e0   : > { %2076 = vmatpush3.bf16.msra.mxu0 %v2156_v61 }
 0x3e1   : > { %2077 = vmatprep.subr.bf16.mxu0 %v2219_v2 }
 0x3e4   : > { %2078 = vmatpush3.bf16.msra.mxu0 %v2157_v62 }
 0x3e5   : > { %2079 = vmatprep.subr.bf16.mxu0 %v2219_v2  ;;  %v1886_v2 = vld [vmem:[%s2632_s5] ss:$0 sm:$0xff] }
 0x3e8   : > { %2080 = vmatpush3.bf16.msra.mxu0 %v2158_v63 }
 0x403   : > { %v1204_v3 = vpop.f32.mrb[12].mxu0 }
 0x404   : > { %v2021_v4 = vpop.f32.mrb[13].mxu0 }
 0x405   : > { %v1207_v5 = vpop.f32.mrb[14].mxu0 }
 0x406   : > { %v2022_v6 = vpop.f32.mrb[15].mxu0  ;;  %v1884_v5 = vld [vmem:[%s2633_s6] ss:$0 sm:$0xff] }
 0x45c   : > { %v1250_v7 = vpop.f32.mrb[28].mxu1 }
 0x45d   : > { %v2027_v8 = vpop.f32.mrb[29].mxu1  ;;  %1533 = vrot.lane.b32.xlu1 %v1250_v7, %s2228_s30  ;;  %v1885_v7 = vld [vmem:[%s2634_s7] ss:$0 sm:$0xff] }
 0x45e   : > { %v1253_v9 = vpop.f32.mrb[30].mxu1 }
 0x45f   : > { %v2028_v10 = vpop.f32.mrb[31].mxu1 }
 0x468   : > { %v1296_v11 = vpop.f32.mrb[16].mxu0 }
 0x469   : > { %1537 = vrot.lane.b32.xlu0 %v1296_v11, %s2227_s28  ;;  %v2033_v12 = vpop.f32.mrb[17].mxu0 }
 0x46a   : > { %v1299_v13 = vpop.f32.mrb[18].mxu0 }
 0x46b   : > { %v2034_v14 = vpop.f32.mrb[19].mxu0 }
 0x46c   : > { %v1342_v15 = vpop.f32.mrb[32].mxu1 }
 0x46d   : > { %1541 = vrot.lane.b32.xlu1 %v1342_v15, %s2226_s27  ;;  %v2039_v16 = vpop.f32.mrb[33].mxu1 }
 0x46e   : > { %v1345_v17 = vpop.f32.mrb[34].mxu1 }
 0x46f   : > { %v2040_v18 = vpop.f32.mrb[35].mxu1 }
 0x470   : > { %v1388_v19 = vpop.f32.mrb[20].mxu0 }
 0x471   : > { %1545 = vrot.lane.b32.xlu0 %v1388_v19, %s2224_s25  ;;  %v2045_v20 = vpop.f32.mrb[21].mxu0 }
 0x472   : > { %v1391_v21 = vpop.f32.mrb[22].mxu0 }
 0x473   : > { %v2046_v22 = vpop.f32.mrb[23].mxu0 }
 0x49d   : > { %v1480_v23 = vpop.f32.mrb[24].mxu0 }
 0x49e   : > { %1553 = vrot.lane.b32.xlu0 %v1480_v23, %s2222_s23  ;;  %v2057_v24 = vpop.f32.mrb[25].mxu0 }
 0x49f   : > { %v1483_v25 = vpop.f32.mrb[26].mxu0 }
 0x4a0   : > { %v2058_v26 = vpop.f32.mrb[27].mxu0 }
 0x4a1   : > { %v1434_v27 = vpop.f32.mrb[36].mxu1 }
 0x4a2   : > { %1549 = vrot.lane.b32.xlu1 %v1434_v27, %s2225_s26  ;;  %v2051_v28 = vpop.f32.mrb[37].mxu1  ;;  %s402_s26 = scalar_lea.vmem %s2637_s10, %s2381_s29 }
 0x4a3   : > { %v1437_v29 = vpop.f32.mrb[38].mxu1  ;;  %v1895_v28 = vld [vmem:[%s2635_s8] ss:$0 sm:$0xff] }
 0x4a4   : > { %v2052_v30 = vpop.f32.mrb[39].mxu1 }
 0x4a5   : > { %v1896_v30 = vld [vmem:[%s2636_s9] ss:$0 sm:$0xff] }
 0x4a9   : > { %v1526_v32 = vpop.f32.mrb[40].mxu1 }
 0x4aa   : > { %1557 = vrot.lane.b32.xlu1 %v1526_v32, %s2223_s24  ;;  %v2063_v33 = vpop.f32.mrb[41].mxu1 }
 0x4ab   : > { %v1529_v34 = vpop.f32.mrb[42].mxu1 }
 0x4ac   : > { %v2064_v35 = vpop.f32.mrb[43].mxu1 }
 0x4cf   : > { %v1534_v36 = vpop.permute.xlu1 %1533 }
 0x4d0   : > { %v1560_v38 = vsel %vm696_vm1, %v1204_v3, %v1534_v36 }
 0x4db   : > { %v1538_v40 = vpop.permute.xlu0 %1537 }
 0x4dc   : > { %v1562_v41 = vsel %vm1561_vm5, %v1560_v38, %v1538_v40 }
 0x4df   : > { %v1542_v37 = vpop.permute.xlu1 %1541 }
 0x4e0   : > { %v1564_v43 = vsel %vm1563_vm6, %v1562_v41, %v1542_v37 }
 0x4e3   : > { %v1546_v39 = vpop.permute.xlu0 %1545 }
 0x4e4   : > { %v1566_v44 = vsel %vm1565_vm7, %v1564_v43, %v1546_v39 }
 0x510   : > { %v1554_v46 = vpop.permute.xlu0 %1553 }
 0x514   : > { %v1550_v42 = vpop.permute.xlu1 %1549 }
 0x515   : > { %v1568_v45 = vsel %vm1567_vm8, %v1566_v44, %v1550_v42 }
 0x516   : > { %v1570_v48 = vsel %vm1569_vm9, %v1568_v45, %v1554_v46 }
 0x51c   : > { %v1558_v47 = vpop.permute.xlu1 %1557 }
 0x51d   : > { %v1572_v49 = vsel %vm1571_vm10, %v1570_v48, %v1558_v47 }
 0x51e   : > { %v1573_v50 = vadd.f32 %v1572_v49, %v2404_v31 }
 0x520   : > { %v1577_v51 = vsel %vm1576_vm11, %v1573_v50, 0.0 }
 0x521   : > { %1578 = vadd.xlane.f32.xlu0 %v1577_v51 }
 0x5ae   : > { %v1579_v54 = vpop.xlane.xlu0 %1578 }
 0x5af   : > { %v1581_v55 = vmul.f32 0.0078125, %v1579_v54 }
 0x5b1   : > { %v1582_v31 = vsub.f32 %v1573_v50, %v1581_v55 }
 0x5b3   : > { %v1583_v56 = vmul.f32 %v1582_v31, %v1582_v31 }
 0x5b5   : > { %v1584_v57 = vsel %vm1576_vm11, %v1583_v56, 0.0 }
 0x5b6   : > { %1585 = vadd.xlane.f32.xlu1 %v1584_v57 }
 0x643   : > { %v1586_v0 = vpop.xlane.xlu1 %1585 }
 0x644   : > { %v1587_v1 = vmul.f32 0.0078125, %v1586_v0 }
 0x646   : > { %v1588_v3 = vadd.f32 1e-05, %v1587_v1 }
 0x648   : > { %2191 = vrsqrt.f32 %v1588_v3 }
 0x652   : > { %v2192_v4 = vpop.eup %2191 }
 0x653   : > { %v1590_v6 = vmul.f32 %v2192_v4, %v1582_v31 }
 0x655   : > { %v1597_v8 = vmul.f32 %v1884_v5, %v1590_v6 }
 0x657   : > { %v1604_v9 = vadd.f32 %v1885_v7, %v1597_v8 }
 0x659   : > { %v1605_v10 = vpack.c.bf16 %v1604_v9, %v1604_v9 }
 0x65b   : > { %2082 = vmatmul.mubr.bf16.vlgmr.msra.gmra.mrb[28].mxu0 %v1605_v10 }
 0x72e   : > { %v1711_v11 = vpop.f32.mrb[28].mxu0 }
 0x72f   : > { %v1712_v12 = vadd.f32 %v1886_v2, %v1711_v11  ;;  %v2083_v13 = vpop.f32.mrb[29].mxu0 }
 0x730   : > { %v1714_v14 = vpop.f32.mrb[30].mxu0 }
 0x731   : > { %v1717_v15 = vmax.f32 %v1712_v12, 0.0  ;;  %v2084_v16 = vpop.f32.mrb[31].mxu0 }
 0x733   : > { %v1718_v17 = vadd.f32 %v1717_v15, %v1604_v9 }
 0x735   : > { %v1721_v18 = vsel %vm1576_vm11, %v1718_v17, 0.0 }
 0x736   : > { %1722 = vadd.xlane.f32.xlu0 %v1721_v18 }
 0x7c3   : > { %v1723_v19 = vpop.xlane.xlu0 %1722 }
 0x7c4   : > { %v1724_v20 = vmul.f32 0.0078125, %v1723_v19 }
 0x7c6   : > { %v1725_v21 = vsub.f32 %v1718_v17, %v1724_v20 }
 0x7c8   : > { %v1726_v22 = vmul.f32 %v1725_v21, %v1725_v21 }
 0x7ca   : > { %v1727_v23 = vsel %vm1576_vm11, %v1726_v22, 0.0 }
 0x7cb   : > { %1728 = vadd.xlane.f32.xlu0 %v1727_v23 }
 0x858   : > { %v1729_v24 = vpop.xlane.xlu0 %1728 }
 0x859   : > { %v1730_v25 = vmul.f32 0.0078125, %v1729_v24 }
 0x85b   : > { %v1731_v26 = vadd.f32 1e-05, %v1730_v25 }
 0x85d   : > { %2193 = vrsqrt.f32 %v1731_v26 }
 0x867   : > { %v2194_v27 = vpop.eup %2193 }
 0x868   : > { %v1733_v29 = vmul.f32 %v2194_v27, %v1725_v21 }
 0x86a   : > { %v1740_v32 = vmul.f32 %v1895_v28, %v1733_v29 }
 0x86c   : > { %v1747_v33 = vadd.f32 %v1896_v30, %v1740_v32 }
 0x86e   : > { %v1748_v34 = vpack.c.bf16 %v1747_v33, %v1747_v33 }
 0x870   : > { %1749 = vst [vmem:[%s402_s26] sm:$0x3] %v1748_v34 }
 0x871 PF: > { %s20_s15 = sadd.s32 1, %s2217_s15   ;;  %s2638_s13 = smov %s2213_s14 }
 0x872   : > { %p17_p5 = scmp.ge.s32.totalorder %s20_s15, 4   ;;  %s2639_s14 = smov %s2641_s16 }
 0x874   :  { %19 = sbr.rel (!%p17_p5) target bundleno = 2 (0x2), region = 93 }

// kernel: _lambda_.14
= control target key start
LH: loop header
LB: loop body
LE: loop exit
PB: predicated region body
PF: predicated region fallthrough
CT: control target
= control target key end

     0   :  { %v347_v0 = vmov 0.0   ;;  %vm348_vm0 = vmmov 0   ;;  %s439_s1 = inlined_call_operand.vmem [shape: bf16[128,128], index: 1, kind: input, shape index: {}]   ;;  %s440_s3 = inlined_call_operand.vmem [shape: bf16[128,128], index: 3, kind: input, shape index: {}]   ;;  %s441_s0 = inlined_call_operand.vmem [shape: f32[2,128], index: 0, kind: input, shape index: {}]   ;;  %s442_s2 = inlined_call_operand.vmem [shape: f32[1,128], index: 2, kind: input, shape index: {}]   ;;  %s443_s4 = inlined_call_operand.vmem [shape: f32[1,128], index: 4, kind: input, shape index: {}]   ;;  %s444_s5 = inlined_call_operand.vmem [shape: bf16[2,128], index: 5, kind: output, shape index: {}]  }
   0x1   :  { %289 = vmatprep.subr.bf16.mxu0 %v347_v0  ;;  %v331_v1 = vld [vmem:[%s439_s1] sm:$0xff]   ;;  %305 = vmatprep.mubr.msk.bf16.mxu0 %vm348_vm0, %v347_v0  ;;  %v332_v2 = vld [vmem:[%s439_s1 + $0x8] sm:$0xff]   ;;  %v333_v3 = vld [vmem:[%s439_s1 + $0x10] sm:$0xff]  }
   0x2   :  { %309 = vmatprep.subr.bf16.mxu1 %v347_v0  ;;  %325 = vmatprep.mubr.msk.bf16.mxu1 %vm348_vm0, %v347_v0  ;;  %v339_v4 = vld [vmem:[%s440_s3] sm:$0xff]   ;;  %v334_v5 = vld [vmem:[%s439_s1 + $0x18] sm:$0xff]   ;;  %v340_v6 = vld [vmem:[%s440_s3 + $0x8] sm:$0xff]  }
   0x3   :  { %290 = vmatpush3.bf16.msra.mxu0 %v331_v1  ;;  %310 = vmatpush3.bf16.msra.mxu1 %v339_v4  ;;  %v335_v7 = vld [vmem:[%s439_s1 + $0x20] sm:$0xff]   ;;  %v341_v8 = vld [vmem:[%s440_s3 + $0x10] sm:$0xff]   ;;  %v336_v9 = vld [vmem:[%s439_s1 + $0x28] sm:$0xff]  }
   0x4   :  { %291 = vmatprep.subr.bf16.mxu0 %v347_v0  ;;  %311 = vmatprep.subr.bf16.mxu1 %v347_v0  ;;  %v342_v10 = vld [vmem:[%s440_s3 + $0x18] sm:$0xff]   ;;  %v337_v11 = vld [vmem:[%s439_s1 + $0x30] sm:$0xff]   ;;  %v343_v12 = vld [vmem:[%s440_s3 + $0x20] sm:$0xff]  }
   0x5   :  { %v338_v13 = vld [vmem:[%s439_s1 + $0x38] sm:$0xff]   ;;  %v21_v14 = vld [vmem:[%s441_s0] sm:$0x3]  ;;  %v344_v15 = vld [vmem:[%s440_s3 + $0x28] sm:$0xff]  }
   0x6   :  { %v22_v16 = vpack.c.bf16 %v21_v14, %v21_v14  ;;  %v345_v17 = vld [vmem:[%s440_s3 + $0x30] sm:$0xff]   ;;  %v346_v18 = vld [vmem:[%s440_s3 + $0x38] sm:$0xff]   ;;  %v253_v19 = vld [vmem:[%s442_s2] ss:$0 sm:$0xff] }
   0x7   :  { %292 = vmatpush3.bf16.msra.mxu0 %v332_v2  ;;  %312 = vmatpush3.bf16.msra.mxu1 %v340_v6  ;;  %v262_v27 = vld [vmem:[%s443_s4] ss:$0 sm:$0xff] }
   0x8   :  { %293 = vmatprep.subr.bf16.mxu0 %v347_v0  ;;  %313 = vmatprep.subr.bf16.mxu1 %v347_v0 }
   0xb   :  { %294 = vmatpush3.bf16.msra.mxu0 %v333_v3  ;;  %314 = vmatpush3.bf16.msra.mxu1 %v341_v8 }
   0xc   :  { %295 = vmatprep.subr.bf16.mxu0 %v347_v0  ;;  %315 = vmatprep.subr.bf16.mxu1 %v347_v0 }
   0xf   :  { %296 = vmatpush3.bf16.msra.mxu0 %v334_v5  ;;  %316 = vmatpush3.bf16.msra.mxu1 %v342_v10 }
  0x10   :  { %297 = vmatprep.subr.bf16.mxu0 %v347_v0  ;;  %317 = vmatprep.subr.bf16.mxu1 %v347_v0 }
  0x13   :  { %298 = vmatpush3.bf16.msra.mxu0 %v335_v7  ;;  %318 = vmatpush3.bf16.msra.mxu1 %v343_v12 }
  0x14   :  { %299 = vmatprep.subr.bf16.mxu0 %v347_v0  ;;  %319 = vmatprep.subr.bf16.mxu1 %v347_v0 }
  0x17   :  { %300 = vmatpush3.bf16.msra.mxu0 %v336_v9  ;;  %320 = vmatpush3.bf16.msra.mxu1 %v344_v15 }
  0x18   :  { %301 = vmatprep.subr.bf16.mxu0 %v347_v0  ;;  %321 = vmatprep.subr.bf16.mxu1 %v347_v0 }
  0x1b   :  { %302 = vmatpush3.bf16.msra.mxu0 %v337_v11  ;;  %322 = vmatpush3.bf16.msra.mxu1 %v345_v17 }
  0x1c   :  { %303 = vmatprep.subr.bf16.mxu0 %v347_v0  ;;  %323 = vmatprep.subr.bf16.mxu1 %v347_v0 }
  0x1f   :  { %304 = vmatpush3.bf16.msra.mxu0 %v338_v13  ;;  %324 = vmatpush3.bf16.msra.mxu1 %v346_v18 }
  0x22   :  { %306 = vmatmul.mubr.bf16.vlgmr.msra.gmra.mrb[0].mxu0 %v22_v16 }
  0xf5   :  { %v128_v20 = vpop.f32.mrb[0].mxu0 }
  0xf6   :  { %v129_v21 = vadd.f32 %v253_v19, %v128_v20  ;;  %v307_v22 = vpop.f32.mrb[1].mxu0 }
  0xf7   :  { %v131_v23 = vpop.f32.mrb[2].mxu0 }
  0xf8   :  { %v134_v24 = vmax.f32 %v129_v21, 0.0  ;;  %v308_v25 = vpop.f32.mrb[3].mxu0 }
  0xfa   :  { %v135_v26 = vpack.c.bf16 %v134_v24, %v134_v24 }
  0xfc   :  { %326 = vmatmul.mubr.bf16.vlgmr.msra.gmra.mrb[0].mxu1 %v135_v26 }
 0x1cf   :  { %v241_v28 = vpop.f32.mrb[0].mxu1 }
 0x1d0   :  { %v242_v29 = vadd.f32 %v262_v27, %v241_v28  ;;  %v327_v30 = vpop.f32.mrb[1].mxu1 }
 0x1d1   :  { %v244_v31 = vpop.f32.mrb[2].mxu1 }
 0x1d2   :  { %v247_v32 = vpack.c.bf16 %v242_v29, %v242_v29  ;;  %v328_v33 = vpop.f32.mrb[3].mxu1 }
 0x1d4   :  { %248 = vst [vmem:[%s444_s5] sm:$0x1] %v247_v32 }

// kernel: _lambda_.11
= control target key start
LH: loop header
LB: loop body
LE: loop exit
PB: predicated region body
PF: predicated region fallthrough
CT: control target
= control target key end

     0   :  { %s2492_s21 = smov 0   ;;  %s2494_s22 = smov 0   ;;  %s2877_s0 = inlined_call_operand.vmem [shape: bf16[2,8,128], index: 0, kind: input, shape index: {}]   ;;  %s2878_s1 = inlined_call_operand.vmem [shape: bf16[2,4,128], index: 1, kind: input, shape index: {}]   ;;  %s2879_s2 = inlined_call_operand.vmem [shape: bf16[2,4,128], index: 2, kind: input, shape index: {}]   ;;  %s2880_s3 = inlined_call_operand.vmem [shape: bf16[128,128], index: 3, kind: input, shape index: {}]   ;;  %s2881_s4 = inlined_call_operand.vmem [shape: bf16[128,128], index: 4, kind: input, shape index: {}]   ;;  %s2882_s5 = inlined_call_operand.vmem [shape: bf16[128,128], index: 5, kind: input, shape index: {}]   ;;  %s2883_s6 = inlined_call_operand.vmem [shape: bf16[128,128], index: 6, kind: input, shape index: {}]   ;;  %s2884_s7 = inlined_call_operand.vmem [shape: f32[1,128], index: 7, kind: input, shape index: {}]   ;;  %s2885_s8 = inlined_call_operand.vmem [shape: f32[1,128], index: 8, kind: input, shape index: {}]   ;;  %s2886_s9 = inlined_call_operand.vmem [shape: f32[1,128], index: 9, kind: input, shape index: {}]   ;;  %s2887_s10 = inlined_call_operand.vmem [shape: f32[1,128], index: 10, kind: input, shape index: {}]   ;;  %s2888_s11 = inlined_call_operand.vmem [shape: f32[1,128], index: 11, kind: input, shape index: {}]   ;;  %s2889_s12 = inlined_call_operand.vmem [shape: bf16[2,8,128], index: 12, kind: output, shape index: {}]  }
   0x1   :  { %s2496_s23 = smov 0  }
   0x2 LB: > { %s34_s24 = sadd.s32 1, %s2412_s22  ;;  %p1989_p0 = scmp.ge.s32.totalorder %s2416_s23, 1  ;;  %s2416_s23 = sphi %s2496_s23, %s22_s23   ;;  %s2412_s22 = sphi %s2494_s22, %s2899_s22   ;;  %s2408_s21 = sphi %s2492_s21, %s2898_s21  }
   0x3   : > { %p36_p1 = scmp.ge.s32.totalorder %s34_s24, 2  ;;  %p398_p2 = scmp.lt.s32.totalorder %s2416_s23, 3 }
   0x5   : > { %s2901_s24 = smov (%p36_p1, %s34_s24), 0  ;;  %p399_p3 = pnand %p1989_p0, %p398_p2 }
   0x6   : > { %v2326_v0 = vld [vmem:[%s2881_s4] sm:$0xff] (!%p399_p3)   ;;  %v2418_v1 = vmov (!%p399_p3), 0.0   ;;  %v2328_v3 = vld [vmem:[%s2881_s4 + $0x8] sm:$0xff] (!%p399_p3)   ;;  %vm2419_vm0 = vmmov (!%p399_p3), 0   ;;  %v2330_v5 = vld [vmem:[%s2881_s4 + $0x10] sm:$0xff] (!%p399_p3)   ;;  %p452_p4 = scmp.lt.s32.totalorder (!%p399_p3), %s2408_s21, 1 }
   0x7   : > { %402 = sbr.rel (%p399_p3) target bundleno = 2156 (0x86c), region = 68  ;;  %2137 = vmatprep.subr.bf16.mxu1 (!%p399_p3), %v2418_v1  ;;  %2117 = vmatprep.subr.bf16.mxu0 (!%p399_p3), %v2418_v1  ;;  %v2327_v2 = vld [vmem:[%s2880_s3] sm:$0xff] (!%p399_p3)   ;;  %v2329_v4 = vld [vmem:[%s2880_s3 + $0x8] sm:$0xff] (!%p399_p3)   ;;  %v2331_v6 = vld [vmem:[%s2880_s3 + $0x10] sm:$0xff] (!%p399_p3)   ;;  %vm839_vm1 = vcmask (!%p399_p3), 130048   ;;  %s2420_s25 = smov (!%p399_p3), 96  }
   0x8   : > { %2138 = vmatpush3.bf16.msra.mxu1 (!%p399_p3), %v2326_v0  ;;  %2153 = vmatprep.mubr.msk.bf16.mxu1 (!%p399_p3), %vm2419_vm0, %v2418_v1  ;;  %v2332_v7 = vld [vmem:[%s2881_s4 + $0x18] sm:$0xff] (!%p399_p3)   ;;  %v2334_v9 = vld [vmem:[%s2881_s4 + $0x20] sm:$0xff] (!%p399_p3)   ;;  %v2336_v11 = vld [vmem:[%s2881_s4 + $0x28] sm:$0xff] (!%p399_p3)   ;;  %s2421_s26 = smov (!%p399_p3), 112   ;;  %s2422_s27 = smov (!%p399_p3), 80   ;;  %vm1208_vm2 = vcmask (!%p399_p3), 31744  }
   0x9   : > { %2118 = vmatpush3.bf16.msra.mxu0 (!%p399_p3), %v2327_v2  ;;  %2139 = vmatprep.subr.bf16.mxu1 (!%p399_p3), %v2418_v1  ;;  %v2333_v8 = vld [vmem:[%s2880_s3 + $0x18] sm:$0xff] (!%p399_p3)   ;;  %v2335_v10 = vld [vmem:[%s2880_s3 + $0x20] sm:$0xff] (!%p399_p3)   ;;  %v2337_v12 = vld [vmem:[%s2880_s3 + $0x28] sm:$0xff] (!%p399_p3)   ;;  %s2423_s28 = smov (!%p399_p3), 64   ;;  %s2424_s29 = smov (!%p399_p3), 48   ;;  %vm1308_vm3 = vcmask (!%p399_p3), 1041408  }
   0xa   : > { %2119 = vmatprep.subr.bf16.mxu0 (!%p399_p3), %v2418_v1  ;;  %2133 = vmatprep.mubr.msk.bf16.mxu0 (!%p399_p3), %vm2419_vm0, %v2418_v1  ;;  %v2338_v13 = vld [vmem:[%s2881_s4 + $0x30] sm:$0xff] (!%p399_p3)   ;;  %v2340_v15 = vld [vmem:[%s2881_s4 + $0x38] sm:$0xff] (!%p399_p3)   ;;  %v2342_v31 = vld [vmem:[%s2882_s5] sm:$0xff] (!%p399_p3)   ;;  %s2893_s14 = smov (!%p399_p3), 32   ;;  %s2891_s19 = smov (!%p399_p3), 16   ;;  %vm1703_vm4 = vcmask (!%p399_p3), 261120  }
   0xb   : > { %v2339_v14 = vld [vmem:[%s2880_s3 + $0x30] sm:$0xff] (!%p399_p3)   ;;  %v2341_v16 = vld [vmem:[%s2880_s3 + $0x38] sm:$0xff] (!%p399_p3)   ;;  %v2343_v32 = vld [vmem:[%s2882_s5 + $0x8] sm:$0xff] (!%p399_p3)   ;;  %s2896_s18 = smov (!%p399_p3), 16   ;;  %vm1705_vm5 = vcmask (!%p399_p3), 392192   ;;  %vm1707_vm6 = vcmask (!%p399_p3), 523264  }
   0xc   : > { %2140 = vmatpush3.bf16.msra.mxu1 (!%p399_p3), %v2328_v3  ;;  %v2344_v33 = vld [vmem:[%s2882_s5 + $0x10] sm:$0xff] (!%p399_p3)   ;;  %v2345_v34 = vld [vmem:[%s2882_s5 + $0x18] sm:$0xff] (!%p399_p3)   ;;  %v2346_v35 = vld [vmem:[%s2882_s5 + $0x20] sm:$0xff] (!%p399_p3)   ;;  %vm1709_vm7 = vcmask (!%p399_p3), 654336   ;;  %vm1711_vm8 = vcmask (!%p399_p3), 785408   ;;  %vm1713_vm9 = vcmask (!%p399_p3), 916480  }
   0xd   : > { %2120 = vmatpush3.bf16.msra.mxu0 (!%p399_p3), %v2329_v4  ;;  %2141 = vmatprep.subr.bf16.mxu1 (!%p399_p3), %v2418_v1  ;;  %v2347_v36 = vld [vmem:[%s2882_s5 + $0x28] sm:$0xff] (!%p399_p3)   ;;  %v2348_v37 = vld [vmem:[%s2882_s5 + $0x30] sm:$0xff] (!%p399_p3)   ;;  %v2349_v38 = vld [vmem:[%s2882_s5 + $0x38] sm:$0xff] (!%p399_p3)  }
   0xe   : > { %2121 = vmatprep.subr.bf16.mxu0 %v2418_v1  ;;  %s2903_s21 = smov (!%p452_p4, %s2408_s21), 1 }
   0xf   : > { %s1991_s15 = sshll.u32 %s2903_s21, 1  ;;  %s2890_s16 = sshll.u32 %s2903_s21, 2 }
  0x10   : > { %2142 = vmatpush3.bf16.msra.mxu1 %v2330_v5  ;;  %s462_s17 = scalar_lea.vmem %s2878_s1, %s1991_s15  ;;  %s458_s20 = scalar_lea.vmem %s2877_s0, %s2890_s16 }
  0x11   : > { %2122 = vmatpush3.bf16.msra.mxu0 %v2331_v6  ;;  %2143 = vmatprep.subr.bf16.mxu1 %v2418_v1  ;;  %v580_v17 = vld [vmem:[%s462_s17] sm:$0x3] }
  0x12   : > { %2123 = vmatprep.subr.bf16.mxu0 %v2418_v1  ;;  %v475_v18 = vld [vmem:[%s458_s20] sm:$0xf] }
  0x14   : > { %2144 = vmatpush3.bf16.msra.mxu1 %v2332_v7 }
  0x15   : > { %2124 = vmatpush3.bf16.msra.mxu0 %v2333_v8  ;;  %2145 = vmatprep.subr.bf16.mxu1 %v2418_v1 }
  0x16   : > { %2125 = vmatprep.subr.bf16.mxu0 %v2418_v1 }
  0x18   : > { %2146 = vmatpush3.bf16.msra.mxu1 %v2334_v9 }
  0x19   : > { %2126 = vmatpush3.bf16.msra.mxu0 %v2335_v10  ;;  %2147 = vmatprep.subr.bf16.mxu1 %v2418_v1 }
  0x1a   : > { %2127 = vmatprep.subr.bf16.mxu0 %v2418_v1 }
  0x1c   : > { %2148 = vmatpush3.bf16.msra.mxu1 %v2336_v11 }
  0x1d   : > { %2128 = vmatpush3.bf16.msra.mxu0 %v2337_v12  ;;  %2149 = vmatprep.subr.bf16.mxu1 %v2418_v1 }
  0x1e   : > { %2129 = vmatprep.subr.bf16.mxu0 %v2418_v1 }
  0x20   : > { %2150 = vmatpush3.bf16.msra.mxu1 %v2338_v13 }
  0x21   : > { %2130 = vmatpush3.bf16.msra.mxu0 %v2339_v14  ;;  %2151 = vmatprep.subr.bf16.mxu1 %v2418_v1 }
  0x22   : > { %2131 = vmatprep.subr.bf16.mxu0 %v2418_v1 }
  0x24   : > { %2152 = vmatpush3.bf16.msra.mxu1 %v2340_v15 }
  0x25   : > { %2132 = vmatpush3.bf16.msra.mxu0 %v2341_v16  ;;  %2177 = vmatprep.subr.bf16.mxu1 %v2418_v1 }
  0x26   : > { %2157 = vmatprep.subr.bf16.mxu0 %v2418_v1 }
  0x27   : > { %2154 = vmatmul.mubr.bf16.vlgmr.msra.gmra.mrb[0].mxu1 %v580_v17 }
  0x28   : > { %2134 = vmatmul.mubr.bf16.vlgmr.msra.gmra.mrb[0].mxu0 %v475_v18  ;;  %2179 = vmatprep.mubr.msk.bf16.mxu1 %vm2419_vm0, %v2418_v1 }
  0x29   : > { %2173 = vmatprep.mubr.msk.bf16.mxu0 %vm2419_vm0, %v2418_v1  ;;  %2158 = vmatpush3.bf16.msra.mxu0 %v2342_v31 }
  0x2a   : > { %2159 = vmatprep.subr.bf16.mxu0 %v2418_v1 }
  0x2d   : > { %2160 = vmatpush3.bf16.msra.mxu0 %v2343_v32 }
  0x2e   : > { %2161 = vmatprep.subr.bf16.mxu0 %v2418_v1 }
  0x31   : > { %2162 = vmatpush3.bf16.msra.mxu0 %v2344_v33 }
  0x32   : > { %2163 = vmatprep.subr.bf16.mxu0 %v2418_v1 }
  0x35   : > { %2164 = vmatpush3.bf16.msra.mxu0 %v2345_v34 }
  0x36   : > { %2165 = vmatprep.subr.bf16.mxu0 %v2418_v1 }
  0x39   : > { %2166 = vmatpush3.bf16.msra.mxu0 %v2346_v35 }
  0x3a   : > { %2167 = vmatprep.subr.bf16.mxu0 %v2418_v1 }
  0x3d   : > { %2168 = vmatpush3.bf16.msra.mxu0 %v2347_v36 }
  0x3e   : > { %2169 = vmatprep.subr.bf16.mxu0 %v2418_v1 }
  0x41   : > { %2170 = vmatpush3.bf16.msra.mxu0 %v2348_v37 }
  0x42   : > { %2171 = vmatprep.subr.bf16.mxu0 %v2418_v1 }
  0x45   : > { %2172 = vmatpush3.bf16.msra.mxu0 %v2349_v38 }
  0x46   : > { %2225 = vmatprep.subr.bf16.mxu0 %v2418_v1 }
  0xfa   : > { %v679_v19 = vpop.f32.mrb[0].mxu1 }
  0xfb   : > { %v792_v20 = vpack.c.bf16 %v679_v19, %v679_v19  ;;  %v2155_v21 = vpop.f32.mrb[1].mxu1  ;;  %v2602_v22 = vpop.f32.mrb[0].mxu0 }
  0xfc   : > { %v790_v23 = vmul.f32 0.088388346, %v2602_v22  ;;  %v682_v24 = vpop.f32.mrb[2].mxu1  ;;  %v2135_v25 = vpop.f32.mrb[1].mxu0 }
  0xfd   : > { %812 = vrot.lane.b32.xlu1 %v792_v20, %s2420_s25  ;;  %810 = vrot.lane.b32.xlu0 %v792_v20, %s2421_s26  ;;  %v2156_v26 = vpop.f32.mrb[3].mxu1  ;;  %v844_v27 = vsel %vm839_vm1, %v792_v20, 0  ;;  %v577_v28 = vpop.f32.mrb[2].mxu0 }
  0xfe   : > { %v791_v29 = vpack.c.bf16 %v790_v23, %v790_v23  ;;  %2178 = vmatpush3.bf16.xpose.msra.mxu1 %v844_v27  ;;  %v2136_v30 = vpop.f32.mrb[3].mxu0 }
  0xff   : > { %2183 = vmatprep.subr.bf16.mxu1 %v2418_v1 }
 0x101   : > { %797 = vrot.lane.b32.xlu1 %v791_v29, %s2420_s25  ;;  %795 = vrot.lane.b32.xlu0 %v791_v29, %s2421_s26 }
 0x105   : > { %799 = vrot.lane.b32.xlu1 %v791_v29, %s2422_s27  ;;  %814 = vrot.lane.b32.xlu0 %v792_v20, %s2422_s27 }
 0x106   : > { %2180 = vmatmul.mubr.msk.bf16.vlgmr.msra.gmra.mrb[4].mxu1 %vm839_vm1, %v791_v29 }
 0x107   : > { %2185 = vmatprep.mubr.msk.bf16.mxu1 %vm2419_vm0, %v2418_v1 }
 0x109   : > { %801 = vrot.lane.b32.xlu1 %v791_v29, %s2423_s28  ;;  %816 = vrot.lane.b32.xlu0 %v792_v20, %s2423_s28 }
 0x10d   : > { %803 = vrot.lane.b32.xlu1 %v791_v29, %s2424_s29  ;;  %818 = vrot.lane.b32.xlu0 %v792_v20, %s2424_s29 }
 0x111   : > { %805 = vrot.lane.b32.xlu1 %v791_v29, %s2893_s14  ;;  %820 = vrot.lane.b32.xlu0 %v792_v20, %s2893_s14 }
 0x115   : > { %807 = vrot.lane.b32.xlu1 %v791_v29, %s2891_s19  ;;  %822 = vrot.lane.b32.xlu0 %v792_v20, %s2891_s19  ;;  %s466_s19 = scalar_lea.vmem %s2879_s2, %s1991_s15  ;;  %s2895_s15 = smov 32  }
 0x116   : > { %v685_v39 = vld [vmem:[%s466_s19] sm:$0x3] }
 0x117   : > { %2174 = vmatmul.mubr.bf16.vlgmr.msra.gmra.mrb[4].mxu0 %v685_v39 }
 0x118   : > { %2227 = vmatprep.mubr.msk.bf16.mxu0 %vm2419_vm0, %v2418_v1 }
 0x16f   : > { %v811_v40 = vpop.permute.xlu0 %810  ;;  %v813_v42 = vpop.permute.xlu1 %812 }
 0x170   : > { %v890_v41 = vsel %vm839_vm1, %v811_v40, 0  ;;  %v936_v44 = vsel %vm839_vm1, %v813_v42, 0 }
 0x171   : > { %2184 = vmatpush3.bf16.xpose.msra.mxu1 %v890_v41 }
 0x172   : > { %2189 = vmatprep.subr.bf16.mxu1 %v2418_v1 }
 0x173   : > { %v796_v43 = vpop.permute.xlu0 %795  ;;  %v798_v46 = vpop.permute.xlu1 %797 }
 0x177   : > { %v815_v45 = vpop.permute.xlu0 %814  ;;  %v800_v49 = vpop.permute.xlu1 %799 }
 0x178   : > { %2186 = vmatmul.mubr.msk.bf16.vlgmr.msra.gmra.mrb[8].mxu1 %vm839_vm1, %v796_v43  ;;  %v982_v47 = vsel %vm839_vm1, %v815_v45, 0 }
 0x179   : > { %2190 = vmatpush3.bf16.xpose.msra.mxu1 %v936_v44  ;;  %2191 = vmatprep.mubr.msk.bf16.mxu1 %vm2419_vm0, %v2418_v1 }
 0x17a   : > { %2195 = vmatprep.subr.bf16.mxu1 %v2418_v1 }
 0x17b   : > { %v817_v48 = vpop.permute.xlu0 %816  ;;  %v802_v52 = vpop.permute.xlu1 %801 }
 0x17c   : > { %v1028_v50 = vsel %vm839_vm1, %v817_v48, 0 }
 0x17f   : > { %v819_v51 = vpop.permute.xlu0 %818  ;;  %v804_v55 = vpop.permute.xlu1 %803 }
 0x180   : > { %2192 = vmatmul.mubr.msk.bf16.vlgmr.msra.gmra.mrb[12].mxu1 %vm839_vm1, %v798_v46  ;;  %v1074_v53 = vsel %vm839_vm1, %v819_v51, 0 }
 0x181   : > { %2196 = vmatpush3.bf16.xpose.msra.mxu1 %v982_v47  ;;  %2197 = vmatprep.mubr.msk.bf16.mxu1 %vm2419_vm0, %v2418_v1 }
 0x182   : > { %2201 = vmatprep.subr.bf16.mxu1 %v2418_v1 }
 0x183   : > { %v821_v54 = vpop.permute.xlu0 %820  ;;  %v806_v58 = vpop.permute.xlu1 %805 }
 0x184   : > { %v1120_v56 = vsel %vm839_vm1, %v821_v54, 0 }
 0x187   : > { %v823_v57 = vpop.permute.xlu0 %822  ;;  %v808_v60 = vpop.permute.xlu1 %807 }
 0x188   : > { %2198 = vmatmul.mubr.msk.bf16.vlgmr.msra.gmra.mrb[16].mxu1 %vm839_vm1, %v800_v49  ;;  %v1166_v59 = vsel %vm839_vm1, %v823_v57, 0 }
 0x189   : > { %2202 = vmatpush3.bf16.xpose.msra.mxu1 %v1028_v50  ;;  %2203 = vmatprep.mubr.msk.bf16.mxu1 %vm2419_vm0, %v2418_v1 }
 0x18a   : > { %2207 = vmatprep.subr.bf16.mxu1 %v2418_v1 }
 0x190   : > { %2204 = vmatmul.mubr.msk.bf16.vlgmr.msra.gmra.mrb[20].mxu1 %vm839_vm1, %v802_v52 }
 0x191   : > { %2208 = vmatpush3.bf16.xpose.msra.mxu1 %v1074_v53  ;;  %2209 = vmatprep.mubr.msk.bf16.mxu1 %vm2419_vm0, %v2418_v1 }
 0x192   : > { %2213 = vmatprep.subr.bf16.mxu1 %v2418_v1 }
 0x198   : > { %2210 = vmatmul.mubr.msk.bf16.vlgmr.msra.gmra.mrb[24].mxu1 %vm839_vm1, %v804_v55 }
 0x199   : > { %2214 = vmatpush3.bf16.xpose.msra.mxu1 %v1120_v56  ;;  %2215 = vmatprep.mubr.msk.bf16.mxu1 %vm2419_vm0, %v2418_v1 }
 0x19a   : > { %2219 = vmatprep.subr.bf16.mxu1 %v2418_v1 }
 0x1a0   : > { %2216 = vmatmul.mubr.msk.bf16.vlgmr.msra.gmra.mrb[28].mxu1 %vm839_vm1, %v806_v58 }
 0x1a1   : > { %2220 = vmatpush3.bf16.xpose.msra.mxu1 %v1166_v59  ;;  %2221 = vmatprep.mubr.msk.bf16.mxu1 %vm2419_vm0, %v2418_v1 }
 0x1a2   : > { %2231 = vmatprep.subr.bf16.mxu1 %v2418_v1 }
 0x1a8   : > { %2222 = vmatmul.mubr.msk.bf16.vlgmr.msra.gmra.mrb[32].mxu1 %vm839_vm1, %v808_v60 }
 0x1a9   : > { %2233 = vmatprep.mubr.msk.bf16.mxu1 %vm2419_vm0, %v2418_v1 }
 0x1d9   : > { %v880_v61 = vpop.f32.mrb[4].mxu1 }
 0x1da   : > { %v2181_v62 = vpop.f32.mrb[5].mxu1  ;;  %v1209_v63 = vsel %vm1208_vm2, %v880_v61, -inf }
 0x1db   : > { %1210 = vmax.xlane.f32.xlu0 %v1209_v63  ;;  %v883_v0 = vpop.f32.mrb[6].mxu1 }
 0x1dc   : > { %v2182_v2 = vpop.f32.mrb[7].mxu1 }
 0x1ea   : > { %v784_v3 = vpop.f32.mrb[4].mxu0 }
 0x1eb   : > { %v2175_v4 = vpop.f32.mrb[5].mxu0  ;;  %v2699_v7 = vpack.c.bf16 %v784_v3, %v784_v3 }
 0x1ec   : > { %v787_v5 = vpop.f32.mrb[6].mxu0 }
 0x1ed   : > { %v2176_v6 = vpop.f32.mrb[7].mxu0  ;;  %v1310_v8 = vsel %vm1308_vm3, %v2699_v7, 0 }
 0x1ee   : > { %2226 = vmatpush3.bf16.msra.mxu0 %v1310_v8 }
 0x1ef   : > { %2237 = vmatprep.subr.bf16.mxu0 %v2418_v1 }
 0x24b   : > { %v926_v9 = vpop.f32.mrb[8].mxu1 }
 0x24c   : > { %v2187_v10 = vpop.f32.mrb[9].mxu1  ;;  %v1212_v11 = vsel %vm1208_vm2, %v926_v9, -inf }
 0x24d   : > { %1213 = vmax.xlane.f32.xlu1 %v1212_v11  ;;  %v929_v12 = vpop.f32.mrb[10].mxu1 }
 0x24e   : > { %v2188_v13 = vpop.f32.mrb[11].mxu1 }
 0x253   : > { %v972_v14 = vpop.f32.mrb[12].mxu1 }
 0x254   : > { %v2193_v15 = vpop.f32.mrb[13].mxu1  ;;  %v1215_v16 = vsel %vm1208_vm2, %v972_v14, -inf }
 0x255   : > { %1216 = vmax.xlane.f32.xlu0 %v1215_v16  ;;  %v975_v17 = vpop.f32.mrb[14].mxu1 }
 0x256   : > { %v2194_v18 = vpop.f32.mrb[15].mxu1 }
 0x25b   : > { %v1018_v19 = vpop.f32.mrb[16].mxu1 }
 0x25c   : > { %v2199_v20 = vpop.f32.mrb[17].mxu1  ;;  %v1218_v21 = vsel %vm1208_vm2, %v1018_v19, -inf }
 0x25d   : > { %1219 = vmax.xlane.f32.xlu0 %v1218_v21  ;;  %v1021_v23 = vpop.f32.mrb[18].mxu1 }
 0x25e   : > { %v2200_v24 = vpop.f32.mrb[19].mxu1 }
 0x263   : > { %v1064_v25 = vpop.f32.mrb[20].mxu1 }
 0x264   : > { %v2205_v26 = vpop.f32.mrb[21].mxu1  ;;  %v1221_v27 = vsel %vm1208_vm2, %v1064_v25, -inf }
 0x265   : > { %1222 = vmax.xlane.f32.xlu1 %v1221_v27  ;;  %v1067_v28 = vpop.f32.mrb[22].mxu1 }
 0x266   : > { %v2206_v29 = vpop.f32.mrb[23].mxu1 }
 0x268   : > { %v1211_v45 = vpop.xlane.xlu0 %1210 }
 0x269   : > { %v1233_v46 = vsub.f32 %v880_v61, %v1211_v45 }
 0x26b   : > { %v2708_v30 = vpop.f32.mrb[24].mxu1  ;;  %v1241_v47 = vmul.f32 1.442695, %v1233_v46 }
 0x26c   : > { %v2211_v31 = vpop.f32.mrb[25].mxu1  ;;  %v1224_v32 = vsel %vm1208_vm2, %v2708_v30, -inf }
 0x26d   : > { %1225 = vmax.xlane.f32.xlu0 %v1224_v32  ;;  %v1113_v33 = vpop.f32.mrb[26].mxu1  ;;  %2358 = vpow2.f32 %v1241_v47 }
 0x26e   : > { %v2212_v34 = vpop.f32.mrb[27].mxu1 }
 0x273   : > { %v1156_v35 = vpop.f32.mrb[28].mxu1 }
 0x274   : > { %v2217_v36 = vpop.f32.mrb[29].mxu1  ;;  %v1227_v37 = vsel %vm1208_vm2, %v1156_v35, -inf }
 0x275   : > { %1228 = vmax.xlane.f32.xlu1 %v1227_v37  ;;  %v1159_v38 = vpop.f32.mrb[30].mxu1 }
 0x276   : > { %v2218_v39 = vpop.f32.mrb[31].mxu1 }
 0x277   : > { %v2721_v48 = vpop.eup %2358 }
 0x278   : > { %v1257_v49 = vsel %vm1208_vm2, %v2721_v48, 0.0 }
 0x27b   : > { %v2713_v40 = vpop.f32.mrb[32].mxu1 }
 0x27c   : > { %v2223_v41 = vpop.f32.mrb[33].mxu1  ;;  %v1230_v42 = vsel %vm1208_vm2, %v2713_v40, -inf }
 0x27d   : > { %1231 = vmax.xlane.f32.xlu0 %v1230_v42  ;;  %v1205_v43 = vpop.f32.mrb[34].mxu1 }
 0x27e   : > { %v2224_v44 = vpop.f32.mrb[35].mxu1 }
 0x286   : > { %825 = vrot.lane.b32.xlu1 %v2699_v7, %s2421_s26 }
 0x293   : > { %827 = vrot.lane.b32.xlu0 %v2699_v7, %s2420_s25 }
 0x2aa   : > { %1258 = vadd.xlane.f32.xlu1 %v1257_v49 }
 0x2bb   : > { %829 = vrot.lane.b32.xlu1 %v2699_v7, %s2422_s27 }
 0x2bf   : > { %831 = vrot.lane.b32.xlu1 %v2699_v7, %s2423_s28 }
 0x2da   : > { %v1214_v50 = vpop.xlane.xlu1 %1213 }
 0x2db   : > { %v1234_v51 = vsub.f32 %v926_v9, %v1214_v50 }
 0x2dd   : > { %v1243_v52 = vmul.f32 1.442695, %v1234_v51 }
 0x2df   : > { %2360 = vpow2.f32 %v1243_v52 }
 0x2e2   : > { %v1217_v53 = vpop.xlane.xlu0 %1216 }
 0x2e3   : > { %v1235_v54 = vsub.f32 %v972_v14, %v1217_v53 }
 0x2e5   : > { %v1245_v55 = vmul.f32 1.442695, %v1235_v54 }
 0x2e7   : > { %2362 = vpow2.f32 %v1245_v55 }
 0x2e9   : > { %v2729_v56 = vpop.eup %2360 }
 0x2ea   : > { %v1220_v57 = vpop.xlane.xlu0 %1219  ;;  %v1260_v58 = vsel %vm1208_vm2, %v2729_v56, 0.0 }
 0x2eb   : > { %v1236_v59 = vsub.f32 %v1018_v19, %v1220_v57  ;;  %1261 = vadd.xlane.f32.xlu0 %v1260_v58 }
 0x2ed   : > { %v1247_v60 = vmul.f32 1.442695, %v1236_v59 }
 0x2ef   : > { %2364 = vpow2.f32 %v1247_v60 }
 0x2f1   : > { %v2733_v61 = vpop.eup %2362 }
 0x2f2   : > { %v1223_v62 = vpop.xlane.xlu1 %1222  ;;  %v1263_v63 = vsel %vm1208_vm2, %v2733_v61, 0.0 }
 0x2f3   : > { %v1237_v0 = vsub.f32 %v1064_v25, %v1223_v62  ;;  %1264 = vadd.xlane.f32.xlu1 %v1263_v63 }
 0x2f5   : > { %v1249_v2 = vmul.f32 1.442695, %v1237_v0 }
 0x2f7   : > { %2366 = vpow2.f32 %v1249_v2 }
 0x2f9   : > { %v2737_v3 = vpop.eup %2364 }
 0x2fa   : > { %v1266_v4 = vsel %vm1208_vm2, %v2737_v3, 0.0  ;;  %v1226_v15 = vpop.xlane.xlu0 %1225 }
 0x2fb   : > { %1267 = vadd.xlane.f32.xlu0 %v1266_v4  ;;  %v1238_v16 = vsub.f32 %v2708_v30, %v1226_v15 }
 0x2fd   : > { %v1251_v18 = vmul.f32 1.442695, %v1238_v16 }
 0x301   : > { %v2741_v5 = vpop.eup %2366 }
 0x302   : > { %v1229_v6 = vpop.xlane.xlu1 %1228  ;;  %v1269_v8 = vsel %vm1208_vm2, %v2741_v5, 0.0 }
 0x303   : > { %v1239_v9 = vsub.f32 %v1156_v35, %v1229_v6  ;;  %1270 = vadd.xlane.f32.xlu1 %v1269_v8 }
 0x305   : > { %v1253_v10 = vmul.f32 1.442695, %v1239_v9 }
 0x306   : > { %v826_v11 = vpop.permute.xlu1 %825 }
 0x307   : > { %2368 = vpow2.f32 %v1253_v10  ;;  %v1356_v12 = vsel %vm1308_vm3, %v826_v11, 0 }
 0x308   : > { %2232 = vmatpush3.bf16.msra.mxu1 %v1356_v12  ;;  %2370 = vpow2.f32 %v1251_v18 }
 0x309   : > { %2243 = vmatprep.subr.bf16.mxu1 %v2418_v1 }
 0x30a   : > { %v1232_v17 = vpop.xlane.xlu0 %1231 }
 0x30b   : > { %v1240_v19 = vsub.f32 %v2713_v40, %v1232_v17 }
 0x30d   : > { %v1255_v20 = vmul.f32 1.442695, %v1240_v19 }
 0x30e   : > { %v828_v29 = vpop.permute.xlu0 %827 }
 0x30f   : > { %2372 = vpow2.f32 %v1255_v20  ;;  %v1402_v31 = vsel %vm1308_vm3, %v828_v29, 0 }
 0x311   : > { %v2747_v13 = vpop.eup %2368  ;;  %833 = vrot.lane.b32.xlu0 %v2699_v7, %s2424_s29 }
 0x312   : > { %v1275_v14 = vsel %vm1208_vm2, %v2747_v13, 0.0  ;;  %v2757_v21 = vpop.eup %2370 }
 0x313   : > { %1276 = vadd.xlane.f32.xlu1 %v1275_v14  ;;  %v1272_v23 = vsel %vm1208_vm2, %v2757_v21, 0.0 }
 0x319   : > { %v2761_v24 = vpop.eup %2372 }
 0x31a   : > { %v1278_v25 = vsel %vm1208_vm2, %v2761_v24, 0.0 }
 0x324   : > { %835 = vrot.lane.b32.xlu1 %v2699_v7, %s2895_s15 }
 0x330   : > { %1273 = vadd.xlane.f32.xlu0 %v1272_v23 }
 0x334   : > { %1279 = vadd.xlane.f32.xlu0 %v1278_v25 }
 0x337   : > { %v1259_v26 = vpop.xlane.xlu1 %1258 }
 0x338   : > { %2374 = vrcp.f32 %v1259_v26 }
 0x33b   : > { %v830_v32 = vpop.permute.xlu1 %829 }
 0x33c   : > { %v1448_v39 = vsel %vm1308_vm3, %v830_v32, 0 }
 0x33f   : > { %v832_v34 = vpop.permute.xlu1 %831 }
 0x340   : > { %v1494_v43 = vsel %vm1308_vm3, %v832_v34, 0 }
 0x342   : > { %v2375_v27 = vpop.eup %2374 }
 0x343   : > { %v1289_v28 = vmul.f32 %v2375_v27, %v2721_v48 }
 0x345   : > { %v1297_v30 = vpack.c.bf16 %v1289_v28, %v1289_v28 }
 0x347   : > { %2228 = vmatmul.mubr.msk.bf16.vlgmr.msra.gmra.mrb[8].mxu0 %vm1208_vm2, %v1297_v30 }
 0x348   : > { %2238 = vmatpush3.bf16.msra.mxu0 %v1402_v31  ;;  %2239 = vmatprep.mubr.msk.bf16.mxu0 %vm2419_vm0, %v2418_v1 }
 0x349   : > { %2249 = vmatprep.subr.bf16.mxu0 %v2418_v1 }
 0x34a   : > { %837 = vrot.lane.b32.xlu0 %v2699_v7, %s2896_s18 }
 0x378   : > { %v1262_v33 = vpop.xlane.xlu0 %1261 }
 0x379   : > { %2376 = vrcp.f32 %v1262_v33 }
 0x380   : > { %v1265_v35 = vpop.xlane.xlu1 %1264 }
 0x381   : > { %2378 = vrcp.f32 %v1265_v35 }
 0x383   : > { %v2377_v36 = vpop.eup %2376 }
 0x384   : > { %v1290_v37 = vmul.f32 %v2377_v36, %v2729_v56 }
 0x386   : > { %v1298_v38 = vpack.c.bf16 %v1290_v37, %v1290_v37 }
 0x388   : > { %v1268_v40 = vpop.xlane.xlu0 %1267  ;;  %2234 = vmatmul.mubr.msk.bf16.vlgmr.msra.gmra.mrb[36].mxu1 %vm1208_vm2, %v1298_v38 }
 0x389   : > { %2380 = vrcp.f32 %v1268_v40  ;;  %2244 = vmatpush3.bf16.msra.mxu1 %v1448_v39  ;;  %2245 = vmatprep.mubr.msk.bf16.mxu1 %vm2419_vm0, %v2418_v1 }
 0x38a   : > { %2255 = vmatprep.subr.bf16.mxu1 %v2418_v1 }
 0x38b   : > { %v2379_v7 = vpop.eup %2378 }
 0x38c   : > { %v1291_v41 = vmul.f32 %v2379_v7, %v2733_v61  ;;  %v834_v47 = vpop.permute.xlu0 %833 }
 0x38d   : > { %v1540_v49 = vsel %vm1308_vm3, %v834_v47, 0 }
 0x38e   : > { %v1299_v42 = vpack.c.bf16 %v1291_v41, %v1291_v41 }
 0x390   : > { %v1271_v44 = vpop.xlane.xlu1 %1270  ;;  %2240 = vmatmul.mubr.msk.bf16.vlgmr.msra.gmra.mrb[12].mxu0 %vm1208_vm2, %v1299_v42 }
 0x391   : > { %2382 = vrcp.f32 %v1271_v44  ;;  %2250 = vmatpush3.bf16.msra.mxu0 %v1494_v43  ;;  %2251 = vmatprep.mubr.msk.bf16.mxu0 %vm2419_vm0, %v2418_v1 }
 0x392   : > { %2261 = vmatprep.subr.bf16.mxu0 %v2418_v1 }
 0x393   : > { %v2381_v45 = vpop.eup %2380 }
 0x394   : > { %v1292_v46 = vmul.f32 %v2381_v45, %v2737_v3 }
 0x396   : > { %v1300_v48 = vpack.c.bf16 %v1292_v46, %v1292_v46 }
 0x398   : > { %2246 = vmatmul.mubr.msk.bf16.vlgmr.msra.gmra.mrb[40].mxu1 %vm1208_vm2, %v1300_v48 }
 0x399   : > { %2256 = vmatpush3.bf16.msra.mxu1 %v1540_v49  ;;  %2257 = vmatprep.mubr.msk.bf16.mxu1 %vm2419_vm0, %v2418_v1 }
 0x39a   : > { %2267 = vmatprep.subr.bf16.mxu1 %v2418_v1 }
 0x39b   : > { %v2383_v50 = vpop.eup %2382 }
 0x39c   : > { %v1293_v51 = vmul.f32 %v2383_v50, %v2741_v5 }
 0x39e   : > { %v1301_v52 = vpack.c.bf16 %v1293_v51, %v1293_v51 }
 0x3a0   : > { %v1277_v53 = vpop.xlane.xlu1 %1276  ;;  %2252 = vmatmul.mubr.msk.bf16.vlgmr.msra.gmra.mrb[16].mxu0 %vm1208_vm2, %v1301_v52 }
 0x3a1   : > { %2384 = vrcp.f32 %v1277_v53  ;;  %2263 = vmatprep.mubr.msk.bf16.mxu0 %vm2419_vm0, %v2418_v1 }
 0x3a4   : > { %v836_v54 = vpop.permute.xlu1 %835 }
 0x3a5   : > { %v1586_v55 = vsel %vm1308_vm3, %v836_v54, 0  ;;  %v2350_v54 = vld [vmem:[%s2883_s6] sm:$0xff]  }
 0x3a6   : > { %2262 = vmatpush3.bf16.msra.mxu0 %v1586_v55  ;;  %v2351_v55 = vld [vmem:[%s2883_s6 + $0x8] sm:$0xff]  }
 0x3a7   : > { %2273 = vmatprep.subr.bf16.mxu0 %v2418_v1 }
 0x3ab   : > { %v2385_v56 = vpop.eup %2384 }
 0x3ac   : > { %v1295_v57 = vmul.f32 %v2385_v56, %v2747_v13 }
 0x3ae   : > { %v1303_v58 = vpack.c.bf16 %v1295_v57, %v1295_v57 }
 0x3b0   : > { %2264 = vmatmul.mubr.msk.bf16.vlgmr.msra.gmra.mrb[20].mxu0 %vm1208_vm2, %v1303_v58 }
 0x3b1   : > { %2289 = vmatprep.mubr.msk.bf16.mxu0 %vm2419_vm0, %v2418_v1  ;;  %2274 = vmatpush3.bf16.msra.mxu0 %v2350_v54 }
 0x3b2   : > { %2275 = vmatprep.subr.bf16.mxu0 %v2418_v1 }
 0x3b5   : > { %2276 = vmatpush3.bf16.msra.mxu0 %v2351_v55 }
 0x3b6   : > { %2277 = vmatprep.subr.bf16.mxu0 %v2418_v1 }
 0x3bd   : > { %v1274_v59 = vpop.xlane.xlu0 %1273 }
 0x3be   : > { %2386 = vrcp.f32 %v1274_v59 }
 0x3c1   : > { %v1280_v60 = vpop.xlane.xlu0 %1279 }
 0x3c2   : > { %2388 = vrcp.f32 %v1280_v60  ;;  %v2353_v60 = vld [vmem:[%s2883_s6 + $0x18] sm:$0xff]  }
 0x3c5   : > { %v838_v63 = vpop.permute.xlu0 %837 }
 0x3c6   : > { %v1632_v3 = vsel %vm1308_vm3, %v838_v63, 0  ;;  %v2356_v63 = vld [vmem:[%s2883_s6 + $0x30] sm:$0xff]  }
 0x3c8   : > { %v2387_v61 = vpop.eup %2386 }
 0x3c9   : > { %v1294_v62 = vmul.f32 %v2387_v61, %v2757_v21  ;;  %v2354_v61 = vld [vmem:[%s2883_s6 + $0x20] sm:$0xff]  }
 0x3cb   : > { %v1302_v0 = vpack.c.bf16 %v1294_v62, %v1294_v62  ;;  %v2355_v62 = vld [vmem:[%s2883_s6 + $0x28] sm:$0xff]  }
 0x3cc   : > { %v2389_v2 = vpop.eup %2388 }
 0x3cd   : > { %2258 = vmatmul.mubr.msk.bf16.vlgmr.msra.gmra.mrb[44].mxu1 %vm1208_vm2, %v1302_v0  ;;  %v1296_v4 = vmul.f32 %v2389_v2, %v2761_v24  ;;  %v2357_v0 = vld [vmem:[%s2883_s6 + $0x38] sm:$0xff]  }
 0x3ce   : > { %2268 = vmatpush3.bf16.msra.mxu1 %v1632_v3  ;;  %2269 = vmatprep.mubr.msk.bf16.mxu1 %vm2419_vm0, %v2418_v1 }
 0x3cf   : > { %v1304_v5 = vpack.c.bf16 %v1296_v4, %v1296_v4 }
 0x3d5   : > { %2270 = vmatmul.mubr.msk.bf16.vlgmr.msra.gmra.mrb[48].mxu1 %vm1208_vm2, %v1304_v5 }
 0x41a   : > { %v1346_v6 = vpop.f32.mrb[8].mxu0 }
 0x41b   : > { %v2229_v8 = vpop.f32.mrb[9].mxu0 }
 0x41c   : > { %v1349_v9 = vpop.f32.mrb[10].mxu0 }
 0x41d   : > { %v2230_v10 = vpop.f32.mrb[11].mxu0  ;;  %v2035_v9 = vld [vmem:[%s2886_s9] ss:$0 sm:$0xff] }
 0x45b   : > { %v1392_v11 = vpop.f32.mrb[36].mxu1 }
 0x45c   : > { %1675 = vrot.lane.b32.xlu1 %v1392_v11, %s2896_s18  ;;  %v2235_v12 = vpop.f32.mrb[37].mxu1 }
 0x45d   : > { %v1395_v13 = vpop.f32.mrb[38].mxu1 }
 0x45e   : > { %v2236_v14 = vpop.f32.mrb[39].mxu1 }
 0x463   : > { %v1438_v15 = vpop.f32.mrb[12].mxu0 }
 0x464   : > { %1679 = vrot.lane.b32.xlu0 %v1438_v15, %s2895_s15  ;;  %v2241_v16 = vpop.f32.mrb[13].mxu0  ;;  %s2897_s15 = sshll.u32 %s2903_s21, 2 }
 0x465   : > { %v1441_v17 = vpop.f32.mrb[14].mxu0 }
 0x466   : > { %v2242_v18 = vpop.f32.mrb[15].mxu0 }
 0x46b   : > { %v1484_v19 = vpop.f32.mrb[40].mxu1 }
 0x46c   : > { %1683 = vrot.lane.b32.xlu1 %v1484_v19, %s2424_s29  ;;  %v2247_v20 = vpop.f32.mrb[41].mxu1 }
 0x46d   : > { %v1487_v21 = vpop.f32.mrb[42].mxu1 }
 0x46e   : > { %v2248_v23 = vpop.f32.mrb[43].mxu1 }
 0x473   : > { %v1530_v24 = vpop.f32.mrb[16].mxu0 }
 0x474   : > { %1687 = vrot.lane.b32.xlu0 %v1530_v24, %s2423_s28  ;;  %v2253_v25 = vpop.f32.mrb[17].mxu0 }
 0x475   : > { %v1533_v26 = vpop.f32.mrb[18].mxu0 }
 0x476   : > { %v2254_v27 = vpop.f32.mrb[19].mxu0 }
 0x483   : > { %v1622_v28 = vpop.f32.mrb[20].mxu0 }
 0x484   : > { %1695 = vrot.lane.b32.xlu0 %v1622_v28, %s2420_s25  ;;  %v2265_v29 = vpop.f32.mrb[21].mxu0 }
 0x485   : > { %v1625_v30 = vpop.f32.mrb[22].mxu0  ;;  %v2045_v29 = vld [vmem:[%s2887_s10] ss:$0 sm:$0xff] }
 0x486   : > { %v2266_v31 = vpop.f32.mrb[23].mxu0 }
 0x487   : > { %v2046_v31 = vld [vmem:[%s2888_s11] ss:$0 sm:$0xff] }
 0x4a0   : > { %v1576_v32 = vpop.f32.mrb[44].mxu1 }
 0x4a1   : > { %1691 = vrot.lane.b32.xlu1 %v1576_v32, %s2422_s27  ;;  %v2259_v33 = vpop.f32.mrb[45].mxu1 }
 0x4a2   : > { %v1579_v34 = vpop.f32.mrb[46].mxu1 }
 0x4a3   : > { %v2260_v35 = vpop.f32.mrb[47].mxu1 }
 0x4a8   : > { %v1668_v36 = vpop.f32.mrb[48].mxu1 }
 0x4a9   : > { %1699 = vrot.lane.b32.xlu1 %v1668_v36, %s2421_s26  ;;  %v2271_v37 = vpop.f32.mrb[49].mxu1  ;;  %s473_s26 = scalar_lea.vmem %s2889_s12, %s2897_s15 }
 0x4aa   : > { %v1671_v38 = vpop.f32.mrb[50].mxu1 }
 0x4ab   : > { %v2272_v39 = vpop.f32.mrb[51].mxu1 }
 0x4ce   : > { %v1676_v40 = vpop.permute.xlu1 %1675 }
 0x4cf   : > { %v1702_v42 = vsel %vm839_vm1, %v1346_v6, %v1676_v40  ;;  %v2034_v6 = vld [vmem:[%s2885_s8] ss:$0 sm:$0xff] }
 0x4d6   : > { %v1680_v7 = vpop.permute.xlu0 %1679 }
 0x4d7   : > { %v1704_v44 = vsel %vm1703_vm4, %v1702_v42, %v1680_v7 }
 0x4de   : > { %v1684_v41 = vpop.permute.xlu1 %1683 }
 0x4df   : > { %v1706_v46 = vsel %vm1705_vm5, %v1704_v44, %v1684_v41 }
 0x4e6   : > { %v1688_v43 = vpop.permute.xlu0 %1687 }
 0x4e7   : > { %v1708_v47 = vsel %vm1707_vm6, %v1706_v46, %v1688_v43 }
 0x4f6   : > { %v1696_v49 = vpop.permute.xlu0 %1695 }
 0x513   : > { %v1692_v45 = vpop.permute.xlu1 %1691 }
 0x514   : > { %v1710_v48 = vsel %vm1709_vm7, %v1708_v47, %v1692_v45 }
 0x515   : > { %v1712_v51 = vsel %vm1711_vm8, %v1710_v48, %v1696_v49 }
 0x51b   : > { %v1700_v50 = vpop.permute.xlu1 %1699 }
 0x51c   : > { %v1714_v52 = vsel %vm1713_vm9, %v1712_v51, %v1700_v50 }
 0x51d   : > { %v1715_v53 = vadd.f32 %v1714_v52, %v2602_v22  ;;  %v2352_v22 = vld [vmem:[%s2883_s6 + $0x10] sm:$0xff]  }
 0x51e   : > { %2278 = vmatpush3.bf16.msra.mxu0 %v2352_v22 }
 0x51f   : > { %1718 = vadd.xlane.f32.xlu0 %v1715_v53  ;;  %2279 = vmatprep.subr.bf16.mxu0 %v2418_v1 }
 0x522   : > { %2280 = vmatpush3.bf16.msra.mxu0 %v2353_v60 }
 0x523   : > { %2281 = vmatprep.subr.bf16.mxu0 %v2418_v1 }
 0x526   : > { %2282 = vmatpush3.bf16.msra.mxu0 %v2354_v61 }
 0x527   : > { %2283 = vmatprep.subr.bf16.mxu0 %v2418_v1 }
 0x52a   : > { %2284 = vmatpush3.bf16.msra.mxu0 %v2355_v62 }
 0x52b   : > { %2285 = vmatprep.subr.bf16.mxu0 %v2418_v1 }
 0x52e   : > { %2286 = vmatpush3.bf16.msra.mxu0 %v2356_v63 }
 0x52f   : > { %2287 = vmatprep.subr.bf16.mxu0 %v2418_v1  ;;  %v2036_v1 = vld [vmem:[%s2884_s7] ss:$0 sm:$0xff] }
 0x532   : > { %2288 = vmatpush3.bf16.msra.mxu0 %v2357_v0 }
 0x5ac   : > { %v1719_v56 = vpop.xlane.xlu0 %1718 }
 0x5ad   : > { %v1721_v57 = vmul.f32 0.0078125, %v1719_v56 }
 0x5af   : > { %v1722_v58 = vsub.f32 %v1715_v53, %v1721_v57 }
 0x5b1   : > { %v1723_v59 = vmul.f32 %v1722_v58, %v1722_v58 }
 0x5b3   : > { %1724 = vadd.xlane.f32.xlu1 %v1723_v59 }
 0x640   : > { %v1725_v2 = vpop.xlane.xlu1 %1724 }
 0x641   : > { %v1726_v3 = vmul.f32 0.0078125, %v1725_v2 }
 0x643   : > { %v1727_v4 = vadd.f32 1e-05, %v1726_v3 }
 0x645   : > { %2390 = vrsqrt.f32 %v1727_v4 }
 0x64f   : > { %v2391_v5 = vpop.eup %2390 }
 0x650   : > { %v1729_v8 = vmul.f32 %v2391_v5, %v1722_v58 }
 0x652   : > { %v1736_v10 = vmul.f32 %v2034_v6, %v1729_v8 }
 0x654   : > { %v1743_v11 = vadd.f32 %v2035_v9, %v1736_v10 }
 0x656   : > { %v1744_v12 = vpack.c.bf16 %v1743_v11, %v1743_v11 }
 0x658   : > { %2290 = vmatmul.mubr.bf16.vlgmr.msra.gmra.mrb[24].mxu0 %v1744_v12 }
 0x72b   : > { %v1850_v13 = vpop.f32.mrb[24].mxu0 }
 0x72c   : > { %v1851_v14 = vadd.f32 %v2036_v1, %v1850_v13  ;;  %v2291_v15 = vpop.f32.mrb[25].mxu0 }
 0x72d   : > { %v1853_v16 = vpop.f32.mrb[26].mxu0 }
 0x72e   : > { %v1856_v17 = vmax.f32 %v1851_v14, 0.0  ;;  %v2292_v18 = vpop.f32.mrb[27].mxu0 }
 0x730   : > { %v1857_v19 = vadd.f32 %v1856_v17, %v1743_v11 }
 0x732   : > { %1860 = vadd.xlane.f32.xlu0 %v1857_v19 }
 0x7bf   : > { %v1861_v20 = vpop.xlane.xlu0 %1860 }
 0x7c0   : > { %v1862_v21 = vmul.f32 0.0078125, %v1861_v20 }
 0x7c2   : > { %v1863_v23 = vsub.f32 %v1857_v19, %v1862_v21 }
 0x7c4   : > { %v1864_v24 = vmul.f32 %v1863_v23, %v1863_v23 }
 0x7c6   : > { %1865 = vadd.xlane.f32.xlu0 %v1864_v24 }
 0x853   : > { %v1866_v25 = vpop.xlane.xlu0 %1865 }
 0x854   : > { %v1867_v26 = vmul.f32 0.0078125, %v1866_v25 }
 0x856   : > { %v1868_v27 = vadd.f32 1e-05, %v1867_v26 }
 0x858   : > { %2392 = vrsqrt.f32 %v1868_v27 }
 0x862   : > { %v2393_v28 = vpop.eup %2392 }
 0x863   : > { %v1870_v30 = vmul.f32 %v2393_v28, %v1863_v23 }
 0x865   : > { %v1877_v32 = vmul.f32 %v2045_v29, %v1870_v30 }
 0x867   : > { %v1884_v33 = vadd.f32 %v2046_v31, %v1877_v32 }
 0x869   : > { %v1885_v34 = vpack.c.bf16 %v1884_v33, %v1884_v33 }
 0x86b   : > { %1886 = vst [vmem:[%s473_s26] sm:$0xf] %v1885_v34 }
 0x86c PF: > { %s22_s23 = sadd.s32 1, %s2416_s23   ;;  %s2898_s21 = smov %s2412_s22 }
 0x86d   : > { %p19_p5 = scmp.ge.s32.totalorder %s22_s23, 4   ;;  %s2899_s22 = smov %s2901_s24 }
 0x86f   :  { %21 = sbr.rel (!%p19_p5) target bundleno = 2 (0x2), region = 104 }

// kernel: _lambda_.15
= control target key start
LH: loop header
LB: loop body
LE: loop exit
PB: predicated region body
PF: predicated region fallthrough
CT: control target
= control target key end

     0   :  { %s855_s24 = smov 0   ;;  %s960_s0 = inlined_call_operand.vmem [shape: bf16[16,256], index: 0, kind: input, shape index: {}]   ;;  %s961_s1 = inlined_call_operand.vmem [shape: f32[16,1], index: 1, kind: input, shape index: {}]   ;;  %s962_s2 = inlined_call_operand.vmem [shape: f32[1,128], index: 2, kind: input, shape index: {}]   ;;  %s963_s3 = inlined_call_operand.vmem [shape: bf16[256,128], index: 3, kind: input, shape index: {}]   ;;  %s964_s4 = inlined_call_operand.vmem [shape: f32[1,128], index: 4, kind: input, shape index: {}]   ;;  %s965_s5 = inlined_call_operand.vmem [shape: bf16[128,128], index: 5, kind: input, shape index: {}]   ;;  %s966_s6 = inlined_call_operand.vmem [shape: f32[1,128], index: 6, kind: input, shape index: {}]   ;;  %s967_s7 = inlined_call_operand.vmem [shape: bf16[16,128], index: 7, kind: output, shape index: {}]  }
   0x1 LB: > { %s674_s25 = sadd.s32 4294967295, %s810_s24   ;;  %p678_p0 = scmp.ge.s32.totalorder %s810_s24, 1  ;;  %s810_s24 = sphi %s855_s24, %s17_s24  }
   0x2   : > { %p246_p1 = scmp.lt.s32.totalorder %s810_s24, 3 }
   0x4   : > { %p247_p2 = pnand %p678_p0, %p246_p1 }
   0x5   : > { %v778_v0 = vld [vmem:[%s963_s3 + $0x40] sm:$0xff] (!%p247_p2)   ;;  %v780_v2 = vld [vmem:[%s963_s3 + $0x48] sm:$0xff] (!%p247_p2)   ;;  %p281_p3 = scmp.lt.s32.totalorder (!%p247_p2), %s674_s25, 1  ;;  %v812_v3 = vmov (!%p247_p2), 0   ;;  %v782_v5 = vld [vmem:[%s963_s3 + $0x50] sm:$0xff] (!%p247_p2)   ;;  %v813_v6 = vmov (!%p247_p2), 0.0  }
   0x6   : > { %250 = sbr.rel (%p247_p2) target bundleno = 480 (0x1e0), region = 48  ;;  %v779_v1 = vld [vmem:[%s963_s3] sm:$0xff] (!%p247_p2)   ;;  %715 = vmatprep.subr.bf16.mxu0 (!%p247_p2), %v778_v0  ;;  %777 = vset.pattern.permute.xlu0 (!%p247_p2), %v812_v3  ;;  %v781_v4 = vld [vmem:[%s963_s3 + $0x8] sm:$0xff] (!%p247_p2)   ;;  %v783_v7 = vld [vmem:[%s963_s3 + $0x10] sm:$0xff] (!%p247_p2)   ;;  %vm814_vm0 = vmmov (!%p247_p2), 0  }
   0x7   : > { %716 = vmatpush3.bf16.msra.mxu0 (!%p247_p2), %v779_v1  ;;  %746 = vmatprep.subr.bf16.mxu1 (!%p247_p2), %v813_v6  ;;  %v784_v8 = vld [vmem:[%s963_s3 + $0x58] sm:$0xff] (!%p247_p2)   ;;  %v786_v10 = vld [vmem:[%s963_s3 + $0x60] sm:$0xff] (!%p247_p2)   ;;  %v788_v12 = vld [vmem:[%s963_s3 + $0x68] sm:$0xff] (!%p247_p2)  }
   0x8   : > { %717 = vmatprep.subr.bf16.mxu0 (!%p247_p2), %v780_v2  ;;  %v785_v9 = vld [vmem:[%s963_s3 + $0x18] sm:$0xff] (!%p247_p2)   ;;  %v787_v11 = vld [vmem:[%s963_s3 + $0x20] sm:$0xff] (!%p247_p2)   ;;  %v789_v17 = vld [vmem:[%s963_s3 + $0x28] sm:$0xff] (!%p247_p2)   ;;  %762 = vmatprep.mubr.msk.bf16.mxu1 (!%p247_p2), %vm814_vm0, %v813_v6 }
   0x9   : > { %v796_v16 = vld [vmem:[%s965_s5] sm:$0xff] (!%p247_p2)   ;;  %v790_v18 = vld [vmem:[%s963_s3 + $0x70] sm:$0xff] (!%p247_p2)   ;;  %v797_v19 = vld [vmem:[%s965_s5 + $0x8] sm:$0xff] (!%p247_p2)  }
   0xa   : > { %747 = vmatpush3.bf16.msra.mxu1 (!%p247_p2), %v796_v16  ;;  %v791_v20 = vld [vmem:[%s963_s3 + $0x30] sm:$0xff] (!%p247_p2)   ;;  %v792_v21 = vld [vmem:[%s963_s3 + $0x78] sm:$0xff] (!%p247_p2)   ;;  %v800_v26 = vld [vmem:[%s965_s5 + $0x20] sm:$0xff] (!%p247_p2)  }
   0xb   : > { %718 = vmatpush3.bf16.msra.mxu0 (!%p247_p2), %v781_v4  ;;  %748 = vmatprep.subr.bf16.mxu1 (!%p247_p2), %v813_v6  ;;  %v798_v22 = vld [vmem:[%s965_s5 + $0x10] sm:$0xff] (!%p247_p2)   ;;  %v793_v23 = vld [vmem:[%s963_s3 + $0x38] sm:$0xff] (!%p247_p2)   ;;  %v801_v27 = vld [vmem:[%s965_s5 + $0x28] sm:$0xff] (!%p247_p2)  }
   0xc   : > { %719 = vmatprep.subr.bf16.mxu0 (!%p247_p2), %v782_v5  ;;  %v799_v24 = vld [vmem:[%s965_s5 + $0x18] sm:$0xff] (!%p247_p2)   ;;  %v802_v28 = vld [vmem:[%s965_s5 + $0x30] sm:$0xff] (!%p247_p2)   ;;  %v702_v30 = vld [vmem:[%s962_s2] ss:$0 sm:$0xff] (!%p247_p2) }
   0xd   : > { %s969_s25 = smov (!%p281_p3, %s674_s25), 1  ;;  %v803_v29 = vld [vmem:[%s965_s5 + $0x38] sm:$0xff]   ;;  %v683_v33 = vld [vmem:[%s964_s4] ss:$0 sm:$0xff] }
   0xe   : > { %s714_s17 = sshll.u32 %s969_s25, 3  ;;  %749 = vmatpush3.bf16.msra.mxu1 %v797_v19  ;;  %v703_v43 = vld [vmem:[%s966_s6] ss:$0 sm:$0xff]  ;;  %s682_s22 = sshll.u32 %s969_s25, 2 }
   0xf   : > { %720 = vmatpush3.bf16.msra.mxu0 %v783_v7  ;;  %s285_s26 = scalar_lea.vmem %s960_s0, %s714_s17  ;;  %s289_s29 = scalar_lea.vmem %s961_s1, %s714_s17  ;;  %750 = vmatprep.subr.bf16.mxu1 %v813_v6 }
  0x10   : > { %721 = vmatprep.subr.bf16.mxu0 %v784_v8  ;;  %v295_v13 = vld [vmem:[%s285_s26] sm:$0xff]  ;;  %s293_s27 = scalar_lea.vmem %s967_s7, %s682_s22 }
  0x11   : > { %v478_v14 = vld [vmem:[%s289_s29] sm:$0xff]  ;;  %v685_v15 = vcombine.high %v295_v13, %v295_v13  ;;  %v684_v25 = vcombine.low %v295_v13, %v295_v13 }
  0x12   : > { %482 = vperm.xlu0 %777, %v478_v14   ;;  %751 = vmatpush3.bf16.msra.mxu1 %v798_v22 }
  0x13   : > { %722 = vmatpush3.bf16.msra.mxu0 %v785_v9  ;;  %470 = vmatprep.mubr.bf16.mxu0 %v685_v15 }
  0x14   : > { %723 = vmatprep.subr.bf16.mxu0 %v786_v10  ;;  %752 = vmatprep.subr.bf16.mxu1 %v813_v6 }
  0x16   : > { %753 = vmatpush3.bf16.msra.mxu1 %v799_v24 }
  0x17   : > { %724 = vmatpush3.bf16.msra.mxu0 %v787_v11  ;;  %754 = vmatprep.subr.bf16.mxu1 %v813_v6 }
  0x18   : > { %725 = vmatprep.subr.bf16.mxu0 %v788_v12 }
  0x1a   : > { %755 = vmatpush3.bf16.msra.mxu1 %v800_v26 }
  0x1b   : > { %726 = vmatpush3.bf16.msra.mxu0 %v789_v17  ;;  %756 = vmatprep.subr.bf16.mxu1 %v813_v6 }
  0x1c   : > { %727 = vmatprep.subr.bf16.mxu0 %v790_v18 }
  0x1e   : > { %757 = vmatpush3.bf16.msra.mxu1 %v801_v27 }
  0x1f   : > { %728 = vmatpush3.bf16.msra.mxu0 %v791_v20  ;;  %758 = vmatprep.subr.bf16.mxu1 %v813_v6 }
  0x20   : > { %729 = vmatprep.subr.bf16.mxu0 %v792_v21 }
  0x22   : > { %759 = vmatpush3.bf16.msra.mxu1 %v802_v28 }
  0x23   : > { %730 = vmatpush3.bf16.msra.mxu0 %v793_v23  ;;  %760 = vmatprep.subr.bf16.mxu1 %v813_v6 }
  0x26   : > { %471 = vmatmul.mubr.bf16.vlgmr.msra.gmra.mrb[0].mxu0 %v684_v25  ;;  %761 = vmatpush3.bf16.msra.mxu1 %v803_v29 }
  0x91   : > { %v483_v31 = vpop.permute.xlu0 %482 }
  0x92   : > { %v491_v37 = vmul.f32 %v702_v30, %v483_v31 }
  0xf9   : > { %v731_v32 = vpop.f32.mrb[0].mxu0 }
  0xfa   : > { %v732_v34 = vpop.f32.mrb[1].mxu0 }
  0xfb   : > { %v733_v35 = vadd.f32 %v732_v34, %v731_v32  ;;  %v734_v36 = vpop.f32.mrb[2].mxu0 }
  0xfc   : > { %v735_v38 = vpop.f32.mrb[3].mxu0 }
  0xfd   : > { %v473_v39 = vadd.f32 %v733_v35, %v683_v33 }
  0xff   : > { %v492_v40 = vadd.f32 %v491_v37, %v473_v39 }
 0x101   : > { %v493_v41 = vmax.f32 %v492_v40, 0.0 }
 0x103   : > { %v494_v42 = vpack.c.bf16 %v493_v41, %v493_v41 }
 0x105   : > { %763 = vmatmul.mubr.bf16.vlgmr.msra.gmra.mrb[0].mxu1 %v494_v42 }
 0x1d8   : > { %v600_v44 = vpop.f32.mrb[0].mxu1 }
 0x1d9   : > { %v601_v45 = vadd.f32 %v703_v43, %v600_v44  ;;  %v764_v46 = vpop.f32.mrb[1].mxu1 }
 0x1da   : > { %v603_v47 = vpop.f32.mrb[2].mxu1 }
 0x1db   : > { %v606_v48 = vmax.f32 %v601_v45, 0.0  ;;  %v765_v49 = vpop.f32.mrb[3].mxu1 }
 0x1dd   : > { %v607_v50 = vpack.c.bf16 %v606_v48, %v606_v48 }
 0x1df   : > { %608 = vst [vmem:[%s293_s27] sm:$0xf] %v607_v50 }
 0x1e0 PF: > { %s17_s24 = sadd.s32 1, %s810_s24  }
 0x1e1   : > { %p14_p4 = scmp.ge.s32.totalorder %s17_s24, 4  }
 0x1e3   :  { %16 = sbr.rel (!%p14_p4) target bundleno = 1 (0x1), region = 81 }

</bundles_post_ra>
